<compile_context>
chip_gen: v6e
topology: v6e:2x2x1
jax: 0.10.0
libtpu: 0.0.40
codegen_flags: <defaults>
</compile_context>

<pallas_src>
import functools
import math

import jax
import jax.numpy as jnp
from jax.experimental import pallas as pl
from jax.experimental.pallas import tpu as pltpu

EPS = 1e-5            # nn.BatchNorm2d default eps
C1 = 256              # Augmentor inplane
PLANES = 64           # Bottleneck planes
PLANES_PAD = 128      # 64 -> 128 lane padding
K1 = 7 * 7 * 3        # conv1 im2col K (147)
K1_PAD = 160          # K padded to a sublane multiple (was 256: wasted bytes)
TM = 512              # conv1 matmul row tile (perf review: 512-1024)
VMEM_LIMIT = 48 * 1024 * 1024   # > v5e default 16 MiB, < v7x physical 64 MiB


def _compiler_params():
    return pltpu.CompilerParams(
        dimension_semantics=("parallel",),
        vmem_limit_bytes=VMEM_LIMIT,
    )


# ----------------------------------------------------------------------------
# Kernels
# ----------------------------------------------------------------------------
def conv1_matmul_bn_relu_kernel(a_ref, w_ref, s_ref, b_ref, o_ref):
    # [TM, K] bf16 x [K, 256] bf16 -> f32 -> BN -> ReLU -> bf16 store.
    acc = jnp.dot(a_ref[...], w_ref[...], preferred_element_type=jnp.float32)
    o_ref[...] = jnp.maximum(acc * s_ref[...] + b_ref[...], 0.0).astype(o_ref.dtype)


def bottleneck_head_kernel(yph_ref, w1_ref, s1_ref, b1_ref,
                           w2p_ref, w2l_ref, s2_ref, b2_ref,
                           w3_ref, s3_ref, b3_ref, cls_ref,
                           o_ref, xpad_ref):
    # Fully fused per-batch tail:
    #   3x3/s2 maxpool (from the 4 stride-2 phases of the zero-padded conv1
    #   output; zero padding is exact because the input is post-ReLU >= 0)
    #   -> 1x1 conv + BN + ReLU
    #   -> 3x3 conv (halo built in VMEM scratch; taps paired to K=256) + BN + ReLU
    #   -> 1x1 conv + BN + residual add + ReLU -> GAP -> classifier -> sigmoid.
    # Nothing between the conv1 activation and the logits touches HBM.
    hp = xpad_ref.shape[0] - 2
    wp = xpad_ref.shape[1] - 2
    cp = xpad_ref.shape[2]                 # 128 (lane-padded bottleneck width)
    c1 = yph_ref.shape[3]                  # 256
    m = hp * wp

    # ---- maxpool 3x3 / stride 2 from the 4 phase views (bf16) --------------
    mx = yph_ref[0, 0:hp, 0:wp, :]
    for dy in range(3):
        for dx in range(3):
            if dy == 0 and dx == 0:
                continue
            p = (dy % 2) * 2 + (dx % 2)
            qy, qx = dy // 2, dx // 2
            mx = jnp.maximum(mx, yph_ref[p, qy:qy + hp, qx:qx + wp, :])
    pooled = mx.reshape(m, c1)             # bf16; also the residual

    # ---- bottleneck conv1 (1x1) + BN + ReLU ---------------------------------
    o1 = jnp.dot(pooled, w1_ref[...], preferred_element_type=jnp.float32)
    o1 = jnp.maximum(o1 * s1_ref[...] + b1_ref[...], 0.0).astype(jnp.bfloat16)

    # ---- zero-padded halo built in VMEM (no HBM roundtrip) ------------------
    xpad_ref[...] = jnp.zeros_like(xpad_ref)
    xpad_ref[1:hp + 1, 1:wp + 1, :] = o1.reshape(hp, wp, cp)

    # ---- bottleneck conv2 (3x3 s1): taps paired to K=256 for the MXU -------
    acc2 = jnp.zeros((m, cp), jnp.float32)
    for pi in range(4):
        dy0, dx0 = divmod(2 * pi, 3)
        dy1, dx1 = divmod(2 * pi + 1, 3)
        t0 = xpad_ref[dy0:dy0 + hp, dx0:dx0 + wp, :].reshape(m, cp)
        t1 = xpad_ref[dy1:dy1 + hp, dx1:dx1 + wp, :].reshape(m, cp)
        tpair = jnp.concatenate([t0, t1], axis=-1)           # [m, 256]
        acc2 = acc2 + jnp.dot(tpair, w2p_ref[pi],
                              preferred_element_type=jnp.float32)
    t8 = xpad_ref[2:2 + hp, 2:2 + wp, :].reshape(m, cp)       # last (odd) tap
    acc2 = acc2 + jnp.dot(t8, w2l_ref[...], preferred_element_type=jnp.float32)
    o2 = jnp.maximum(acc2 * s2_ref[...] + b2_ref[...], 0.0).astype(jnp.bfloat16)

    # ---- conv3 (1x1) + BN + residual + ReLU + GAP + classifier + sigmoid ---
    acc3 = jnp.dot(o2, w3_ref[...], preferred_element_type=jnp.float32)
    o3 = jnp.maximum(acc3 * s3_ref[...] + b3_ref[...]
                     + pooled.astype(jnp.float32), 0.0)       # [m, 256]
    gap = jnp.mean(o3, axis=0, keepdims=True)                 # [1, 256]
    logits = jnp.dot(gap.astype(jnp.bfloat16), cls_ref[...],
                     preferred_element_type=jnp.float32)      # [1, NCp]
    o_ref[0] = 0.5 * (jnp.tanh(0.5 * logits) + 1.0)   # numerically stable sigmoid


# ----------------------------------------------------------------------------
# Wrapper-side glue (pure data movement, all in bf16)
# ----------------------------------------------------------------------------
def _im2col(x_nhwc, kh, kw, stride, pad):
    B, H, W, C = x_nhwc.shape
    xp = jnp.pad(x_nhwc, ((0, 0), (pad, pad), (pad, pad), (0, 0)))
    Ho = (H + 2 * pad - kh) // stride + 1
    Wo = (W + 2 * pad - kw) // stride + 1
    cols = []
    for dy in range(kh):
        for dx in range(kw):
            cols.append(
                xp[:, dy:dy + stride * (Ho - 1) + 1:stride,
                      dx:dx + stride * (Wo - 1) + 1:stride, :]
            )
    patches = jnp.concatenate(cols, axis=-1)    # (dy, dx, cin) order
    return patches.reshape(B * Ho * Wo, kh * kw * C), (B, Ho, Wo)


# ----------------------------------------------------------------------------
# Parameters (deterministic, matches PyTorch __init__ initialization scheme)
# ----------------------------------------------------------------------------
def init_params(key, num_classes):
    ks = jax.random.split(key, 5)

    def conv_w(k, kh, kw, cin, cout):
        # PyTorch: normal(0, sqrt(2 / (kh*kw*out_channels)))
        std = math.sqrt(2.0 / (kh * kw * cout))
        return jax.random.normal(k, (kh, kw, cin, cout), jnp.float32) * std

    def bn_fold(c):
        # gamma=1, beta=0, running_mean=0, running_var=1 -> y = x / sqrt(1+eps)
        scale = jnp.full((1, c), 1.0 / math.sqrt(1.0 + EPS), jnp.float32)
        bias = jnp.zeros((1, c), jnp.float32)
        return scale, bias

    w1 = conv_w(ks[0], 7, 7, 3, C1).reshape(K1, C1)
    w1 = jnp.pad(w1, ((0, K1_PAD - K1), (0, 0)))                     # [160, 256]

    wb1 = conv_w(ks[1], 1, 1, C1, PLANES).reshape(C1, PLANES)
    wb1 = jnp.pad(wb1, ((0, 0), (0, PLANES_PAD - PLANES)))           # [256, 128]

    wb2 = conv_w(ks[2], 3, 3, PLANES, PLANES).reshape(9, PLANES, PLANES)
    wb2 = jnp.pad(wb2, ((0, 0), (0, PLANES_PAD - PLANES),
                        (0, PLANES_PAD - PLANES)))                   # [9, 128, 128]
    wb2_pairs = wb2[:8].reshape(4, 2 * PLANES_PAD, PLANES_PAD)       # [4, 256, 128]
    wb2_last = wb2[8]                                                # [128, 128]

    wb3 = conv_w(ks[3], 1, 1, PLANES, C1).reshape(PLANES, C1)
    wb3 = jnp.pad(wb3, ((0, PLANES_PAD - PLANES), (0, 0)))           # [128, 256]

    nc_pad = pl.cdiv(num_classes, 128) * 128
    wc = jax.random.normal(ks[4], (C1, num_classes), jnp.float32) * 0.001
    wc = jnp.pad(wc, ((0, 0), (0, nc_pad - num_classes)))            # [256, NCp]

    return {
        "conv1_w": w1.astype(jnp.bfloat16),
        "b_conv1_w": wb1.astype(jnp.bfloat16),
        "b_conv2_wp": wb2_pairs.astype(jnp.bfloat16),
        "b_conv2_wl": wb2_last.astype(jnp.bfloat16),
        "b_conv3_w": wb3.astype(jnp.bfloat16),
        "cls_w": wc.astype(jnp.bfloat16),
        "bn1": bn_fold(C1),
        "b_bn1": bn_fold(PLANES_PAD),
        "b_bn2": bn_fold(PLANES_PAD),
        "b_bn3": bn_fold(C1),
    }


# ----------------------------------------------------------------------------
# Forward pass
# ----------------------------------------------------------------------------
def augmentor_forward(params, x_nchw, *, num_classes):
    # NCHW -> NHWC in bf16 (all wrapper-side data movement stays bf16).
    x = jnp.transpose(x_nchw, (0, 2, 3, 1)).astype(jnp.bfloat16)

    # ---- conv1 (7x7 s2 p3) + bn1 + relu : row-tiled bf16 im2col matmul -----
    a, (B, Ho, Wo) = _im2col(x, 7, 7, 2, 3)
    M1 = a.shape[0]
    M1p = pl.cdiv(M1, TM) * TM
    a = jnp.pad(a, ((0, M1p - M1), (0, K1_PAD - a.shape[1])))        # bf16
    s1, b1 = params["bn1"]
    y = pl.pallas_call(
        conv1_matmul_bn_relu_kernel,
        grid=(M1p // TM,),
        in_specs=[
            pl.BlockSpec((TM, K1_PAD), lambda i: (i, 0)),
            pl.BlockSpec((K1_PAD, C1), lambda i: (0, 0)),   # resident weight
            pl.BlockSpec((1, C1), lambda i: (0, 0)),
            pl.BlockSpec((1, C1), lambda i: (0, 0)),
        ],
        out_specs=pl.BlockSpec((TM, C1), lambda i: (i, 0)),
        out_shape=jax.ShapeDtypeStruct((M1p, C1), jnp.bfloat16),
        compiler_params=_compiler_params(),
    )(a, params["conv1_w"], s1, b1)
    y = y[:M1].reshape(B, Ho, Wo, C1)                                # bf16

    # ---- phase-split of the zero-padded conv1 output (bf16 re-layout) ------
    assert Ho % 2 == 0 and Wo % 2 == 0, "phase-split maxpool expects even dims"
    Hp, Wp = Ho // 2, Wo // 2
    Hph, Wph = Hp + 1, Wp + 1
    # zero padding is exact for max because y >= 0 (post-ReLU invariant)
    y_pad = jnp.pad(y, ((0, 0), (1, 1), (1, 1), (0, 0)))
    phases = jnp.stack(
        [y_pad[:, py::2, px::2, :] for py in (0, 1) for px in (0, 1)], axis=1
    ).reshape(B * 4, Hph, Wph, C1)

    # ---- fused: maxpool + full bottleneck + GAP + classifier + sigmoid -----
    nc_pad = params["cls_w"].shape[1]
    s_b1, b_b1 = params["b_bn1"]
    s_b2, b_b2 = params["b_bn2"]
    s_b3, b_b3 = params["b_bn3"]
    probs = pl.pallas_call(
        bottleneck_head_kernel,
        grid=(B,),
        in_specs=[
            pl.BlockSpec((4, Hph, Wph, C1), lambda i: (i, 0, 0, 0)),
            pl.BlockSpec((C1, PLANES_PAD), lambda i: (0, 0)),
            pl.BlockSpec((1, PLANES_PAD), lambda i: (0, 0)),
            pl.BlockSpec((1, PLANES_PAD), lambda i: (0, 0)),
            pl.BlockSpec((4, 2 * PLANES_PAD, PLANES_PAD), lambda i: (0, 0, 0)),
            pl.BlockSpec((PLANES_PAD, PLANES_PAD), lambda i: (0, 0)),
            pl.BlockSpec((1, PLANES_PAD), lambda i: (0, 0)),
            pl.BlockSpec((1, PLANES_PAD), lambda i: (0, 0)),
            pl.BlockSpec((PLANES_PAD, C1), lambda i: (0, 0)),
            pl.BlockSpec((1, C1), lambda i: (0, 0)),
            pl.BlockSpec((1, C1), lambda i: (0, 0)),
            pl.BlockSpec((C1, nc_pad), lambda i: (0, 0)),
        ],
        out_specs=pl.BlockSpec((1, 1, nc_pad), lambda i: (i, 0, 0)),
        out_shape=jax.ShapeDtypeStruct((B, 1, nc_pad), jnp.float32),
        scratch_shapes=[pltpu.VMEM((Hp + 2, Wp + 2, PLANES_PAD), jnp.bfloat16)],
        compiler_params=_compiler_params(),
    )(phases,
      params["b_conv1_w"], s_b1, b_b1,
      params["b_conv2_wp"], params["b_conv2_wl"], s_b2, b_b2,
      params["b_conv3_w"], s_b3, b_b3,
      params["cls_w"])

    return probs[:, 0, :num_classes]


if __name__ == "__main__":
    key = jax.random.PRNGKey(0)
    kp, kx = jax.random.split(key)

    num_classes = 16  # small; module default is 1000
    params = init_params(kp, num_classes)

    # PyTorch-style NCHW input: batch=2, 3 channels, 32x32 spatial
    x = jax.random.normal(kx, (2, 3, 32, 32), jnp.float32)

    fwd = jax.jit(functools.partial(augmentor_forward, num_classes=num_classes))
    out = jax.block_until_ready(fwd(params, x))

    assert out.shape == (2, num_classes), out.shape
    assert bool(jnp.all(jnp.isfinite(out)))
    assert bool(jnp.all((out >= 0.0) & (out <= 1.0)))  # sigmoid range
    print("KERNEL_OK")
</pallas_src>

<mosaic_0001>
module attributes {stable_mosaic.version = 11 : i64} {
  func.func @conv1_matmul_bn_relu_kernel(%arg0: i32, %arg1: memref<512x160xbf16, #tpu.memory_space<vmem>>, %arg2: memref<160x256xbf16, #tpu.memory_space<vmem>>, %arg3: memref<1x256xf32, #tpu.memory_space<vmem>>, %arg4: memref<1x256xf32, #tpu.memory_space<vmem>>, %arg5: memref<512x256xbf16, #tpu.memory_space<vmem>>) attributes {dimension_semantics = [#tpu.dimension_semantics<parallel>], iteration_bounds = array<i64: 1>, scalar_prefetch = 0 : i64, scratch_operands = 0 : i64, tpu.core_type = #tpu.core_type<tc>, window_params = [{transform_indices = @transform_0, window_bounds = array<i64: 512, 160>}, {pipeline_mode = #tpu.pipeline_mode<synchronous>, transform_indices = @transform_1, window_bounds = array<i64: 160, 256>}, {pipeline_mode = #tpu.pipeline_mode<synchronous>, transform_indices = @transform_2, window_bounds = array<i64: 1, 256>}, {pipeline_mode = #tpu.pipeline_mode<synchronous>, transform_indices = @transform_3, window_bounds = array<i64: 1, 256>}, {transform_indices = @transform_4, window_bounds = array<i64: 512, 256>}]} {
    %c0 = arith.constant 0 : index
    %c0_0 = arith.constant 0 : index
    %0 = vector.load %arg1[%c0, %c0_0] : memref<512x160xbf16, #tpu.memory_space<vmem>>, vector<512x160xbf16>
    %c0_1 = arith.constant 0 : index
    %c0_2 = arith.constant 0 : index
    %1 = vector.load %arg2[%c0_1, %c0_2] : memref<160x256xbf16, #tpu.memory_space<vmem>>, vector<160x256xbf16>
    %cst = arith.constant dense<0.000000e+00> : vector<512x256xf32>
    %2 = tpu.matmul %0, %1, %cst {dimension_numbers = #tpu.dot_dimension_numbers<[1], [0], [0], [1], [0, 0, 1, 1], [], []>} : vector<512x160xbf16>, vector<160x256xbf16>, vector<512x256xf32> -> vector<512x256xf32>
    %c0_3 = arith.constant 0 : index
    %c0_4 = arith.constant 0 : index
    %3 = vector.load %arg3[%c0_3, %c0_4] : memref<1x256xf32, #tpu.memory_space<vmem>>, vector<1x256xf32>
    %4 = vector.broadcast %3 : vector<1x256xf32> to vector<512x256xf32>
    %5 = arith.mulf %2, %4 : vector<512x256xf32>
    %c0_5 = arith.constant 0 : index
    %c0_6 = arith.constant 0 : index
    %6 = vector.load %arg4[%c0_5, %c0_6] : memref<1x256xf32, #tpu.memory_space<vmem>>, vector<1x256xf32>
    %7 = vector.broadcast %6 : vector<1x256xf32> to vector<512x256xf32>
    %8 = arith.addf %5, %7 : vector<512x256xf32>
    %cst_7 = arith.constant 0.000000e+00 : f32
    %9 = vector.broadcast %cst_7 : f32 to vector<512x256xf32>
    %10 = arith.maximumf %8, %9 : vector<512x256xf32>
    %11 = arith.truncf %10 : vector<512x256xf32> to vector<512x256xbf16>
    %c0_8 = arith.constant 0 : index
    %c0_9 = arith.constant 0 : index
    %12 = vector.load %arg5[%c0_8, %c0_9] : memref<512x256xbf16, #tpu.memory_space<vmem>>, vector<512x256xbf16>
    tpu.vector_store %arg5[%c0_8, %c0_9], %11 {strides = array<i32>} : memref<512x256xbf16, #tpu.memory_space<vmem>>, vector<512x256xbf16>,
    return
  }
  func.func @transform_0(%arg0: i32) -> (i32, i32) {
    %c0_i32 = arith.constant 0 : i32
    %c0_i32_0 = arith.constant 0 : i32
    return %arg0, %c0_i32 : i32, i32
  }
  func.func @transform_1(%arg0: i32) -> (i32, i32) {
    %c0_i32 = arith.constant 0 : i32
    %c0_i32_0 = arith.constant 0 : i32
    %c0_i32_1 = arith.constant 0 : i32
    return %c0_i32, %c0_i32_0 : i32, i32
  }
  func.func @transform_2(%arg0: i32) -> (i32, i32) {
    %c0_i32 = arith.constant 0 : i32
    %c0_i32_0 = arith.constant 0 : i32
    %c0_i32_1 = arith.constant 0 : i32
    return %c0_i32, %c0_i32_0 : i32, i32
  }
  func.func @transform_3(%arg0: i32) -> (i32, i32) {
    %c0_i32 = arith.constant 0 : i32
    %c0_i32_0 = arith.constant 0 : i32
    %c0_i32_1 = arith.constant 0 : i32
    return %c0_i32, %c0_i32_0 : i32, i32
  }
  func.func @transform_4(%arg0: i32) -> (i32, i32) {
    %c0_i32 = arith.constant 0 : i32
    %c0_i32_0 = arith.constant 0 : i32
    return %arg0, %c0_i32 : i32, i32
  }
}

module attributes {stable_mosaic.version = 11 : i64} {
  func.func @bottleneck_head_kernel(%arg0: i32, %arg1: memref<4x9x9x256xbf16, #tpu.memory_space<vmem>>, %arg2: memref<256x128xbf16, #tpu.memory_space<vmem>>, %arg3: memref<1x128xf32, #tpu.memory_space<vmem>>, %arg4: memref<1x128xf32, #tpu.memory_space<vmem>>, %arg5: memref<4x256x128xbf16, #tpu.memory_space<vmem>>, %arg6: memref<128x128xbf16, #tpu.memory_space<vmem>>, %arg7: memref<1x128xf32, #tpu.memory_space<vmem>>, %arg8: memref<1x128xf32, #tpu.memory_space<vmem>>, %arg9: memref<128x256xbf16, #tpu.memory_space<vmem>>, %arg10: memref<1x256xf32, #tpu.memory_space<vmem>>, %arg11: memref<1x256xf32, #tpu.memory_space<vmem>>, %arg12: memref<256x128xbf16, #tpu.memory_space<vmem>>, %arg13: memref<1x1x128xf32, #tpu.memory_space<vmem>>, %arg14: memref<10x10x128xbf16, #tpu.memory_space<vmem>>) attributes {dimension_semantics = [#tpu.dimension_semantics<parallel>], iteration_bounds = array<i64: 2>, scalar_prefetch = 0 : i64, scratch_operands = 1 : i64, tpu.core_type = #tpu.core_type<tc>, window_params = [{transform_indices = @transform_0, window_bounds = array<i64: 4, 9, 9, 256>}, {pipeline_mode = #tpu.pipeline_mode<synchronous>, transform_indices = @transform_1, window_bounds = array<i64: 256, 128>}, {pipeline_mode = #tpu.pipeline_mode<synchronous>, transform_indices = @transform_2, window_bounds = array<i64: 1, 128>}, {pipeline_mode = #tpu.pipeline_mode<synchronous>, transform_indices = @transform_3, window_bounds = array<i64: 1, 128>}, {pipeline_mode = #tpu.pipeline_mode<synchronous>, transform_indices = @transform_4, window_bounds = array<i64: 4, 256, 128>}, {pipeline_mode = #tpu.pipeline_mode<synchronous>, transform_indices = @transform_5, window_bounds = array<i64: 128, 128>}, {pipeline_mode = #tpu.pipeline_mode<synchronous>, transform_indices = @transform_6, window_bounds = array<i64: 1, 128>}, {pipeline_mode = #tpu.pipeline_mode<synchronous>, transform_indices = @transform_7, window_bounds = array<i64: 1, 128>}, {pipeline_mode = #tpu.pipeline_mode<synchronous>, transform_indices = @transform_8, window_bounds = array<i64: 128, 256>}, {pipeline_mode = #tpu.pipeline_mode<synchronous>, transform_indices = @transform_9, window_bounds = array<i64: 1, 256>}, {pipeline_mode = #tpu.pipeline_mode<synchronous>, transform_indices = @transform_10, window_bounds = array<i64: 1, 256>}, {pipeline_mode = #tpu.pipeline_mode<synchronous>, transform_indices = @transform_11, window_bounds = array<i64: 256, 128>}, {transform_indices = @transform_12, window_bounds = array<i64: 1, 1, 128>}]} {
    %c0 = arith.constant 0 : index
    %c0_0 = arith.constant 0 : index
    %c0_1 = arith.constant 0 : index
    %c0_2 = arith.constant 0 : index
    %0 = vector.load %arg1[%c0, %c0_0, %c0_1, %c0_2] : memref<4x9x9x256xbf16, #tpu.memory_space<vmem>>, vector<1x8x8x256xbf16>
    %1 = vector.shape_cast %0 : vector<1x8x8x256xbf16> to vector<8x8x256xbf16>
    %c1 = arith.constant 1 : index
    %c0_3 = arith.constant 0 : index
    %c0_4 = arith.constant 0 : index
    %c0_5 = arith.constant 0 : index
    %2 = vector.load %arg1[%c1, %c0_3, %c0_4, %c0_5] : memref<4x9x9x256xbf16, #tpu.memory_space<vmem>>, vector<1x8x8x256xbf16>
    %3 = vector.shape_cast %2 : vector<1x8x8x256xbf16> to vector<8x8x256xbf16>
    %4 = arith.maximumf %1, %3 : vector<8x8x256xbf16>
    %c0_6 = arith.constant 0 : index
    %c0_7 = arith.constant 0 : index
    %c1_8 = arith.constant 1 : index
    %c0_9 = arith.constant 0 : index
    %5 = vector.load %arg1[%c0_6, %c0_7, %c1_8, %c0_9] : memref<4x9x9x256xbf16, #tpu.memory_space<vmem>>, vector<1x8x8x256xbf16>
    %6 = vector.shape_cast %5 : vector<1x8x8x256xbf16> to vector<8x8x256xbf16>
    %7 = arith.maximumf %4, %6 : vector<8x8x256xbf16>
    %c2 = arith.constant 2 : index
    %c0_10 = arith.constant 0 : index
    %c0_11 = arith.constant 0 : index
    %c0_12 = arith.constant 0 : index
    %8 = vector.load %arg1[%c2, %c0_10, %c0_11, %c0_12] : memref<4x9x9x256xbf16, #tpu.memory_space<vmem>>, vector<1x8x8x256xbf16>
    %9 = vector.shape_cast %8 : vector<1x8x8x256xbf16> to vector<8x8x256xbf16>
    %10 = arith.maximumf %7, %9 : vector<8x8x256xbf16>
    %c3 = arith.constant 3 : index
    %c0_13 = arith.constant 0 : index
    %c0_14 = arith.constant 0 : index
    %c0_15 = arith.constant 0 : index
    %11 = vector.load %arg1[%c3, %c0_13, %c0_14, %c0_15] : memref<4x9x9x256xbf16, #tpu.memory_space<vmem>>, vector<1x8x8x256xbf16>
    %12 = vector.shape_cast %11 : vector<1x8x8x256xbf16> to vector<8x8x256xbf16>
    %13 = arith.maximumf %10, %12 : vector<8x8x256xbf16>
    %c2_16 = arith.constant 2 : index
    %c0_17 = arith.constant 0 : index
    %c1_18 = arith.constant 1 : index
    %c0_19 = arith.constant 0 : index
    %14 = vector.load %arg1[%c2_16, %c0_17, %c1_18, %c0_19] : memref<4x9x9x256xbf16, #tpu.memory_space<vmem>>, vector<1x8x8x256xbf16>
    %15 = vector.shape_cast %14 : vector<1x8x8x256xbf16> to vector<8x8x256xbf16>
    %16 = arith.maximumf %13, %15 : vector<8x8x256xbf16>
    %c0_20 = arith.constant 0 : index
    %c1_21 = arith.constant 1 : index
    %c0_22 = arith.constant 0 : index
    %c0_23 = arith.constant 0 : index
    %17 = vector.load %arg1[%c0_20, %c1_21, %c0_22, %c0_23] : memref<4x9x9x256xbf16, #tpu.memory_space<vmem>>, vector<1x8x8x256xbf16>
    %18 = vector.shape_cast %17 : vector<1x8x8x256xbf16> to vector<8x8x256xbf16>
    %19 = arith.maximumf %16, %18 : vector<8x8x256xbf16>
    %c1_24 = arith.constant 1 : index
    %c1_25 = arith.constant 1 : index
    %c0_26 = arith.constant 0 : index
    %c0_27 = arith.constant 0 : index
    %20 = vector.load %arg1[%c1_24, %c1_25, %c0_26, %c0_27] : memref<4x9x9x256xbf16, #tpu.memory_space<vmem>>, vector<1x8x8x256xbf16>
    %21 = vector.shape_cast %20 : vector<1x8x8x256xbf16> to vector<8x8x256xbf16>
    %22 = arith.maximumf %19, %21 : vector<8x8x256xbf16>
    %c0_28 = arith.constant 0 : index
    %c1_29 = arith.constant 1 : index
    %c1_30 = arith.constant 1 : index
    %c0_31 = arith.constant 0 : index
    %23 = vector.load %arg1[%c0_28, %c1_29, %c1_30, %c0_31] : memref<4x9x9x256xbf16, #tpu.memory_space<vmem>>, vector<1x8x8x256xbf16>
    %24 = vector.shape_cast %23 : vector<1x8x8x256xbf16> to vector<8x8x256xbf16>
    %25 = arith.maximumf %22, %24 : vector<8x8x256xbf16>
    %26 = vector.shape_cast %25 : vector<8x8x256xbf16> to vector<64x256xbf16>
    %c0_32 = arith.constant 0 : index
    %c0_33 = arith.constant 0 : index
    %27 = vector.load %arg2[%c0_32, %c0_33] : memref<256x128xbf16, #tpu.memory_space<vmem>>, vector<256x128xbf16>
    %cst = arith.constant dense<0.000000e+00> : vector<64x128xf32>
    %28 = tpu.matmul %26, %27, %cst {dimension_numbers = #tpu.dot_dimension_numbers<[1], [0], [0], [1], [0, 0, 1, 1], [], []>} : vector<64x256xbf16>, vector<256x128xbf16>, vector<64x128xf32> -> vector<64x128xf32>
    %c0_34 = arith.constant 0 : index
    %c0_35 = arith.constant 0 : index
    %29 = vector.load %arg3[%c0_34, %c0_35] : memref<1x128xf32, #tpu.memory_space<vmem>>, vector<1x128xf32>
    %30 = vector.broadcast %29 : vector<1x128xf32> to vector<64x128xf32>
    %31 = arith.mulf %28, %30 : vector<64x128xf32>
    %c0_36 = arith.constant 0 : index
    %c0_37 = arith.constant 0 : index
    %32 = vector.load %arg4[%c0_36, %c0_37] : memref<1x128xf32, #tpu.memory_space<vmem>>, vector<1x128xf32>
    %33 = vector.broadcast %32 : vector<1x128xf32> to vector<64x128xf32>
    %34 = arith.addf %31, %33 : vector<64x128xf32>
    %cst_38 = arith.constant 0.000000e+00 : f32
    %35 = vector.broadcast %cst_38 : f32 to vector<64x128xf32>
    %36 = arith.maximumf %34, %35 : vector<64x128xf32>
    %37 = arith.truncf %36 : vector<64x128xf32> to vector<64x128xbf16>
    %cst_39 = arith.constant 0.000000e+00 : bf16
    %38 = vector.broadcast %cst_39 : bf16 to vector<10x10x128xbf16>
    %c0_40 = arith.constant 0 : index
    %c0_41 = arith.constant 0 : index
    %c0_42 = arith.constant 0 : index
    %39 = vector.load %arg14[%c0_40, %c0_41, %c0_42] : memref<10x10x128xbf16, #tpu.memory_space<vmem>>, vector<10x10x128xbf16>
    tpu.vector_store %arg14[%c0_40, %c0_41, %c0_42], %38 {strides = array<i32>} : memref<10x10x128xbf16, #tpu.memory_space<vmem>>, vector<10x10x128xbf16>,
    %40 = vector.shape_cast %37 : vector<64x128xbf16> to vector<8x8x128xbf16>
    %c1_43 = arith.constant 1 : index
    %c1_44 = arith.constant 1 : index
    %c0_45 = arith.constant 0 : index
    %41 = vector.load %arg14[%c1_43, %c1_44, %c0_45] : memref<10x10x128xbf16, #tpu.memory_space<vmem>>, vector<8x8x128xbf16>
    tpu.vector_store %arg14[%c1_43, %c1_44, %c0_45], %40 {strides = array<i32>} : memref<10x10x128xbf16, #tpu.memory_space<vmem>>, vector<8x8x128xbf16>,
    %cst_46 = arith.constant 0.000000e+00 : f32
    %42 = vector.broadcast %cst_46 : f32 to vector<64x128xf32>
    %c0_47 = arith.constant 0 : index
    %c0_48 = arith.constant 0 : index
    %c0_49 = arith.constant 0 : index
    %43 = vector.load %arg14[%c0_47, %c0_48, %c0_49] : memref<10x10x128xbf16, #tpu.memory_space<vmem>>, vector<8x8x128xbf16>
    %44 = vector.shape_cast %43 : vector<8x8x128xbf16> to vector<64x128xbf16>
    %c0_50 = arith.constant 0 : index
    %c1_51 = arith.constant 1 : index
    %c0_52 = arith.constant 0 : index
    %45 = vector.load %arg14[%c0_50, %c1_51, %c0_52] : memref<10x10x128xbf16, #tpu.memory_space<vmem>>, vector<8x8x128xbf16>
    %46 = vector.shape_cast %45 : vector<8x8x128xbf16> to vector<64x128xbf16>
    %47 = tpu.concatenate %44, %46 in 1 : vector<64x128xbf16>, vector<64x128xbf16> -> vector<64x256xbf16>
    %c0_53 = arith.constant 0 : index
    %c0_54 = arith.constant 0 : index
    %c0_55 = arith.constant 0 : index
    %48 = vector.load %arg5[%c0_53, %c0_54, %c0_55] : memref<4x256x128xbf16, #tpu.memory_space<vmem>>, vector<1x256x128xbf16>
    %49 = vector.shape_cast %48 : vector<1x256x128xbf16> to vector<256x128xbf16>
    %cst_56 = arith.constant dense<0.000000e+00> : vector<64x128xf32>
    %50 = tpu.matmul %47, %49, %cst_56 {dimension_numbers = #tpu.dot_dimension_numbers<[1], [0], [0], [1], [0, 0, 1, 1], [], []>} : vector<64x256xbf16>, vector<256x128xbf16>, vector<64x128xf32> -> vector<64x128xf32>
    %51 = arith.addf %42, %50 : vector<64x128xf32>
    %c0_57 = arith.constant 0 : index
    %c2_58 = arith.constant 2 : index
    %c0_59 = arith.constant 0 : index
    %52 = vector.load %arg14[%c0_57, %c2_58, %c0_59] : memref<10x10x128xbf16, #tpu.memory_space<vmem>>, vector<8x8x128xbf16>
    %53 = vector.shape_cast %52 : vector<8x8x128xbf16> to vector<64x128xbf16>
    %c1_60 = arith.constant 1 : index
    %c0_61 = arith.constant 0 : index
    %c0_62 = arith.constant 0 : index
    %54 = vector.load %arg14[%c1_60, %c0_61, %c0_62] : memref<10x10x128xbf16, #tpu.memory_space<vmem>>, vector<8x8x128xbf16>
    %55 = vector.shape_cast %54 : vector<8x8x128xbf16> to vector<64x128xbf16>
    %56 = tpu.concatenate %53, %55 in 1 : vector<64x128xbf16>, vector<64x128xbf16> -> vector<64x256xbf16>
    %c1_63 = arith.constant 1 : index
    %c0_64 = arith.constant 0 : index
    %c0_65 = arith.constant 0 : index
    %57 = vector.load %arg5[%c1_63, %c0_64, %c0_65] : memref<4x256x128xbf16, #tpu.memory_space<vmem>>, vector<1x256x128xbf16>
    %58 = vector.shape_cast %57 : vector<1x256x128xbf16> to vector<256x128xbf16>
    %cst_66 = arith.constant dense<0.000000e+00> : vector<64x128xf32>
    %59 = tpu.matmul %56, %58, %cst_66 {dimension_numbers = #tpu.dot_dimension_numbers<[1], [0], [0], [1], [0, 0, 1, 1], [], []>} : vector<64x256xbf16>, vector<256x128xbf16>, vector<64x128xf32> -> vector<64x128xf32>
    %60 = arith.addf %51, %59 : vector<64x128xf32>
    %c1_67 = arith.constant 1 : index
    %c1_68 = arith.constant 1 : index
    %c0_69 = arith.constant 0 : index
    %61 = vector.load %arg14[%c1_67, %c1_68, %c0_69] : memref<10x10x128xbf16, #tpu.memory_space<vmem>>, vector<8x8x128xbf16>
    %62 = vector.shape_cast %61 : vector<8x8x128xbf16> to vector<64x128xbf16>
    %c1_70 = arith.constant 1 : index
    %c2_71 = arith.constant 2 : index
    %c0_72 = arith.constant 0 : index
    %63 = vector.load %arg14[%c1_70, %c2_71, %c0_72] : memref<10x10x128xbf16, #tpu.memory_space<vmem>>, vector<8x8x128xbf16>
    %64 = vector.shape_cast %63 : vector<8x8x128xbf16> to vector<64x128xbf16>
    %65 = tpu.concatenate %62, %64 in 1 : vector<64x128xbf16>, vector<64x128xbf16> -> vector<64x256xbf16>
    %c2_73 = arith.constant 2 : index
    %c0_74 = arith.constant 0 : index
    %c0_75 = arith.constant 0 : index
    %66 = vector.load %arg5[%c2_73, %c0_74, %c0_75] : memref<4x256x128xbf16, #tpu.memory_space<vmem>>, vector<1x256x128xbf16>
    %67 = vector.shape_cast %66 : vector<1x256x128xbf16> to vector<256x128xbf16>
    %cst_76 = arith.constant dense<0.000000e+00> : vector<64x128xf32>
    %68 = tpu.matmul %65, %67, %cst_76 {dimension_numbers = #tpu.dot_dimension_numbers<[1], [0], [0], [1], [0, 0, 1, 1], [], []>} : vector<64x256xbf16>, vector<256x128xbf16>, vector<64x128xf32> -> vector<64x128xf32>
    %69 = arith.addf %60, %68 : vector<64x128xf32>
    %c2_77 = arith.constant 2 : index
    %c0_78 = arith.constant 0 : index
    %c0_79 = arith.constant 0 : index
    %70 = vector.load %arg14[%c2_77, %c0_78, %c0_79] : memref<10x10x128xbf16, #tpu.memory_space<vmem>>, vector<8x8x128xbf16>
    %71 = vector.shape_cast %70 : vector<8x8x128xbf16> to vector<64x128xbf16>
    %c2_80 = arith.constant 2 : index
    %c1_81 = arith.constant 1 : index
    %c0_82 = arith.constant 0 : index
    %72 = vector.load %arg14[%c2_80, %c1_81, %c0_82] : memref<10x10x128xbf16, #tpu.memory_space<vmem>>, vector<8x8x128xbf16>
    %73 = vector.shape_cast %72 : vector<8x8x128xbf16> to vector<64x128xbf16>
    %74 = tpu.concatenate %71, %73 in 1 : vector<64x128xbf16>, vector<64x128xbf16> -> vector<64x256xbf16>
    %c3_83 = arith.constant 3 : index
    %c0_84 = arith.constant 0 : index
    %c0_85 = arith.constant 0 : index
    %75 = vector.load %arg5[%c3_83, %c0_84, %c0_85] : memref<4x256x128xbf16, #tpu.memory_space<vmem>>, vector<1x256x128xbf16>
    %76 = vector.shape_cast %75 : vector<1x256x128xbf16> to vector<256x128xbf16>
    %cst_86 = arith.constant dense<0.000000e+00> : vector<64x128xf32>
    %77 = tpu.matmul %74, %76, %cst_86 {dimension_numbers = #tpu.dot_dimension_numbers<[1], [0], [0], [1], [0, 0, 1, 1], [], []>} : vector<64x256xbf16>, vector<256x128xbf16>, vector<64x128xf32> -> vector<64x128xf32>
    %78 = arith.addf %69, %77 : vector<64x128xf32>
    %c2_87 = arith.constant 2 : index
    %c2_88 = arith.constant 2 : index
    %c0_89 = arith.constant 0 : index
    %79 = vector.load %arg14[%c2_87, %c2_88, %c0_89] : memref<10x10x128xbf16, #tpu.memory_space<vmem>>, vector<8x8x128xbf16>
    %80 = vector.shape_cast %79 : vector<8x8x128xbf16> to vector<64x128xbf16>
    %c0_90 = arith.constant 0 : index
    %c0_91 = arith.constant 0 : index
    %81 = vector.load %arg6[%c0_90, %c0_91] : memref<128x128xbf16, #tpu.memory_space<vmem>>, vector<128x128xbf16>
    %cst_92 = arith.constant dense<0.000000e+00> : vector<64x128xf32>
    %82 = tpu.matmul %80, %81, %cst_92 {dimension_numbers = #tpu.dot_dimension_numbers<[1], [0], [0], [1], [0, 0, 1, 1], [], []>} : vector<64x128xbf16>, vector<128x128xbf16>, vector<64x128xf32> -> vector<64x128xf32>
    %83 = arith.addf %78, %82 : vector<64x128xf32>
    %c0_93 = arith.constant 0 : index
    %c0_94 = arith.constant 0 : index
    %84 = vector.load %arg7[%c0_93, %c0_94] : memref<1x128xf32, #tpu.memory_space<vmem>>, vector<1x128xf32>
    %85 = vector.broadcast %84 : vector<1x128xf32> to vector<64x128xf32>
    %86 = arith.mulf %83, %85 : vector<64x128xf32>
    %c0_95 = arith.constant 0 : index
    %c0_96 = arith.constant 0 : index
    %87 = vector.load %arg8[%c0_95, %c0_96] : memref<1x128xf32, #tpu.memory_space<vmem>>, vector<1x128xf32>
    %88 = vector.broadcast %87 : vector<1x128xf32> to vector<64x128xf32>
    %89 = arith.addf %86, %88 : vector<64x128xf32>
    %cst_97 = arith.constant 0.000000e+00 : f32
    %90 = vector.broadcast %cst_97 : f32 to vector<64x128xf32>
    %91 = arith.maximumf %89, %90 : vector<64x128xf32>
    %92 = arith.truncf %91 : vector<64x128xf32> to vector<64x128xbf16>
    %c0_98 = arith.constant 0 : index
    %c0_99 = arith.constant 0 : index
    %93 = vector.load %arg9[%c0_98, %c0_99] : memref<128x256xbf16, #tpu.memory_space<vmem>>, vector<128x256xbf16>
    %cst_100 = arith.constant dense<0.000000e+00> : vector<64x256xf32>
    %94 = tpu.matmul %92, %93, %cst_100 {dimension_numbers = #tpu.dot_dimension_numbers<[1], [0], [0], [1], [0, 0, 1, 1], [], []>} : vector<64x128xbf16>, vector<128x256xbf16>, vector<64x256xf32> -> vector<64x256xf32>
    %c0_101 = arith.constant 0 : index
    %c0_102 = arith.constant 0 : index
    %95 = vector.load %arg10[%c0_101, %c0_102] : memref<1x256xf32, #tpu.memory_space<vmem>>, vector<1x256xf32>
    %96 = vector.broadcast %95 : vector<1x256xf32> to vector<64x256xf32>
    %97 = arith.mulf %94, %96 : vector<64x256xf32>
    %c0_103 = arith.constant 0 : index
    %c0_104 = arith.constant 0 : index
    %98 = vector.load %arg11[%c0_103, %c0_104] : memref<1x256xf32, #tpu.memory_space<vmem>>, vector<1x256xf32>
    %99 = vector.broadcast %98 : vector<1x256xf32> to vector<64x256xf32>
    %100 = arith.addf %97, %99 : vector<64x256xf32>
    %101 = arith.extf %26 : vector<64x256xbf16> to vector<64x256xf32>
    %102 = arith.addf %100, %101 : vector<64x256xf32>
    %cst_105 = arith.constant 0.000000e+00 : f32
    %103 = vector.broadcast %cst_105 : f32 to vector<64x256xf32>
    %104 = arith.maximumf %102, %103 : vector<64x256xf32>
    %cst_106 = arith.constant dense<0.000000e+00> : vector<256xf32>
    %105 = vector.multi_reduction <add>, %104, %cst_106 [0] : vector<64x256xf32> to vector<256xf32>
    %106 = vector.shape_cast %105 : vector<256xf32> to vector<1x256xf32>
    %cst_107 = arith.constant 6.400000e+01 : f32
    %107 = vector.broadcast %cst_107 : f32 to vector<1x256xf32>
    %108 = arith.divf %106, %107 : vector<1x256xf32>
    %109 = arith.truncf %108 : vector<1x256xf32> to vector<1x256xbf16>
    %c0_108 = arith.constant 0 : index
    %c0_109 = arith.constant 0 : index
    %110 = vector.load %arg12[%c0_108, %c0_109] : memref<256x128xbf16, #tpu.memory_space<vmem>>, vector<256x128xbf16>
    %cst_110 = arith.constant dense<0.000000e+00> : vector<1x128xf32>
    %111 = tpu.matmul %109, %110, %cst_110 {dimension_numbers = #tpu.dot_dimension_numbers<[1], [0], [0], [1], [0, 0, 1, 1], [], []>} : vector<1x256xbf16>, vector<256x128xbf16>, vector<1x128xf32> -> vector<1x128xf32>
    %cst_111 = arith.constant 5.000000e-01 : f32
    %112 = vector.broadcast %cst_111 : f32 to vector<1x128xf32>
    %113 = arith.mulf %112, %111 : vector<1x128xf32>
    %114 = math.tanh %113 : vector<1x128xf32>
    %cst_112 = arith.constant 1.000000e+00 : f32
    %115 = vector.broadcast %cst_112 : f32 to vector<1x128xf32>
    %116 = arith.addf %114, %115 : vector<1x128xf32>
    %cst_113 = arith.constant 5.000000e-01 : f32
    %117 = vector.broadcast %cst_113 : f32 to vector<1x128xf32>
    %118 = arith.mulf %117, %116 : vector<1x128xf32>
    %c0_114 = arith.constant 0 : index
    %c0_115 = arith.constant 0 : index
    %c0_116 = arith.constant 0 : index
    %119 = vector.load %arg13[%c0_114, %c0_115, %c0_116] : memref<1x1x128xf32, #tpu.memory_space<vmem>>, vector<1x1x128xf32>
    %120 = vector.shape_cast %119 : vector<1x1x128xf32> to vector<1x128xf32>
    %121 = vector.shape_cast %118 : vector<1x128xf32> to vector<1x1x128xf32>
    tpu.vector_store %arg13[%c0_114, %c0_115, %c0_116], %121 {strides = array<i32>} : memref<1x1x128xf32, #tpu.memory_space<vmem>>, vector<1x1x128xf32>,
    return
  }
  func.func @transform_0(%arg0: i32) -> (i32, i32, i32, i32) {
    %c0_i32 = arith.constant 0 : i32
    %c0_i32_0 = arith.constant 0 : i32
    %c0_i32_1 = arith.constant 0 : i32
    %c0_i32_2 = arith.constant 0 : i32
    return %arg0, %c0_i32, %c0_i32_0, %c0_i32_1 : i32, i32, i32, i32
  }
  func.func @transform_1(%arg0: i32) -> (i32, i32) {
    %c0_i32 = arith.constant 0 : i32
    %c0_i32_0 = arith.constant 0 : i32
    %c0_i32_1 = arith.constant 0 : i32
    return %c0_i32, %c0_i32_0 : i32, i32
  }
  func.func @transform_2(%arg0: i32) -> (i32, i32) {
    %c0_i32 = arith.constant 0 : i32
    %c0_i32_0 = arith.constant 0 : i32
    %c0_i32_1 = arith.constant 0 : i32
    return %c0_i32, %c0_i32_0 : i32, i32
  }
  func.func @transform_3(%arg0: i32) -> (i32, i32) {
    %c0_i32 = arith.constant 0 : i32
    %c0_i32_0 = arith.constant 0 : i32
    %c0_i32_1 = arith.constant 0 : i32
    return %c0_i32, %c0_i32_0 : i32, i32
  }
  func.func @transform_4(%arg0: i32) -> (i32, i32, i32) {
    %c0_i32 = arith.constant 0 : i32
    %c0_i32_0 = arith.constant 0 : i32
    %c0_i32_1 = arith.constant 0 : i32
    %c0_i32_2 = arith.constant 0 : i32
    return %c0_i32, %c0_i32_0, %c0_i32_1 : i32, i32, i32
  }
  func.func @transform_5(%arg0: i32) -> (i32, i32) {
    %c0_i32 = arith.constant 0 : i32
    %c0_i32_0 = arith.constant 0 : i32
    %c0_i32_1 = arith.constant 0 : i32
    return %c0_i32, %c0_i32_0 : i32, i32
  }
  func.func @transform_6(%arg0: i32) -> (i32, i32) {
    %c0_i32 = arith.constant 0 : i32
    %c0_i32_0 = arith.constant 0 : i32
    %c0_i32_1 = arith.constant 0 : i32
    return %c0_i32, %c0_i32_0 : i32, i32
  }
  func.func @transform_7(%arg0: i32) -> (i32, i32) {
    %c0_i32 = arith.constant 0 : i32
    %c0_i32_0 = arith.constant 0 : i32
    %c0_i32_1 = arith.constant 0 : i32
    return %c0_i32, %c0_i32_0 : i32, i32
  }
  func.func @transform_8(%arg0: i32) -> (i32, i32) {
    %c0_i32 = arith.constant 0 : i32
    %c0_i32_0 = arith.constant 0 : i32
    %c0_i32_1 = arith.constant 0 : i32
    return %c0_i32, %c0_i32_0 : i32, i32
  }
  func.func @transform_9(%arg0: i32) -> (i32, i32) {
    %c0_i32 = arith.constant 0 : i32
    %c0_i32_0 = arith.constant 0 : i32
    %c0_i32_1 = arith.constant 0 : i32
    return %c0_i32, %c0_i32_0 : i32, i32
  }
  func.func @transform_10(%arg0: i32) -> (i32, i32) {
    %c0_i32 = arith.constant 0 : i32
    %c0_i32_0 = arith.constant 0 : i32
    %c0_i32_1 = arith.constant 0 : i32
    return %c0_i32, %c0_i32_0 : i32, i32
  }
  func.func @transform_11(%arg0: i32) -> (i32, i32) {
    %c0_i32 = arith.constant 0 : i32
    %c0_i32_0 = arith.constant 0 : i32
    %c0_i32_1 = arith.constant 0 : i32
    return %c0_i32, %c0_i32_0 : i32, i32
  }
  func.func @transform_12(%arg0: i32) -> (i32, i32, i32) {
    %c0_i32 = arith.constant 0 : i32
    %c0_i32_0 = arith.constant 0 : i32
    %c0_i32_1 = arith.constant 0 : i32
    return %arg0, %c0_i32, %c0_i32_0 : i32, i32, i32
  }
}

</mosaic_0001>

<bundles_post_ra>
// kernel: augmentor_forward.2
= control target key start
LH: loop header
LB: loop body
LE: loop exit
PB: predicated region body
PF: predicated region fallthrough
CT: control target
= control target key end

     0   :  { %vm490_vm0 = vcmask 261120   ;;  %s2961_s1 = inlined_call_operand.vmem [shape: bf16[160,256], index: 1, kind: input, shape index: {}]   ;;  %s2962_s0 = inlined_call_operand.vmem [shape: bf16[512,160], index: 0, kind: input, shape index: {}]   ;;  %s2963_s2 = inlined_call_operand.vmem [shape: f32[1,256], index: 2, kind: input, shape index: {}]   ;;  %s2964_s3 = inlined_call_operand.vmem [shape: f32[1,256], index: 3, kind: input, shape index: {}]   ;;  %s2965_s4 = inlined_call_operand.vmem [shape: bf16[512,256], index: 4, kind: output, shape index: {}]  }
   0x1   :  { %v2064_v0 = vld [vmem:[%s2961_s1 + $0x74] ss:$8 sps:$4 sm:$0xff]   ;;  %v2066_v1 = vld [vmem:[%s2961_s1 + $0x70] ss:$8 sps:$4 sm:$0xff]   ;;  %v2067_v2 = vld [vmem:[%s2961_s1 + $0x64] ss:$8 sps:$4 sm:$0xff]  }
   0x2   :  { %587 = vmatprep.subr.bf16.mxu0 %v2064_v0  ;;  %2044 = vmatprep.subr.bf16.mxu1 %v2064_v0  ;;  %v2069_v3 = vld [vmem:[%s2961_s1 + $0x60] ss:$8 sps:$4 sm:$0xff]   ;;  %v2070_v4 = vld [vmem:[%s2961_s1 + $0x54] ss:$8 sps:$4 sm:$0xff]   ;;  %v2072_v5 = vld [vmem:[%s2961_s1 + $0x50] ss:$8 sps:$4 sm:$0xff]  }
   0x3   :  { %588 = vmatpush1.bf16.msra.mxu0 %v2066_v1  ;;  %2054 = vmatpush1.bf16.msra.mxu1 %v2066_v1  ;;  %v2073_v6 = vld [vmem:[%s2961_s1 + $0x44] ss:$8 sps:$4 sm:$0xff]   ;;  %v2075_v7 = vld [vmem:[%s2961_s1 + $0x40] ss:$8 sps:$4 sm:$0xff]   ;;  %v2076_v8 = vld [vmem:[%s2961_s1 + $0x34] ss:$8 sps:$4 sm:$0xff]  }
   0x4   :  { %589 = vmatprep.subr.bf16.mxu0 %v2067_v2  ;;  %2045 = vmatprep.subr.bf16.mxu1 %v2067_v2  ;;  %v2096_v9 = vld [vmem:[%s2962_s0 + $0x4] ss:$8 sps:$4 sm:$0xff]   ;;  %v2078_v10 = vld [vmem:[%s2961_s1 + $0x30] ss:$8 sps:$4 sm:$0xff]   ;;  %v2081_v13 = vld [vmem:[%s2961_s1 + $0x20] ss:$8 sps:$4 sm:$0xff]  }
   0x5   :  { %v2099_v11 = vld [vmem:[%s2962_s0 + $0x104] ss:$8 sps:$4 sm:$0xff]   ;;  %1884 = vmatprep.mubr.msk.bf16.mxu0 %vm490_vm0, %v2096_v9  ;;  %v2082_v14 = vld [vmem:[%s2961_s1 + $0x14] ss:$8 sps:$4 sm:$0xff]   ;;  %v2084_v15 = vld [vmem:[%s2961_s1 + $0x10] ss:$8 sps:$4 sm:$0xff]  }
   0x6   :  { %v2079_v12 = vld [vmem:[%s2961_s1 + $0x24] ss:$8 sps:$4 sm:$0xff]   ;;  %1900 = vmatprep.mubr.msk.bf16.mxu1 %vm490_vm0, %v2099_v11  ;;  %v2087_v17 = vld [vmem:[%s2961_s1] ss:$8 sps:$4 sm:$0xff]   ;;  %v2088_v18 = vld [vmem:[%s2961_s1 + $0x94] ss:$8 sps:$4 sm:$0xff]  }
   0x7   :  { %590 = vmatpush1.bf16.msra.mxu0 %v2069_v3  ;;  %2055 = vmatpush1.bf16.msra.mxu1 %v2069_v3  ;;  %v2085_v16 = vld [vmem:[%s2961_s1 + $0x4] ss:$8 sps:$4 sm:$0xff]   ;;  %v2090_v19 = vld [vmem:[%s2961_s1 + $0x90] ss:$8 sps:$4 sm:$0xff]   ;;  %v2093_v21 = vld [vmem:[%s2961_s1 + $0x80] ss:$8 sps:$4 sm:$0xff]  }
   0x8   :  { %591 = vmatprep.subr.bf16.mxu0 %v2070_v4  ;;  %2046 = vmatprep.subr.bf16.mxu1 %v2070_v4  ;;  %v2091_v20 = vld [vmem:[%s2961_s1 + $0x84] ss:$8 sps:$4 sm:$0xff]   ;;  %v2094_v22 = vld [vmem:[%s2962_s0] ss:$8 sps:$4 sm:$0xff]   ;;  %v2100_v24 = vld [vmem:[%s2962_s0 + $0x14] ss:$8 sps:$4 sm:$0xff]  }
   0x9   :  { %v2097_v23 = vld [vmem:[%s2962_s0 + $0x100] ss:$8 sps:$4 sm:$0xff]   ;;  %v2102_v25 = vld [vmem:[%s2962_s0 + $0x114] ss:$8 sps:$4 sm:$0xff]   ;;  %v2104_v26 = vld [vmem:[%s2962_s0 + $0x10] ss:$8 sps:$4 sm:$0xff]  }
   0xa   :  { %v2105_v27 = vld [vmem:[%s2962_s0 + $0x110] ss:$8 sps:$4 sm:$0xff]   ;;  %v2106_v28 = vld [vmem:[%s2962_s0 + $0x24] ss:$8 sps:$4 sm:$0xff]   ;;  %v2110_v30 = vld [vmem:[%s2962_s0 + $0x20] ss:$8 sps:$4 sm:$0xff]  }
   0xb   :  { %592 = vmatpush1.bf16.msra.mxu0 %v2072_v5  ;;  %2056 = vmatpush1.bf16.msra.mxu1 %v2072_v5  ;;  %v2108_v29 = vld [vmem:[%s2962_s0 + $0x124] ss:$8 sps:$4 sm:$0xff]   ;;  %v2111_v31 = vld [vmem:[%s2962_s0 + $0x120] ss:$8 sps:$4 sm:$0xff]   ;;  %v2112_v32 = vld [vmem:[%s2962_s0 + $0x34] ss:$8 sps:$4 sm:$0xff]  }
   0xc   :  { %593 = vmatprep.subr.bf16.mxu0 %v2073_v6  ;;  %2047 = vmatprep.subr.bf16.mxu1 %v2073_v6  ;;  %v2114_v33 = vld [vmem:[%s2962_s0 + $0x134] ss:$8 sps:$4 sm:$0xff]   ;;  %v2116_v34 = vld [vmem:[%s2962_s0 + $0x30] ss:$8 sps:$4 sm:$0xff]   ;;  %v2118_v36 = vld [vmem:[%s2962_s0 + $0x44] ss:$8 sps:$4 sm:$0xff]  }
   0xd   :  { %v2117_v35 = vld [vmem:[%s2962_s0 + $0x130] ss:$8 sps:$4 sm:$0xff]   ;;  %v2120_v37 = vld [vmem:[%s2962_s0 + $0x144] ss:$8 sps:$4 sm:$0xff]   ;;  %v2122_v38 = vld [vmem:[%s2962_s0 + $0x40] ss:$8 sps:$4 sm:$0xff]  }
   0xe   :  { %v2123_v39 = vld [vmem:[%s2962_s0 + $0x140] ss:$8 sps:$4 sm:$0xff]   ;;  %v2124_v40 = vld [vmem:[%s2962_s0 + $0x54] ss:$8 sps:$4 sm:$0xff]   ;;  %v2128_v42 = vld [vmem:[%s2962_s0 + $0x50] ss:$8 sps:$4 sm:$0xff]  }
   0xf   :  { %594 = vmatpush1.bf16.msra.mxu0 %v2075_v7  ;;  %2057 = vmatpush1.bf16.msra.mxu1 %v2075_v7  ;;  %v2126_v41 = vld [vmem:[%s2962_s0 + $0x154] ss:$8 sps:$4 sm:$0xff]   ;;  %v2129_v43 = vld [vmem:[%s2962_s0 + $0x150] ss:$8 sps:$4 sm:$0xff]   ;;  %v2130_v44 = vld [vmem:[%s2962_s0 + $0x64] ss:$8 sps:$4 sm:$0xff]  }
  0x10   :  { %595 = vmatprep.subr.bf16.mxu0 %v2076_v8  ;;  %2048 = vmatprep.subr.bf16.mxu1 %v2076_v8  ;;  %v2132_v45 = vld [vmem:[%s2962_s0 + $0x164] ss:$8 sps:$4 sm:$0xff]   ;;  %v2134_v46 = vld [vmem:[%s2962_s0 + $0x60] ss:$8 sps:$4 sm:$0xff]   ;;  %v2136_v48 = vld [vmem:[%s2962_s0 + $0x74] ss:$8 sps:$4 sm:$0xff]  }
  0x11   :  { %v2135_v47 = vld [vmem:[%s2962_s0 + $0x160] ss:$8 sps:$4 sm:$0xff]   ;;  %v2138_v49 = vld [vmem:[%s2962_s0 + $0x174] ss:$8 sps:$4 sm:$0xff]   ;;  %v2140_v50 = vld [vmem:[%s2962_s0 + $0x70] ss:$8 sps:$4 sm:$0xff]  }
  0x12   :  { %v2141_v51 = vld [vmem:[%s2962_s0 + $0x170] ss:$8 sps:$4 sm:$0xff]   ;;  %v2142_v52 = vld [vmem:[%s2962_s0 + $0x84] ss:$8 sps:$4 sm:$0xff]   ;;  %v2146_v54 = vld [vmem:[%s2962_s0 + $0x80] ss:$8 sps:$4 sm:$0xff]  }
  0x13   :  { %596 = vmatpush1.bf16.msra.mxu0 %v2078_v10  ;;  %2058 = vmatpush1.bf16.msra.mxu1 %v2078_v10  ;;  %v2144_v53 = vld [vmem:[%s2962_s0 + $0x184] ss:$8 sps:$4 sm:$0xff]   ;;  %v2147_v55 = vld [vmem:[%s2962_s0 + $0x180] ss:$8 sps:$4 sm:$0xff]   ;;  %v2148_v56 = vld [vmem:[%s2962_s0 + $0x94] ss:$8 sps:$4 sm:$0xff]  }
  0x14   :  { %597 = vmatprep.subr.bf16.mxu0 %v2079_v12  ;;  %2049 = vmatprep.subr.bf16.mxu1 %v2079_v12  ;;  %v2150_v57 = vld [vmem:[%s2962_s0 + $0x194] ss:$8 sps:$4 sm:$0xff]   ;;  %v2152_v58 = vld [vmem:[%s2962_s0 + $0x90] ss:$8 sps:$4 sm:$0xff]   ;;  %v2154_v60 = vld [vmem:[%s2962_s0 + $0xa4] ss:$8 sps:$4 sm:$0xff]  }
  0x15   :  { %v2153_v59 = vld [vmem:[%s2962_s0 + $0x190] ss:$8 sps:$4 sm:$0xff]   ;;  %v2156_v61 = vld [vmem:[%s2962_s0 + $0x1a4] ss:$8 sps:$4 sm:$0xff]   ;;  %v2158_v62 = vld [vmem:[%s2962_s0 + $0xa0] ss:$8 sps:$4 sm:$0xff]  }
  0x16   :  { %v2159_v63 = vld [vmem:[%s2962_s0 + $0x1a0] ss:$8 sps:$4 sm:$0xff]   ;;  %v2160_v0 = vld [vmem:[%s2962_s0 + $0xb4] ss:$8 sps:$4 sm:$0xff]   ;;  %v2164_v2 = vld [vmem:[%s2962_s0 + $0xb0] ss:$8 sps:$4 sm:$0xff]  }
  0x17   :  { %598 = vmatpush1.bf16.msra.mxu0 %v2081_v13  ;;  %2059 = vmatpush1.bf16.msra.mxu1 %v2081_v13  ;;  %v2162_v1 = vld [vmem:[%s2962_s0 + $0x1b4] ss:$8 sps:$4 sm:$0xff]   ;;  %v2165_v3 = vld [vmem:[%s2962_s0 + $0x1b0] ss:$8 sps:$4 sm:$0xff]   ;;  %v2166_v4 = vld [vmem:[%s2962_s0 + $0xc4] ss:$8 sps:$4 sm:$0xff]  }
  0x18   :  { %599 = vmatprep.subr.bf16.mxu0 %v2082_v14  ;;  %2050 = vmatprep.subr.bf16.mxu1 %v2082_v14  ;;  %v2168_v5 = vld [vmem:[%s2962_s0 + $0x1c4] ss:$8 sps:$4 sm:$0xff]   ;;  %v2170_v6 = vld [vmem:[%s2962_s0 + $0xc0] ss:$8 sps:$4 sm:$0xff]   ;;  %v2172_v8 = vld [vmem:[%s2962_s0 + $0xd4] ss:$8 sps:$4 sm:$0xff]  }
  0x19   :  { %v2171_v7 = vld [vmem:[%s2962_s0 + $0x1c0] ss:$8 sps:$4 sm:$0xff]   ;;  %v2174_v9 = vld [vmem:[%s2962_s0 + $0x1d4] ss:$8 sps:$4 sm:$0xff]   ;;  %v2176_v10 = vld [vmem:[%s2962_s0 + $0xd0] ss:$8 sps:$4 sm:$0xff]  }
  0x1a   :  { %v2177_v11 = vld [vmem:[%s2962_s0 + $0x1d0] ss:$8 sps:$4 sm:$0xff]   ;;  %v2178_v12 = vld [vmem:[%s2962_s0 + $0xe4] ss:$8 sps:$4 sm:$0xff]   ;;  %v2182_v14 = vld [vmem:[%s2962_s0 + $0xe0] ss:$8 sps:$4 sm:$0xff]  }
  0x1b   :  { %600 = vmatpush1.bf16.msra.mxu0 %v2084_v15  ;;  %2060 = vmatpush1.bf16.msra.mxu1 %v2084_v15  ;;  %v2180_v13 = vld [vmem:[%s2962_s0 + $0x1e4] ss:$8 sps:$4 sm:$0xff]   ;;  %v2183_v15 = vld [vmem:[%s2962_s0 + $0x1e0] ss:$8 sps:$4 sm:$0xff]  }
  0x1c   :  { %601 = vmatprep.subr.bf16.mxu0 %v2085_v16  ;;  %2051 = vmatprep.subr.bf16.mxu1 %v2085_v16  ;;  %v2184_v16 = vld [vmem:[%s2962_s0 + $0xf4] ss:$8 sps:$4 sm:$0xff]  }
  0x1f   :  { %602 = vmatpush1.bf16.msra.mxu0 %v2087_v17  ;;  %2061 = vmatpush1.bf16.msra.mxu1 %v2087_v17  ;;  %v2186_v17 = vld [vmem:[%s2962_s0 + $0x1f4] ss:$8 sps:$4 sm:$0xff]  }
  0x20   :  { %615 = vmatprep.subr.bf16.mxu0 %v2088_v18  ;;  %2052 = vmatprep.subr.bf16.mxu1 %v2088_v18  ;;  %v2188_v18 = vld [vmem:[%s2962_s0 + $0xf0] ss:$8 sps:$4 sm:$0xff]  }
  0x23   :  { %616 = vmatpush2.bf16.msra.mxu0 %v2090_v19  ;;  %2062 = vmatpush2.bf16.msra.mxu1 %v2090_v19  ;;  %v2189_v19 = vld [vmem:[%s2962_s0 + $0x1f0] ss:$8 sps:$4 sm:$0xff]  }
  0x24   :  { %617 = vmatprep.subr.bf16.mxu0 %v2091_v20  ;;  %2053 = vmatprep.subr.bf16.mxu1 %v2091_v20  ;;  %v942_v20 = vlaneseq }
  0x27   :  { %618 = vmatpush2.bf16.msra.mxu0 %v2093_v21  ;;  %2063 = vmatpush2.bf16.msra.mxu1 %v2093_v21  ;;  %v943_v21 = vshrl.u32 %v942_v20, 7 }
  0x2a   :  { %620 = vmatmul.mubr.bf16.vlgmr.msra.gmra.mxu0 %v2094_v22  ;;  %780 = vmatmul.mubr.bf16.vlgmr.msra.gmra.mxu1 %v2097_v23  ;;  %v944_v22 = vsub.s32 0, %v943_v21  ;;  %v940_v23 = vld [vmem:[%s2963_s2] sm:$0x3] }
  0x2b   :  { %1885 = vmatprep.mubr.msk.bf16.mxu0 %vm490_vm0, %v2100_v24  ;;  %1901 = vmatprep.mubr.msk.bf16.mxu1 %vm490_vm0, %v2102_v25  ;;  %v948_v24 = vsub.s32 1, %v943_v21  ;;  %v1080_v25 = vld [vmem:[%s2964_s3] sm:$0x3] }
  0x32   :  { %630 = vmatmul.mubr.bf16.gmra.mxu0 %v2104_v26  ;;  %790 = vmatmul.mubr.bf16.gmra.mxu1 %v2105_v27  ;;  %v2505_v26 = vrot.slane %v940_v23, %v944_v22  ;;  %v2507_v27 = vrot.slane %v1080_v25, %v944_v22 }
  0x33   :  { %1886 = vmatprep.mubr.msk.bf16.mxu0 %vm490_vm0, %v2106_v28  ;;  %1902 = vmatprep.mubr.msk.bf16.mxu1 %vm490_vm0, %v2108_v29  ;;  %v2509_v28 = vrot.slane %v940_v23, %v948_v24 }
  0x3a   :  { %640 = vmatmul.mubr.bf16.gmra.mxu0 %v2110_v30  ;;  %800 = vmatmul.mubr.bf16.gmra.mxu1 %v2111_v31 }
  0x3b   :  { %1887 = vmatprep.mubr.msk.bf16.mxu0 %vm490_vm0, %v2112_v32  ;;  %1903 = vmatprep.mubr.msk.bf16.mxu1 %vm490_vm0, %v2114_v33  ;;  %v2513_v33 = vrot.slane %v1080_v25, %v948_v24 }
  0x42   :  { %650 = vmatmul.mubr.bf16.gmra.mxu0 %v2116_v34  ;;  %810 = vmatmul.mubr.bf16.gmra.mxu1 %v2117_v35 }
  0x43   :  { %1888 = vmatprep.mubr.msk.bf16.mxu0 %vm490_vm0, %v2118_v36  ;;  %1904 = vmatprep.mubr.msk.bf16.mxu1 %vm490_vm0, %v2120_v37 }
  0x4a   :  { %660 = vmatmul.mubr.bf16.gmra.mxu0 %v2122_v38  ;;  %820 = vmatmul.mubr.bf16.gmra.mxu1 %v2123_v39 }
  0x4b   :  { %1889 = vmatprep.mubr.msk.bf16.mxu0 %vm490_vm0, %v2124_v40  ;;  %1905 = vmatprep.mubr.msk.bf16.mxu1 %vm490_vm0, %v2126_v41 }
  0x52   :  { %670 = vmatmul.mubr.bf16.gmra.mxu0 %v2128_v42  ;;  %830 = vmatmul.mubr.bf16.gmra.mxu1 %v2129_v43 }
  0x53   :  { %1890 = vmatprep.mubr.msk.bf16.mxu0 %vm490_vm0, %v2130_v44  ;;  %1906 = vmatprep.mubr.msk.bf16.mxu1 %vm490_vm0, %v2132_v45 }
  0x5a   :  { %680 = vmatmul.mubr.bf16.gmra.mxu0 %v2134_v46  ;;  %840 = vmatmul.mubr.bf16.gmra.mxu1 %v2135_v47 }
  0x5b   :  { %1891 = vmatprep.mubr.msk.bf16.mxu0 %vm490_vm0, %v2136_v48  ;;  %1907 = vmatprep.mubr.msk.bf16.mxu1 %vm490_vm0, %v2138_v49 }
  0x62   :  { %690 = vmatmul.mubr.bf16.gmra.mxu0 %v2140_v50  ;;  %850 = vmatmul.mubr.bf16.gmra.mxu1 %v2141_v51 }
  0x63   :  { %1892 = vmatprep.mubr.msk.bf16.mxu0 %vm490_vm0, %v2142_v52  ;;  %1908 = vmatprep.mubr.msk.bf16.mxu1 %vm490_vm0, %v2144_v53 }
  0x6a   :  { %700 = vmatmul.mubr.bf16.gmra.mxu0 %v2146_v54  ;;  %860 = vmatmul.mubr.bf16.gmra.mxu1 %v2147_v55 }
  0x6b   :  { %1893 = vmatprep.mubr.msk.bf16.mxu0 %vm490_vm0, %v2148_v56  ;;  %1909 = vmatprep.mubr.msk.bf16.mxu1 %vm490_vm0, %v2150_v57 }
  0x72   :  { %710 = vmatmul.mubr.bf16.gmra.mxu0 %v2152_v58  ;;  %870 = vmatmul.mubr.bf16.gmra.mxu1 %v2153_v59 }
  0x73   :  { %1894 = vmatprep.mubr.msk.bf16.mxu0 %vm490_vm0, %v2154_v60  ;;  %1910 = vmatprep.mubr.msk.bf16.mxu1 %vm490_vm0, %v2156_v61 }
  0x7a   :  { %720 = vmatmul.mubr.bf16.gmra.mxu0 %v2158_v62  ;;  %880 = vmatmul.mubr.bf16.gmra.mxu1 %v2159_v63 }
  0x7b   :  { %1895 = vmatprep.mubr.msk.bf16.mxu0 %vm490_vm0, %v2160_v0  ;;  %1911 = vmatprep.mubr.msk.bf16.mxu1 %vm490_vm0, %v2162_v1 }
  0x82   :  { %730 = vmatmul.mubr.bf16.gmra.mxu0 %v2164_v2  ;;  %890 = vmatmul.mubr.bf16.gmra.mxu1 %v2165_v3 }
  0x83   :  { %1896 = vmatprep.mubr.msk.bf16.mxu0 %vm490_vm0, %v2166_v4  ;;  %1912 = vmatprep.mubr.msk.bf16.mxu1 %vm490_vm0, %v2168_v5 }
  0x8a   :  { %740 = vmatmul.mubr.bf16.gmra.mxu0 %v2170_v6  ;;  %900 = vmatmul.mubr.bf16.gmra.mxu1 %v2171_v7 }
  0x8b   :  { %1897 = vmatprep.mubr.msk.bf16.mxu0 %vm490_vm0, %v2172_v8  ;;  %1913 = vmatprep.mubr.msk.bf16.mxu1 %vm490_vm0, %v2174_v9 }
  0x92   :  { %750 = vmatmul.mubr.bf16.gmra.mxu0 %v2176_v10  ;;  %910 = vmatmul.mubr.bf16.gmra.mxu1 %v2177_v11 }
  0x93   :  { %1898 = vmatprep.mubr.msk.bf16.mxu0 %vm490_vm0, %v2178_v12  ;;  %1914 = vmatprep.mubr.msk.bf16.mxu1 %vm490_vm0, %v2180_v13 }
  0x9a   :  { %760 = vmatmul.mubr.bf16.gmra.mxu0 %v2182_v14  ;;  %920 = vmatmul.mubr.bf16.gmra.mxu1 %v2183_v15 }
  0x9b   :  { %1899 = vmatprep.mubr.msk.bf16.mxu0 %vm490_vm0, %v2184_v16  ;;  %1915 = vmatprep.mubr.msk.bf16.mxu1 %vm490_vm0, %v2186_v17 }
  0xa2   :  { %770 = vmatmul.mubr.bf16.gmra.mxu0 %v2188_v18  ;;  %930 = vmatmul.mubr.bf16.gmra.mxu1 %v2189_v19 }
  0xea   :  { %v621_v29 = vpop.f32.mrf.mxu0  ;;  %v781_v30 = vpop.f32.mrf.mxu1 }
  0xeb   :  { %v952_v31 = vmul.f32 %v2505_v26, %v621_v29  ;;  %v1016_v32 = vmul.f32 %v2505_v26, %v781_v30 }
  0xec   :  { %v623_v34 = vpop.f32.mrf.mxu0  ;;  %v783_v35 = vpop.f32.mrf.mxu1 }
  0xed   :  { %v1092_v36 = vadd.f32 %v2507_v27, %v952_v31  ;;  %v1156_v37 = vadd.f32 %v2507_v27, %v1016_v32  ;;  %v953_v38 = vmul.f32 %v2509_v28, %v623_v34  ;;  %v1017_v39 = vmul.f32 %v2509_v28, %v783_v35 }
  0xee   :  { %v625_v40 = vpop.f32.mrf.mxu0  ;;  %v785_v41 = vpop.f32.mrf.mxu1 }
  0xef   :  { %v1093_v42 = vadd.f32 %v2513_v33, %v953_v38  ;;  %v1157_v43 = vadd.f32 %v2513_v33, %v1017_v39  ;;  %v1220_v44 = vmax.f32 %v1092_v36, 0.0  ;;  %v1284_v45 = vmax.f32 %v1156_v37, 0.0 }
  0xf0   :  { %v954_v46 = vmul.f32 %v2505_v26, %v625_v40  ;;  %v1018_v47 = vmul.f32 %v2505_v26, %v785_v41  ;;  %v627_v48 = vpop.f32.mrf.mxu0  ;;  %v787_v49 = vpop.f32.mrf.mxu1 }
  0xf1   :  { %v1221_v50 = vmax.f32 %v1093_v42, 0.0  ;;  %v1285_v51 = vmax.f32 %v1157_v43, 0.0  ;;  %v955_v52 = vmul.f32 %v2509_v28, %v627_v48  ;;  %v1019_v53 = vmul.f32 %v2509_v28, %v787_v49 }
  0xf2   :  { %v1094_v54 = vadd.f32 %v2507_v27, %v954_v46  ;;  %v1158_v55 = vadd.f32 %v2507_v27, %v1018_v47  ;;  %v631_v56 = vpop.f32.mrf.mxu0  ;;  %v791_v57 = vpop.f32.mrf.mxu1 }
  0xf3   :  { %v1980_v58 = vpack.c.bf16 %v1221_v50, %v1220_v44  ;;  %v2012_v59 = vpack.c.bf16 %v1285_v51, %v1284_v45  ;;  %v1095_v60 = vadd.f32 %v2513_v33, %v955_v52  ;;  %v1159_v61 = vadd.f32 %v2513_v33, %v1019_v53 }
  0xf4   :  { %v1222_v62 = vmax.f32 %v1094_v54, 0.0  ;;  %v1286_v63 = vmax.f32 %v1158_v55, 0.0  ;;  %v956_v0 = vmul.f32 %v2505_v26, %v631_v56  ;;  %v1020_v1 = vmul.f32 %v2505_v26, %v791_v57  ;;  %v633_v2 = vpop.f32.mrf.mxu0  ;;  %v793_v3 = vpop.f32.mrf.mxu1 }
  0xf5   :  { %1732 = vst [vmem:[%s2965_s4] sm:$0xff] %v1980_v58  ;;  %1764 = vst [vmem:[%s2965_s4 + $0x100] sm:$0xff] %v2012_v59  ;;  %v1223_v4 = vmax.f32 %v1095_v60, 0.0  ;;  %v1287_v5 = vmax.f32 %v1159_v61, 0.0  ;;  %v957_v6 = vmul.f32 %v2509_v28, %v633_v2  ;;  %v1021_v7 = vmul.f32 %v2509_v28, %v793_v3 }
  0xf6   :  { %v1096_v8 = vadd.f32 %v2507_v27, %v956_v0  ;;  %v1160_v9 = vadd.f32 %v2507_v27, %v1020_v1  ;;  %v635_v10 = vpop.f32.mrf.mxu0  ;;  %v795_v11 = vpop.f32.mrf.mxu1 }
  0xf7   :  { %v1981_v12 = vpack.c.bf16 %v1223_v4, %v1222_v62  ;;  %v2013_v13 = vpack.c.bf16 %v1287_v5, %v1286_v63  ;;  %v1097_v14 = vadd.f32 %v2513_v33, %v957_v6  ;;  %v1161_v15 = vadd.f32 %v2513_v33, %v1021_v7 }
  0xf8   :  { %v1224_v16 = vmax.f32 %v1096_v8, 0.0  ;;  %v1288_v17 = vmax.f32 %v1160_v9, 0.0  ;;  %v958_v18 = vmul.f32 %v2505_v26, %v635_v10  ;;  %v1022_v19 = vmul.f32 %v2505_v26, %v795_v11  ;;  %v637_v20 = vpop.f32.mrf.mxu0  ;;  %v797_v21 = vpop.f32.mrf.mxu1 }
  0xf9   :  { %1733 = vst [vmem:[%s2965_s4 + $0x8] sm:$0xff] %v1981_v12  ;;  %1765 = vst [vmem:[%s2965_s4 + $0x108] sm:$0xff] %v2013_v13  ;;  %v1225_v22 = vmax.f32 %v1097_v14, 0.0  ;;  %v1289_v23 = vmax.f32 %v1161_v15, 0.0  ;;  %v959_v24 = vmul.f32 %v2509_v28, %v637_v20  ;;  %v1023_v25 = vmul.f32 %v2509_v28, %v797_v21 }
  0xfa   :  { %v1098_v29 = vadd.f32 %v2507_v27, %v958_v18  ;;  %v1162_v30 = vadd.f32 %v2507_v27, %v1022_v19  ;;  %v641_v31 = vpop.f32.mrf.mxu0  ;;  %v801_v32 = vpop.f32.mrf.mxu1 }
  0xfb   :  { %v1982_v34 = vpack.c.bf16 %v1225_v22, %v1224_v16  ;;  %v2014_v35 = vpack.c.bf16 %v1289_v23, %v1288_v17  ;;  %v1099_v36 = vadd.f32 %v2513_v33, %v959_v24  ;;  %v1163_v37 = vadd.f32 %v2513_v33, %v1023_v25 }
  0xfc   :  { %v1226_v38 = vmax.f32 %v1098_v29, 0.0  ;;  %v1290_v39 = vmax.f32 %v1162_v30, 0.0  ;;  %v960_v40 = vmul.f32 %v2505_v26, %v641_v31  ;;  %v1024_v41 = vmul.f32 %v2505_v26, %v801_v32  ;;  %v643_v42 = vpop.f32.mrf.mxu0  ;;  %v803_v43 = vpop.f32.mrf.mxu1 }
  0xfd   :  { %1734 = vst [vmem:[%s2965_s4 + $0x10] sm:$0xff] %v1982_v34  ;;  %1766 = vst [vmem:[%s2965_s4 + $0x110] sm:$0xff] %v2014_v35  ;;  %v1227_v44 = vmax.f32 %v1099_v36, 0.0  ;;  %v1291_v45 = vmax.f32 %v1163_v37, 0.0  ;;  %v961_v46 = vmul.f32 %v2509_v28, %v643_v42  ;;  %v1025_v47 = vmul.f32 %v2509_v28, %v803_v43 }
  0xfe   :  { %v1100_v48 = vadd.f32 %v2507_v27, %v960_v40  ;;  %v1164_v49 = vadd.f32 %v2507_v27, %v1024_v41  ;;  %v645_v50 = vpop.f32.mrf.mxu0  ;;  %v805_v51 = vpop.f32.mrf.mxu1 }
  0xff   :  { %v1983_v52 = vpack.c.bf16 %v1227_v44, %v1226_v38  ;;  %v2015_v53 = vpack.c.bf16 %v1291_v45, %v1290_v39  ;;  %v1101_v54 = vadd.f32 %v2513_v33, %v961_v46  ;;  %v1165_v55 = vadd.f32 %v2513_v33, %v1025_v47 }
 0x100   :  { %v1228_v56 = vmax.f32 %v1100_v48, 0.0  ;;  %v1292_v57 = vmax.f32 %v1164_v49, 0.0  ;;  %v962_v58 = vmul.f32 %v2505_v26, %v645_v50  ;;  %v1026_v59 = vmul.f32 %v2505_v26, %v805_v51  ;;  %v647_v60 = vpop.f32.mrf.mxu0  ;;  %v807_v61 = vpop.f32.mrf.mxu1 }
 0x101   :  { %1735 = vst [vmem:[%s2965_s4 + $0x18] sm:$0xff] %v1983_v52  ;;  %1767 = vst [vmem:[%s2965_s4 + $0x118] sm:$0xff] %v2015_v53  ;;  %v1229_v62 = vmax.f32 %v1101_v54, 0.0  ;;  %v1293_v63 = vmax.f32 %v1165_v55, 0.0  ;;  %v963_v0 = vmul.f32 %v2509_v28, %v647_v60  ;;  %v1027_v1 = vmul.f32 %v2509_v28, %v807_v61 }
 0x102   :  { %v1102_v2 = vadd.f32 %v2507_v27, %v962_v58  ;;  %v1166_v3 = vadd.f32 %v2507_v27, %v1026_v59  ;;  %v651_v4 = vpop.f32.mrf.mxu0  ;;  %v811_v5 = vpop.f32.mrf.mxu1 }
 0x103   :  { %v1984_v6 = vpack.c.bf16 %v1229_v62, %v1228_v56  ;;  %v2016_v7 = vpack.c.bf16 %v1293_v63, %v1292_v57  ;;  %v1103_v8 = vadd.f32 %v2513_v33, %v963_v0  ;;  %v1167_v9 = vadd.f32 %v2513_v33, %v1027_v1 }
 0x104   :  { %v1230_v10 = vmax.f32 %v1102_v2, 0.0  ;;  %v1294_v11 = vmax.f32 %v1166_v3, 0.0  ;;  %v964_v12 = vmul.f32 %v2505_v26, %v651_v4  ;;  %v1028_v13 = vmul.f32 %v2505_v26, %v811_v5  ;;  %v653_v14 = vpop.f32.mrf.mxu0  ;;  %v813_v15 = vpop.f32.mrf.mxu1 }
 0x105   :  { %1736 = vst [vmem:[%s2965_s4 + $0x20] sm:$0xff] %v1984_v6  ;;  %1768 = vst [vmem:[%s2965_s4 + $0x120] sm:$0xff] %v2016_v7  ;;  %v1231_v16 = vmax.f32 %v1103_v8, 0.0  ;;  %v1295_v17 = vmax.f32 %v1167_v9, 0.0  ;;  %v965_v18 = vmul.f32 %v2509_v28, %v653_v14  ;;  %v1029_v19 = vmul.f32 %v2509_v28, %v813_v15 }
 0x106   :  { %v1104_v20 = vadd.f32 %v2507_v27, %v964_v12  ;;  %v1168_v21 = vadd.f32 %v2507_v27, %v1028_v13  ;;  %v655_v22 = vpop.f32.mrf.mxu0  ;;  %v815_v23 = vpop.f32.mrf.mxu1 }
 0x107   :  { %v1985_v24 = vpack.c.bf16 %v1231_v16, %v1230_v10  ;;  %v2017_v25 = vpack.c.bf16 %v1295_v17, %v1294_v11  ;;  %v1105_v29 = vadd.f32 %v2513_v33, %v965_v18  ;;  %v1169_v30 = vadd.f32 %v2513_v33, %v1029_v19 }
 0x108   :  { %v1232_v31 = vmax.f32 %v1104_v20, 0.0  ;;  %v1296_v32 = vmax.f32 %v1168_v21, 0.0  ;;  %v966_v34 = vmul.f32 %v2505_v26, %v655_v22  ;;  %v1030_v35 = vmul.f32 %v2505_v26, %v815_v23  ;;  %v657_v36 = vpop.f32.mrf.mxu0  ;;  %v817_v37 = vpop.f32.mrf.mxu1 }
 0x109   :  { %1737 = vst [vmem:[%s2965_s4 + $0x28] sm:$0xff] %v1985_v24  ;;  %1769 = vst [vmem:[%s2965_s4 + $0x128] sm:$0xff] %v2017_v25  ;;  %v1233_v38 = vmax.f32 %v1105_v29, 0.0  ;;  %v1297_v39 = vmax.f32 %v1169_v30, 0.0  ;;  %v967_v40 = vmul.f32 %v2509_v28, %v657_v36  ;;  %v1031_v41 = vmul.f32 %v2509_v28, %v817_v37 }
 0x10a   :  { %v1106_v42 = vadd.f32 %v2507_v27, %v966_v34  ;;  %v1170_v43 = vadd.f32 %v2507_v27, %v1030_v35  ;;  %v661_v44 = vpop.f32.mrf.mxu0  ;;  %v821_v45 = vpop.f32.mrf.mxu1 }
 0x10b   :  { %v1986_v46 = vpack.c.bf16 %v1233_v38, %v1232_v31  ;;  %v2018_v47 = vpack.c.bf16 %v1297_v39, %v1296_v32  ;;  %v1107_v48 = vadd.f32 %v2513_v33, %v967_v40  ;;  %v1171_v49 = vadd.f32 %v2513_v33, %v1031_v41 }
 0x10c   :  { %v1234_v50 = vmax.f32 %v1106_v42, 0.0  ;;  %v1298_v51 = vmax.f32 %v1170_v43, 0.0  ;;  %v968_v52 = vmul.f32 %v2505_v26, %v661_v44  ;;  %v1032_v53 = vmul.f32 %v2505_v26, %v821_v45  ;;  %v663_v54 = vpop.f32.mrf.mxu0  ;;  %v823_v55 = vpop.f32.mrf.mxu1 }
 0x10d   :  { %1738 = vst [vmem:[%s2965_s4 + $0x30] sm:$0xff] %v1986_v46  ;;  %1770 = vst [vmem:[%s2965_s4 + $0x130] sm:$0xff] %v2018_v47  ;;  %v1235_v56 = vmax.f32 %v1107_v48, 0.0  ;;  %v1299_v57 = vmax.f32 %v1171_v49, 0.0  ;;  %v969_v58 = vmul.f32 %v2509_v28, %v663_v54  ;;  %v1033_v59 = vmul.f32 %v2509_v28, %v823_v55 }
 0x10e   :  { %v1108_v60 = vadd.f32 %v2507_v27, %v968_v52  ;;  %v1172_v61 = vadd.f32 %v2507_v27, %v1032_v53  ;;  %v665_v62 = vpop.f32.mrf.mxu0  ;;  %v825_v63 = vpop.f32.mrf.mxu1 }
 0x10f   :  { %v1987_v0 = vpack.c.bf16 %v1235_v56, %v1234_v50  ;;  %v2019_v1 = vpack.c.bf16 %v1299_v57, %v1298_v51  ;;  %v1109_v2 = vadd.f32 %v2513_v33, %v969_v58  ;;  %v1173_v3 = vadd.f32 %v2513_v33, %v1033_v59 }
 0x110   :  { %v1236_v4 = vmax.f32 %v1108_v60, 0.0  ;;  %v1300_v5 = vmax.f32 %v1172_v61, 0.0  ;;  %v970_v6 = vmul.f32 %v2505_v26, %v665_v62  ;;  %v1034_v7 = vmul.f32 %v2505_v26, %v825_v63  ;;  %v667_v8 = vpop.f32.mrf.mxu0  ;;  %v827_v9 = vpop.f32.mrf.mxu1 }
 0x111   :  { %1739 = vst [vmem:[%s2965_s4 + $0x38] sm:$0xff] %v1987_v0  ;;  %1771 = vst [vmem:[%s2965_s4 + $0x138] sm:$0xff] %v2019_v1  ;;  %v1237_v10 = vmax.f32 %v1109_v2, 0.0  ;;  %v1301_v11 = vmax.f32 %v1173_v3, 0.0  ;;  %v971_v12 = vmul.f32 %v2509_v28, %v667_v8  ;;  %v1035_v13 = vmul.f32 %v2509_v28, %v827_v9 }
 0x112   :  { %v1110_v14 = vadd.f32 %v2507_v27, %v970_v6  ;;  %v1174_v15 = vadd.f32 %v2507_v27, %v1034_v7  ;;  %v671_v16 = vpop.f32.mrf.mxu0  ;;  %v831_v17 = vpop.f32.mrf.mxu1 }
 0x113   :  { %v1988_v18 = vpack.c.bf16 %v1237_v10, %v1236_v4  ;;  %v2020_v19 = vpack.c.bf16 %v1301_v11, %v1300_v5  ;;  %v1111_v20 = vadd.f32 %v2513_v33, %v971_v12  ;;  %v1175_v21 = vadd.f32 %v2513_v33, %v1035_v13 }
 0x114   :  { %v1238_v22 = vmax.f32 %v1110_v14, 0.0  ;;  %v1302_v23 = vmax.f32 %v1174_v15, 0.0  ;;  %v972_v24 = vmul.f32 %v2505_v26, %v671_v16  ;;  %v1036_v25 = vmul.f32 %v2505_v26, %v831_v17  ;;  %v673_v29 = vpop.f32.mrf.mxu0  ;;  %v833_v30 = vpop.f32.mrf.mxu1 }
 0x115   :  { %1740 = vst [vmem:[%s2965_s4 + $0x40] sm:$0xff] %v1988_v18  ;;  %1772 = vst [vmem:[%s2965_s4 + $0x140] sm:$0xff] %v2020_v19  ;;  %v1239_v31 = vmax.f32 %v1111_v20, 0.0  ;;  %v1303_v32 = vmax.f32 %v1175_v21, 0.0  ;;  %v973_v34 = vmul.f32 %v2509_v28, %v673_v29  ;;  %v1037_v35 = vmul.f32 %v2509_v28, %v833_v30 }
 0x116   :  { %v1112_v36 = vadd.f32 %v2507_v27, %v972_v24  ;;  %v1176_v37 = vadd.f32 %v2507_v27, %v1036_v25  ;;  %v675_v38 = vpop.f32.mrf.mxu0  ;;  %v835_v39 = vpop.f32.mrf.mxu1 }
 0x117   :  { %v1989_v40 = vpack.c.bf16 %v1239_v31, %v1238_v22  ;;  %v2021_v41 = vpack.c.bf16 %v1303_v32, %v1302_v23  ;;  %v1113_v42 = vadd.f32 %v2513_v33, %v973_v34  ;;  %v1177_v43 = vadd.f32 %v2513_v33, %v1037_v35 }
 0x118   :  { %v1240_v44 = vmax.f32 %v1112_v36, 0.0  ;;  %v1304_v45 = vmax.f32 %v1176_v37, 0.0  ;;  %v974_v46 = vmul.f32 %v2505_v26, %v675_v38  ;;  %v1038_v47 = vmul.f32 %v2505_v26, %v835_v39  ;;  %v677_v48 = vpop.f32.mrf.mxu0  ;;  %v837_v49 = vpop.f32.mrf.mxu1 }
 0x119   :  { %1741 = vst [vmem:[%s2965_s4 + $0x48] sm:$0xff] %v1989_v40  ;;  %1773 = vst [vmem:[%s2965_s4 + $0x148] sm:$0xff] %v2021_v41  ;;  %v1241_v50 = vmax.f32 %v1113_v42, 0.0  ;;  %v1305_v51 = vmax.f32 %v1177_v43, 0.0  ;;  %v975_v52 = vmul.f32 %v2509_v28, %v677_v48  ;;  %v1039_v53 = vmul.f32 %v2509_v28, %v837_v49 }
 0x11a   :  { %v1114_v54 = vadd.f32 %v2507_v27, %v974_v46  ;;  %v1178_v55 = vadd.f32 %v2507_v27, %v1038_v47  ;;  %v681_v56 = vpop.f32.mrf.mxu0  ;;  %v841_v57 = vpop.f32.mrf.mxu1 }
 0x11b   :  { %v1990_v58 = vpack.c.bf16 %v1241_v50, %v1240_v44  ;;  %v2022_v59 = vpack.c.bf16 %v1305_v51, %v1304_v45  ;;  %v1115_v60 = vadd.f32 %v2513_v33, %v975_v52  ;;  %v1179_v61 = vadd.f32 %v2513_v33, %v1039_v53 }
 0x11c   :  { %v1242_v62 = vmax.f32 %v1114_v54, 0.0  ;;  %v1306_v63 = vmax.f32 %v1178_v55, 0.0  ;;  %v976_v0 = vmul.f32 %v2505_v26, %v681_v56  ;;  %v1040_v1 = vmul.f32 %v2505_v26, %v841_v57  ;;  %v683_v2 = vpop.f32.mrf.mxu0  ;;  %v843_v3 = vpop.f32.mrf.mxu1 }
 0x11d   :  { %1742 = vst [vmem:[%s2965_s4 + $0x50] sm:$0xff] %v1990_v58  ;;  %1774 = vst [vmem:[%s2965_s4 + $0x150] sm:$0xff] %v2022_v59  ;;  %v1243_v4 = vmax.f32 %v1115_v60, 0.0  ;;  %v1307_v5 = vmax.f32 %v1179_v61, 0.0  ;;  %v977_v6 = vmul.f32 %v2509_v28, %v683_v2  ;;  %v1041_v7 = vmul.f32 %v2509_v28, %v843_v3 }
 0x11e   :  { %v1116_v8 = vadd.f32 %v2507_v27, %v976_v0  ;;  %v1180_v9 = vadd.f32 %v2507_v27, %v1040_v1  ;;  %v685_v10 = vpop.f32.mrf.mxu0  ;;  %v845_v11 = vpop.f32.mrf.mxu1 }
 0x11f   :  { %v1991_v12 = vpack.c.bf16 %v1243_v4, %v1242_v62  ;;  %v2023_v13 = vpack.c.bf16 %v1307_v5, %v1306_v63  ;;  %v1117_v14 = vadd.f32 %v2513_v33, %v977_v6  ;;  %v1181_v15 = vadd.f32 %v2513_v33, %v1041_v7 }
 0x120   :  { %v1244_v16 = vmax.f32 %v1116_v8, 0.0  ;;  %v1308_v17 = vmax.f32 %v1180_v9, 0.0  ;;  %v978_v18 = vmul.f32 %v2505_v26, %v685_v10  ;;  %v1042_v19 = vmul.f32 %v2505_v26, %v845_v11  ;;  %v687_v20 = vpop.f32.mrf.mxu0  ;;  %v847_v21 = vpop.f32.mrf.mxu1 }
 0x121   :  { %1743 = vst [vmem:[%s2965_s4 + $0x58] sm:$0xff] %v1991_v12  ;;  %1775 = vst [vmem:[%s2965_s4 + $0x158] sm:$0xff] %v2023_v13  ;;  %v1245_v22 = vmax.f32 %v1117_v14, 0.0  ;;  %v1309_v23 = vmax.f32 %v1181_v15, 0.0  ;;  %v979_v24 = vmul.f32 %v2509_v28, %v687_v20  ;;  %v1043_v25 = vmul.f32 %v2509_v28, %v847_v21 }
 0x122   :  { %v1118_v29 = vadd.f32 %v2507_v27, %v978_v18  ;;  %v1182_v30 = vadd.f32 %v2507_v27, %v1042_v19  ;;  %v691_v31 = vpop.f32.mrf.mxu0  ;;  %v851_v32 = vpop.f32.mrf.mxu1 }
 0x123   :  { %v1992_v34 = vpack.c.bf16 %v1245_v22, %v1244_v16  ;;  %v2024_v35 = vpack.c.bf16 %v1309_v23, %v1308_v17  ;;  %v1119_v36 = vadd.f32 %v2513_v33, %v979_v24  ;;  %v1183_v37 = vadd.f32 %v2513_v33, %v1043_v25 }
 0x124   :  { %v1246_v38 = vmax.f32 %v1118_v29, 0.0  ;;  %v1310_v39 = vmax.f32 %v1182_v30, 0.0  ;;  %v980_v40 = vmul.f32 %v2505_v26, %v691_v31  ;;  %v1044_v41 = vmul.f32 %v2505_v26, %v851_v32  ;;  %v693_v42 = vpop.f32.mrf.mxu0  ;;  %v853_v43 = vpop.f32.mrf.mxu1 }
 0x125   :  { %1744 = vst [vmem:[%s2965_s4 + $0x60] sm:$0xff] %v1992_v34  ;;  %1776 = vst [vmem:[%s2965_s4 + $0x160] sm:$0xff] %v2024_v35  ;;  %v1247_v44 = vmax.f32 %v1119_v36, 0.0  ;;  %v1311_v45 = vmax.f32 %v1183_v37, 0.0  ;;  %v981_v46 = vmul.f32 %v2509_v28, %v693_v42  ;;  %v1045_v47 = vmul.f32 %v2509_v28, %v853_v43 }
 0x126   :  { %v1120_v48 = vadd.f32 %v2507_v27, %v980_v40  ;;  %v1184_v49 = vadd.f32 %v2507_v27, %v1044_v41  ;;  %v695_v50 = vpop.f32.mrf.mxu0  ;;  %v855_v51 = vpop.f32.mrf.mxu1 }
 0x127   :  { %v1993_v52 = vpack.c.bf16 %v1247_v44, %v1246_v38  ;;  %v2025_v53 = vpack.c.bf16 %v1311_v45, %v1310_v39  ;;  %v1121_v54 = vadd.f32 %v2513_v33, %v981_v46  ;;  %v1185_v55 = vadd.f32 %v2513_v33, %v1045_v47 }
 0x128   :  { %v1248_v56 = vmax.f32 %v1120_v48, 0.0  ;;  %v1312_v57 = vmax.f32 %v1184_v49, 0.0  ;;  %v982_v58 = vmul.f32 %v2505_v26, %v695_v50  ;;  %v1046_v59 = vmul.f32 %v2505_v26, %v855_v51  ;;  %v697_v60 = vpop.f32.mrf.mxu0  ;;  %v857_v61 = vpop.f32.mrf.mxu1 }
 0x129   :  { %1745 = vst [vmem:[%s2965_s4 + $0x68] sm:$0xff] %v1993_v52  ;;  %1777 = vst [vmem:[%s2965_s4 + $0x168] sm:$0xff] %v2025_v53  ;;  %v1249_v62 = vmax.f32 %v1121_v54, 0.0  ;;  %v1313_v63 = vmax.f32 %v1185_v55, 0.0  ;;  %v983_v0 = vmul.f32 %v2509_v28, %v697_v60  ;;  %v1047_v1 = vmul.f32 %v2509_v28, %v857_v61 }
 0x12a   :  { %v1122_v2 = vadd.f32 %v2507_v27, %v982_v58  ;;  %v1186_v3 = vadd.f32 %v2507_v27, %v1046_v59  ;;  %v701_v4 = vpop.f32.mrf.mxu0  ;;  %v861_v5 = vpop.f32.mrf.mxu1 }
 0x12b   :  { %v1994_v6 = vpack.c.bf16 %v1249_v62, %v1248_v56  ;;  %v2026_v7 = vpack.c.bf16 %v1313_v63, %v1312_v57  ;;  %v1123_v8 = vadd.f32 %v2513_v33, %v983_v0  ;;  %v1187_v9 = vadd.f32 %v2513_v33, %v1047_v1 }
 0x12c   :  { %v1250_v10 = vmax.f32 %v1122_v2, 0.0  ;;  %v1314_v11 = vmax.f32 %v1186_v3, 0.0  ;;  %v984_v12 = vmul.f32 %v2505_v26, %v701_v4  ;;  %v1048_v13 = vmul.f32 %v2505_v26, %v861_v5  ;;  %v703_v14 = vpop.f32.mrf.mxu0  ;;  %v863_v15 = vpop.f32.mrf.mxu1 }
 0x12d   :  { %1746 = vst [vmem:[%s2965_s4 + $0x70] sm:$0xff] %v1994_v6  ;;  %1778 = vst [vmem:[%s2965_s4 + $0x170] sm:$0xff] %v2026_v7  ;;  %v1251_v16 = vmax.f32 %v1123_v8, 0.0  ;;  %v1315_v17 = vmax.f32 %v1187_v9, 0.0  ;;  %v985_v18 = vmul.f32 %v2509_v28, %v703_v14  ;;  %v1049_v19 = vmul.f32 %v2509_v28, %v863_v15 }
 0x12e   :  { %v1124_v20 = vadd.f32 %v2507_v27, %v984_v12  ;;  %v1188_v21 = vadd.f32 %v2507_v27, %v1048_v13  ;;  %v705_v22 = vpop.f32.mrf.mxu0  ;;  %v865_v23 = vpop.f32.mrf.mxu1 }
 0x12f   :  { %v1995_v24 = vpack.c.bf16 %v1251_v16, %v1250_v10  ;;  %v2027_v25 = vpack.c.bf16 %v1315_v17, %v1314_v11  ;;  %v1125_v29 = vadd.f32 %v2513_v33, %v985_v18  ;;  %v1189_v30 = vadd.f32 %v2513_v33, %v1049_v19 }
 0x130   :  { %v1252_v31 = vmax.f32 %v1124_v20, 0.0  ;;  %v1316_v32 = vmax.f32 %v1188_v21, 0.0  ;;  %v986_v34 = vmul.f32 %v2505_v26, %v705_v22  ;;  %v1050_v35 = vmul.f32 %v2505_v26, %v865_v23  ;;  %v707_v36 = vpop.f32.mrf.mxu0  ;;  %v867_v37 = vpop.f32.mrf.mxu1 }
 0x131   :  { %1747 = vst [vmem:[%s2965_s4 + $0x78] sm:$0xff] %v1995_v24  ;;  %1779 = vst [vmem:[%s2965_s4 + $0x178] sm:$0xff] %v2027_v25  ;;  %v1253_v38 = vmax.f32 %v1125_v29, 0.0  ;;  %v1317_v39 = vmax.f32 %v1189_v30, 0.0  ;;  %v987_v40 = vmul.f32 %v2509_v28, %v707_v36  ;;  %v1051_v41 = vmul.f32 %v2509_v28, %v867_v37 }
 0x132   :  { %v1126_v42 = vadd.f32 %v2507_v27, %v986_v34  ;;  %v1190_v43 = vadd.f32 %v2507_v27, %v1050_v35  ;;  %v711_v44 = vpop.f32.mrf.mxu0  ;;  %v871_v45 = vpop.f32.mrf.mxu1 }
 0x133   :  { %v1996_v46 = vpack.c.bf16 %v1253_v38, %v1252_v31  ;;  %v2028_v47 = vpack.c.bf16 %v1317_v39, %v1316_v32  ;;  %v1127_v48 = vadd.f32 %v2513_v33, %v987_v40  ;;  %v1191_v49 = vadd.f32 %v2513_v33, %v1051_v41 }
 0x134   :  { %v1254_v50 = vmax.f32 %v1126_v42, 0.0  ;;  %v1318_v51 = vmax.f32 %v1190_v43, 0.0  ;;  %v988_v52 = vmul.f32 %v2505_v26, %v711_v44  ;;  %v1052_v53 = vmul.f32 %v2505_v26, %v871_v45  ;;  %v713_v54 = vpop.f32.mrf.mxu0  ;;  %v873_v55 = vpop.f32.mrf.mxu1 }
 0x135   :  { %1748 = vst [vmem:[%s2965_s4 + $0x80] sm:$0xff] %v1996_v46  ;;  %1780 = vst [vmem:[%s2965_s4 + $0x180] sm:$0xff] %v2028_v47  ;;  %v1255_v56 = vmax.f32 %v1127_v48, 0.0  ;;  %v1319_v57 = vmax.f32 %v1191_v49, 0.0  ;;  %v989_v58 = vmul.f32 %v2509_v28, %v713_v54  ;;  %v1053_v59 = vmul.f32 %v2509_v28, %v873_v55 }
 0x136   :  { %v1128_v60 = vadd.f32 %v2507_v27, %v988_v52  ;;  %v1192_v61 = vadd.f32 %v2507_v27, %v1052_v53  ;;  %v715_v62 = vpop.f32.mrf.mxu0  ;;  %v875_v63 = vpop.f32.mrf.mxu1 }
 0x137   :  { %v1997_v0 = vpack.c.bf16 %v1255_v56, %v1254_v50  ;;  %v2029_v1 = vpack.c.bf16 %v1319_v57, %v1318_v51  ;;  %v1129_v2 = vadd.f32 %v2513_v33, %v989_v58  ;;  %v1193_v3 = vadd.f32 %v2513_v33, %v1053_v59 }
 0x138   :  { %v1256_v4 = vmax.f32 %v1128_v60, 0.0  ;;  %v1320_v5 = vmax.f32 %v1192_v61, 0.0  ;;  %v990_v6 = vmul.f32 %v2505_v26, %v715_v62  ;;  %v1054_v7 = vmul.f32 %v2505_v26, %v875_v63  ;;  %v717_v8 = vpop.f32.mrf.mxu0  ;;  %v877_v9 = vpop.f32.mrf.mxu1 }
 0x139   :  { %1749 = vst [vmem:[%s2965_s4 + $0x88] sm:$0xff] %v1997_v0  ;;  %1781 = vst [vmem:[%s2965_s4 + $0x188] sm:$0xff] %v2029_v1  ;;  %v1257_v10 = vmax.f32 %v1129_v2, 0.0  ;;  %v1321_v11 = vmax.f32 %v1193_v3, 0.0  ;;  %v991_v12 = vmul.f32 %v2509_v28, %v717_v8  ;;  %v1055_v13 = vmul.f32 %v2509_v28, %v877_v9 }
 0x13a   :  { %v1130_v14 = vadd.f32 %v2507_v27, %v990_v6  ;;  %v1194_v15 = vadd.f32 %v2507_v27, %v1054_v7  ;;  %v721_v16 = vpop.f32.mrf.mxu0  ;;  %v881_v17 = vpop.f32.mrf.mxu1 }
 0x13b   :  { %v1998_v18 = vpack.c.bf16 %v1257_v10, %v1256_v4  ;;  %v2030_v19 = vpack.c.bf16 %v1321_v11, %v1320_v5  ;;  %v1131_v20 = vadd.f32 %v2513_v33, %v991_v12  ;;  %v1195_v21 = vadd.f32 %v2513_v33, %v1055_v13 }
 0x13c   :  { %v1258_v22 = vmax.f32 %v1130_v14, 0.0  ;;  %v1322_v23 = vmax.f32 %v1194_v15, 0.0  ;;  %v992_v24 = vmul.f32 %v2505_v26, %v721_v16  ;;  %v1056_v25 = vmul.f32 %v2505_v26, %v881_v17  ;;  %v723_v29 = vpop.f32.mrf.mxu0  ;;  %v883_v30 = vpop.f32.mrf.mxu1 }
 0x13d   :  { %1750 = vst [vmem:[%s2965_s4 + $0x90] sm:$0xff] %v1998_v18  ;;  %1782 = vst [vmem:[%s2965_s4 + $0x190] sm:$0xff] %v2030_v19  ;;  %v1259_v31 = vmax.f32 %v1131_v20, 0.0  ;;  %v1323_v32 = vmax.f32 %v1195_v21, 0.0  ;;  %v993_v34 = vmul.f32 %v2509_v28, %v723_v29  ;;  %v1057_v35 = vmul.f32 %v2509_v28, %v883_v30 }
 0x13e   :  { %v1132_v36 = vadd.f32 %v2507_v27, %v992_v24  ;;  %v1196_v37 = vadd.f32 %v2507_v27, %v1056_v25  ;;  %v725_v38 = vpop.f32.mrf.mxu0  ;;  %v885_v39 = vpop.f32.mrf.mxu1 }
 0x13f   :  { %v1999_v40 = vpack.c.bf16 %v1259_v31, %v1258_v22  ;;  %v2031_v41 = vpack.c.bf16 %v1323_v32, %v1322_v23  ;;  %v1133_v42 = vadd.f32 %v2513_v33, %v993_v34  ;;  %v1197_v43 = vadd.f32 %v2513_v33, %v1057_v35 }
 0x140   :  { %v1260_v44 = vmax.f32 %v1132_v36, 0.0  ;;  %v1324_v45 = vmax.f32 %v1196_v37, 0.0  ;;  %v994_v46 = vmul.f32 %v2505_v26, %v725_v38  ;;  %v1058_v47 = vmul.f32 %v2505_v26, %v885_v39  ;;  %v727_v48 = vpop.f32.mrf.mxu0  ;;  %v887_v49 = vpop.f32.mrf.mxu1 }
 0x141   :  { %1751 = vst [vmem:[%s2965_s4 + $0x98] sm:$0xff] %v1999_v40  ;;  %1783 = vst [vmem:[%s2965_s4 + $0x198] sm:$0xff] %v2031_v41  ;;  %v1261_v50 = vmax.f32 %v1133_v42, 0.0  ;;  %v1325_v51 = vmax.f32 %v1197_v43, 0.0  ;;  %v995_v52 = vmul.f32 %v2509_v28, %v727_v48  ;;  %v1059_v53 = vmul.f32 %v2509_v28, %v887_v49 }
 0x142   :  { %v1134_v54 = vadd.f32 %v2507_v27, %v994_v46  ;;  %v1198_v55 = vadd.f32 %v2507_v27, %v1058_v47  ;;  %v731_v56 = vpop.f32.mrf.mxu0  ;;  %v891_v57 = vpop.f32.mrf.mxu1 }
 0x143   :  { %v2000_v58 = vpack.c.bf16 %v1261_v50, %v1260_v44  ;;  %v2032_v59 = vpack.c.bf16 %v1325_v51, %v1324_v45  ;;  %v1135_v60 = vadd.f32 %v2513_v33, %v995_v52  ;;  %v1199_v61 = vadd.f32 %v2513_v33, %v1059_v53 }
 0x144   :  { %v1262_v62 = vmax.f32 %v1134_v54, 0.0  ;;  %v1326_v63 = vmax.f32 %v1198_v55, 0.0  ;;  %v996_v0 = vmul.f32 %v2505_v26, %v731_v56  ;;  %v1060_v1 = vmul.f32 %v2505_v26, %v891_v57  ;;  %v733_v2 = vpop.f32.mrf.mxu0  ;;  %v893_v3 = vpop.f32.mrf.mxu1 }
 0x145   :  { %1752 = vst [vmem:[%s2965_s4 + $0xa0] sm:$0xff] %v2000_v58  ;;  %1784 = vst [vmem:[%s2965_s4 + $0x1a0] sm:$0xff] %v2032_v59  ;;  %v1263_v4 = vmax.f32 %v1135_v60, 0.0  ;;  %v1327_v5 = vmax.f32 %v1199_v61, 0.0  ;;  %v997_v6 = vmul.f32 %v2509_v28, %v733_v2  ;;  %v1061_v7 = vmul.f32 %v2509_v28, %v893_v3 }
 0x146   :  { %v1136_v8 = vadd.f32 %v2507_v27, %v996_v0  ;;  %v1200_v9 = vadd.f32 %v2507_v27, %v1060_v1  ;;  %v735_v10 = vpop.f32.mrf.mxu0  ;;  %v895_v11 = vpop.f32.mrf.mxu1 }
 0x147   :  { %v2001_v12 = vpack.c.bf16 %v1263_v4, %v1262_v62  ;;  %v2033_v13 = vpack.c.bf16 %v1327_v5, %v1326_v63  ;;  %v1137_v14 = vadd.f32 %v2513_v33, %v997_v6  ;;  %v1201_v15 = vadd.f32 %v2513_v33, %v1061_v7 }
 0x148   :  { %v1264_v16 = vmax.f32 %v1136_v8, 0.0  ;;  %v1328_v17 = vmax.f32 %v1200_v9, 0.0  ;;  %v998_v18 = vmul.f32 %v2505_v26, %v735_v10  ;;  %v1062_v19 = vmul.f32 %v2505_v26, %v895_v11  ;;  %v737_v20 = vpop.f32.mrf.mxu0  ;;  %v897_v21 = vpop.f32.mrf.mxu1 }
 0x149   :  { %1753 = vst [vmem:[%s2965_s4 + $0xa8] sm:$0xff] %v2001_v12  ;;  %1785 = vst [vmem:[%s2965_s4 + $0x1a8] sm:$0xff] %v2033_v13  ;;  %v1265_v22 = vmax.f32 %v1137_v14, 0.0  ;;  %v1329_v23 = vmax.f32 %v1201_v15, 0.0  ;;  %v999_v24 = vmul.f32 %v2509_v28, %v737_v20  ;;  %v1063_v25 = vmul.f32 %v2509_v28, %v897_v21 }
 0x14a   :  { %v1138_v29 = vadd.f32 %v2507_v27, %v998_v18  ;;  %v1202_v30 = vadd.f32 %v2507_v27, %v1062_v19  ;;  %v741_v31 = vpop.f32.mrf.mxu0  ;;  %v901_v32 = vpop.f32.mrf.mxu1 }
 0x14b   :  { %v2002_v34 = vpack.c.bf16 %v1265_v22, %v1264_v16  ;;  %v2034_v35 = vpack.c.bf16 %v1329_v23, %v1328_v17  ;;  %v1139_v36 = vadd.f32 %v2513_v33, %v999_v24  ;;  %v1203_v37 = vadd.f32 %v2513_v33, %v1063_v25 }
 0x14c   :  { %v1266_v38 = vmax.f32 %v1138_v29, 0.0  ;;  %v1330_v39 = vmax.f32 %v1202_v30, 0.0  ;;  %v1000_v40 = vmul.f32 %v2505_v26, %v741_v31  ;;  %v1064_v41 = vmul.f32 %v2505_v26, %v901_v32  ;;  %v743_v42 = vpop.f32.mrf.mxu0  ;;  %v903_v43 = vpop.f32.mrf.mxu1 }
 0x14d   :  { %1754 = vst [vmem:[%s2965_s4 + $0xb0] sm:$0xff] %v2002_v34  ;;  %1786 = vst [vmem:[%s2965_s4 + $0x1b0] sm:$0xff] %v2034_v35  ;;  %v1267_v44 = vmax.f32 %v1139_v36, 0.0  ;;  %v1331_v45 = vmax.f32 %v1203_v37, 0.0  ;;  %v1001_v46 = vmul.f32 %v2509_v28, %v743_v42  ;;  %v1065_v47 = vmul.f32 %v2509_v28, %v903_v43 }
 0x14e   :  { %v1140_v48 = vadd.f32 %v2507_v27, %v1000_v40  ;;  %v1204_v49 = vadd.f32 %v2507_v27, %v1064_v41  ;;  %v745_v50 = vpop.f32.mrf.mxu0  ;;  %v905_v51 = vpop.f32.mrf.mxu1 }
 0x14f   :  { %v2003_v52 = vpack.c.bf16 %v1267_v44, %v1266_v38  ;;  %v2035_v53 = vpack.c.bf16 %v1331_v45, %v1330_v39  ;;  %v1141_v54 = vadd.f32 %v2513_v33, %v1001_v46  ;;  %v1205_v55 = vadd.f32 %v2513_v33, %v1065_v47 }
 0x150   :  { %v1268_v56 = vmax.f32 %v1140_v48, 0.0  ;;  %v1332_v57 = vmax.f32 %v1204_v49, 0.0  ;;  %v1002_v58 = vmul.f32 %v2505_v26, %v745_v50  ;;  %v1066_v59 = vmul.f32 %v2505_v26, %v905_v51  ;;  %v747_v60 = vpop.f32.mrf.mxu0  ;;  %v907_v61 = vpop.f32.mrf.mxu1 }
 0x151   :  { %1755 = vst [vmem:[%s2965_s4 + $0xb8] sm:$0xff] %v2003_v52  ;;  %1787 = vst [vmem:[%s2965_s4 + $0x1b8] sm:$0xff] %v2035_v53  ;;  %v1269_v62 = vmax.f32 %v1141_v54, 0.0  ;;  %v1333_v63 = vmax.f32 %v1205_v55, 0.0  ;;  %v1003_v0 = vmul.f32 %v2509_v28, %v747_v60  ;;  %v1067_v1 = vmul.f32 %v2509_v28, %v907_v61 }
 0x152   :  { %v1142_v2 = vadd.f32 %v2507_v27, %v1002_v58  ;;  %v1206_v3 = vadd.f32 %v2507_v27, %v1066_v59  ;;  %v751_v4 = vpop.f32.mrf.mxu0  ;;  %v911_v5 = vpop.f32.mrf.mxu1 }
 0x153   :  { %v2004_v6 = vpack.c.bf16 %v1269_v62, %v1268_v56  ;;  %v2036_v7 = vpack.c.bf16 %v1333_v63, %v1332_v57  ;;  %v1143_v8 = vadd.f32 %v2513_v33, %v1003_v0  ;;  %v1207_v9 = vadd.f32 %v2513_v33, %v1067_v1 }
 0x154   :  { %v1270_v10 = vmax.f32 %v1142_v2, 0.0  ;;  %v1334_v11 = vmax.f32 %v1206_v3, 0.0  ;;  %v1004_v12 = vmul.f32 %v2505_v26, %v751_v4  ;;  %v1068_v13 = vmul.f32 %v2505_v26, %v911_v5  ;;  %v753_v14 = vpop.f32.mrf.mxu0  ;;  %v913_v15 = vpop.f32.mrf.mxu1 }
 0x155   :  { %1756 = vst [vmem:[%s2965_s4 + $0xc0] sm:$0xff] %v2004_v6  ;;  %1788 = vst [vmem:[%s2965_s4 + $0x1c0] sm:$0xff] %v2036_v7  ;;  %v1271_v16 = vmax.f32 %v1143_v8, 0.0  ;;  %v1335_v17 = vmax.f32 %v1207_v9, 0.0  ;;  %v1005_v18 = vmul.f32 %v2509_v28, %v753_v14  ;;  %v1069_v19 = vmul.f32 %v2509_v28, %v913_v15 }
 0x156   :  { %v1144_v20 = vadd.f32 %v2507_v27, %v1004_v12  ;;  %v1208_v21 = vadd.f32 %v2507_v27, %v1068_v13  ;;  %v755_v22 = vpop.f32.mrf.mxu0  ;;  %v915_v23 = vpop.f32.mrf.mxu1 }
 0x157   :  { %v2005_v24 = vpack.c.bf16 %v1271_v16, %v1270_v10  ;;  %v2037_v25 = vpack.c.bf16 %v1335_v17, %v1334_v11  ;;  %v1145_v29 = vadd.f32 %v2513_v33, %v1005_v18  ;;  %v1209_v30 = vadd.f32 %v2513_v33, %v1069_v19 }
 0x158   :  { %v1272_v31 = vmax.f32 %v1144_v20, 0.0  ;;  %v1336_v32 = vmax.f32 %v1208_v21, 0.0  ;;  %v1006_v34 = vmul.f32 %v2505_v26, %v755_v22  ;;  %v1070_v35 = vmul.f32 %v2505_v26, %v915_v23  ;;  %v757_v36 = vpop.f32.mrf.mxu0  ;;  %v917_v37 = vpop.f32.mrf.mxu1 }
 0x159   :  { %1757 = vst [vmem:[%s2965_s4 + $0xc8] sm:$0xff] %v2005_v24  ;;  %1789 = vst [vmem:[%s2965_s4 + $0x1c8] sm:$0xff] %v2037_v25  ;;  %v1273_v38 = vmax.f32 %v1145_v29, 0.0  ;;  %v1337_v39 = vmax.f32 %v1209_v30, 0.0  ;;  %v1007_v40 = vmul.f32 %v2509_v28, %v757_v36  ;;  %v1071_v41 = vmul.f32 %v2509_v28, %v917_v37 }
 0x15a   :  { %v1146_v42 = vadd.f32 %v2507_v27, %v1006_v34  ;;  %v1210_v43 = vadd.f32 %v2507_v27, %v1070_v35  ;;  %v761_v44 = vpop.f32.mrf.mxu0  ;;  %v921_v45 = vpop.f32.mrf.mxu1 }
 0x15b   :  { %v2006_v46 = vpack.c.bf16 %v1273_v38, %v1272_v31  ;;  %v2038_v47 = vpack.c.bf16 %v1337_v39, %v1336_v32  ;;  %v1147_v48 = vadd.f32 %v2513_v33, %v1007_v40  ;;  %v1211_v49 = vadd.f32 %v2513_v33, %v1071_v41 }
 0x15c   :  { %v1274_v50 = vmax.f32 %v1146_v42, 0.0  ;;  %v1338_v51 = vmax.f32 %v1210_v43, 0.0  ;;  %v1008_v52 = vmul.f32 %v2505_v26, %v761_v44  ;;  %v1072_v53 = vmul.f32 %v2505_v26, %v921_v45  ;;  %v763_v54 = vpop.f32.mrf.mxu0  ;;  %v923_v55 = vpop.f32.mrf.mxu1 }
 0x15d   :  { %1758 = vst [vmem:[%s2965_s4 + $0xd0] sm:$0xff] %v2006_v46  ;;  %1790 = vst [vmem:[%s2965_s4 + $0x1d0] sm:$0xff] %v2038_v47  ;;  %v1275_v56 = vmax.f32 %v1147_v48, 0.0  ;;  %v1339_v57 = vmax.f32 %v1211_v49, 0.0  ;;  %v1009_v58 = vmul.f32 %v2509_v28, %v763_v54  ;;  %v1073_v59 = vmul.f32 %v2509_v28, %v923_v55 }
 0x15e   :  { %v1148_v60 = vadd.f32 %v2507_v27, %v1008_v52  ;;  %v1212_v61 = vadd.f32 %v2507_v27, %v1072_v53  ;;  %v765_v62 = vpop.f32.mrf.mxu0  ;;  %v925_v63 = vpop.f32.mrf.mxu1 }
 0x15f   :  { %v2007_v0 = vpack.c.bf16 %v1275_v56, %v1274_v50  ;;  %v2039_v1 = vpack.c.bf16 %v1339_v57, %v1338_v51  ;;  %v1149_v2 = vadd.f32 %v2513_v33, %v1009_v58  ;;  %v1213_v3 = vadd.f32 %v2513_v33, %v1073_v59 }
 0x160   :  { %v1276_v4 = vmax.f32 %v1148_v60, 0.0  ;;  %v1340_v5 = vmax.f32 %v1212_v61, 0.0  ;;  %v1010_v6 = vmul.f32 %v2505_v26, %v765_v62  ;;  %v1074_v7 = vmul.f32 %v2505_v26, %v925_v63  ;;  %v767_v8 = vpop.f32.mrf.mxu0  ;;  %v927_v9 = vpop.f32.mrf.mxu1 }
 0x161   :  { %1759 = vst [vmem:[%s2965_s4 + $0xd8] sm:$0xff] %v2007_v0  ;;  %1791 = vst [vmem:[%s2965_s4 + $0x1d8] sm:$0xff] %v2039_v1  ;;  %v1277_v10 = vmax.f32 %v1149_v2, 0.0  ;;  %v1341_v11 = vmax.f32 %v1213_v3, 0.0  ;;  %v1011_v12 = vmul.f32 %v2509_v28, %v767_v8  ;;  %v1075_v13 = vmul.f32 %v2509_v28, %v927_v9 }
 0x162   :  { %v1150_v14 = vadd.f32 %v2507_v27, %v1010_v6  ;;  %v1214_v15 = vadd.f32 %v2507_v27, %v1074_v7  ;;  %v771_v16 = vpop.f32.mrf.mxu0  ;;  %v931_v17 = vpop.f32.mrf.mxu1 }
 0x163   :  { %v2008_v18 = vpack.c.bf16 %v1277_v10, %v1276_v4  ;;  %v2040_v19 = vpack.c.bf16 %v1341_v11, %v1340_v5  ;;  %v1151_v20 = vadd.f32 %v2513_v33, %v1011_v12  ;;  %v1215_v21 = vadd.f32 %v2513_v33, %v1075_v13 }
 0x164   :  { %v1278_v22 = vmax.f32 %v1150_v14, 0.0  ;;  %v1342_v23 = vmax.f32 %v1214_v15, 0.0  ;;  %v1012_v24 = vmul.f32 %v2505_v26, %v771_v16  ;;  %v1076_v25 = vmul.f32 %v2505_v26, %v931_v17  ;;  %v773_v29 = vpop.f32.mrf.mxu0  ;;  %v933_v30 = vpop.f32.mrf.mxu1 }
 0x165   :  { %1760 = vst [vmem:[%s2965_s4 + $0xe0] sm:$0xff] %v2008_v18  ;;  %1792 = vst [vmem:[%s2965_s4 + $0x1e0] sm:$0xff] %v2040_v19  ;;  %v1279_v31 = vmax.f32 %v1151_v20, 0.0  ;;  %v1343_v32 = vmax.f32 %v1215_v21, 0.0  ;;  %v1013_v34 = vmul.f32 %v2509_v28, %v773_v29  ;;  %v1077_v35 = vmul.f32 %v2509_v28, %v933_v30 }
 0x166   :  { %v1152_v36 = vadd.f32 %v2507_v27, %v1012_v24  ;;  %v1216_v37 = vadd.f32 %v2507_v27, %v1076_v25  ;;  %v775_v38 = vpop.f32.mrf.mxu0  ;;  %v935_v39 = vpop.f32.mrf.mxu1 }
 0x167   :  { %v2009_v40 = vpack.c.bf16 %v1279_v31, %v1278_v22  ;;  %v2041_v41 = vpack.c.bf16 %v1343_v32, %v1342_v23  ;;  %v1153_v42 = vadd.f32 %v2513_v33, %v1013_v34  ;;  %v1217_v43 = vadd.f32 %v2513_v33, %v1077_v35 }
 0x168   :  { %v1280_v44 = vmax.f32 %v1152_v36, 0.0  ;;  %v1344_v45 = vmax.f32 %v1216_v37, 0.0  ;;  %v1014_v46 = vmul.f32 %v2505_v26, %v775_v38  ;;  %v1078_v47 = vmul.f32 %v2505_v26, %v935_v39  ;;  %v777_v48 = vpop.f32.mrf.mxu0  ;;  %v937_v49 = vpop.f32.mrf.mxu1 }
 0x169   :  { %1761 = vst [vmem:[%s2965_s4 + $0xe8] sm:$0xff] %v2009_v40  ;;  %1793 = vst [vmem:[%s2965_s4 + $0x1e8] sm:$0xff] %v2041_v41  ;;  %v1281_v50 = vmax.f32 %v1153_v42, 0.0  ;;  %v1345_v51 = vmax.f32 %v1217_v43, 0.0  ;;  %v1015_v52 = vmul.f32 %v2509_v28, %v777_v48  ;;  %v1079_v53 = vmul.f32 %v2509_v28, %v937_v49 }
 0x16a   :  { %v1154_v54 = vadd.f32 %v2507_v27, %v1014_v46  ;;  %v1218_v26 = vadd.f32 %v2507_v27, %v1078_v47 }
 0x16b   :  { %v2010_v55 = vpack.c.bf16 %v1281_v50, %v1280_v44  ;;  %v2042_v56 = vpack.c.bf16 %v1345_v51, %v1344_v45  ;;  %v1155_v57 = vadd.f32 %v2513_v33, %v1015_v52  ;;  %v1219_v58 = vadd.f32 %v2513_v33, %v1079_v53 }
 0x16c   :  { %v1282_v59 = vmax.f32 %v1154_v54, 0.0  ;;  %v1346_v28 = vmax.f32 %v1218_v26, 0.0 }
 0x16d   :  { %1762 = vst [vmem:[%s2965_s4 + $0xf0] sm:$0xff] %v2010_v55  ;;  %1794 = vst [vmem:[%s2965_s4 + $0x1f0] sm:$0xff] %v2042_v56  ;;  %v1283_v60 = vmax.f32 %v1155_v57, 0.0  ;;  %v1347_v61 = vmax.f32 %v1219_v58, 0.0 }
 0x16f   :  { %v2011_v62 = vpack.c.bf16 %v1283_v60, %v1282_v59  ;;  %v2043_v27 = vpack.c.bf16 %v1347_v61, %v1346_v28 }
 0x171   :  { %1763 = vst [vmem:[%s2965_s4 + $0xf8] sm:$0xff] %v2011_v62  ;;  %1795 = vst [vmem:[%s2965_s4 + $0x1f8] sm:$0xff] %v2043_v27 }

// kernel: augmentor_forward.3
= control target key start
LH: loop header
LB: loop body
LE: loop exit
PB: predicated region body
PF: predicated region fallthrough
CT: control target
= control target key end

     0   :  { %17 = vsyncpa [#allocation4], 0  ;;  %s5794_s0 = inlined_call_operand.vmem [shape: bf16[8,9,9,256], index: 0, kind: input, shape index: {}]   ;;  %s5795_s1 = inlined_call_operand.vmem [shape: bf16[256,128], index: 1, kind: input, shape index: {}]   ;;  %s5796_s2 = inlined_call_operand.vmem [shape: f32[1,128], index: 2, kind: input, shape index: {}]   ;;  %s5797_s3 = inlined_call_operand.vmem [shape: f32[1,128], index: 3, kind: input, shape index: {}]   ;;  %s5798_s4 = inlined_call_operand.vmem [shape: bf16[4,256,128], index: 4, kind: input, shape index: {}]   ;;  %s5799_s5 = inlined_call_operand.vmem [shape: bf16[128,128], index: 5, kind: input, shape index: {}]   ;;  %s5800_s6 = inlined_call_operand.vmem [shape: f32[1,128], index: 6, kind: input, shape index: {}]   ;;  %s5801_s7 = inlined_call_operand.vmem [shape: f32[1,128], index: 7, kind: input, shape index: {}]   ;;  %s5802_s8 = inlined_call_operand.vmem [shape: bf16[128,256], index: 8, kind: input, shape index: {}]   ;;  %s5803_s9 = inlined_call_operand.vmem [shape: f32[1,256], index: 9, kind: input, shape index: {}]   ;;  %s5804_s10 = inlined_call_operand.vmem [shape: f32[1,256], index: 10, kind: input, shape index: {}]   ;;  %s5805_s11 = inlined_call_operand.vmem [shape: bf16[256,128], index: 11, kind: input, shape index: {}]   ;;  %s5806_s12 = inlined_call_operand.hbm [shape: f32[2,1,128], index: 12, kind: output, shape index: {}]  }
   0x1   :  { %19 = vsyncpa [#allocation4 + $0x1], 0  ;;  %s4559_s21 = smov 0   ;;  %s4561_s22 = smov 0  }
   0x2   :  { %s4563_s23 = smov 0   ;;  %s4565_s24 = smov 0  }
   0x3 LB: > { %5829 = sst [smem:[#allocation6_spill]] %s4486_s23  ;;  %s4580_s25 = sadd.s32 4294967295, %s4490_s24   ;;  %s4490_s24 = sphi %s4565_s24, %s5877_s24   ;;  %s4486_s23 = sphi %s4563_s23, %s5879_s23   ;;  %s4482_s22 = sphi %s4561_s22, %s5881_s22   ;;  %s4478_s21 = sphi %s4559_s21, %s5880_s21  }
   0x4   : > { %s3618_s26 = sadd.s32 4294967294, %s4490_s24   ;;  %s4584_s27 = sadd.s32 1, %s4490_s24  }
   0x5   : > { %5830 = sst [smem:[#allocation7_spill]] %s4584_s27  ;;  %s289_s28 = sadd.s32 1, %s4486_s23 }
   0x6   : > { %s286_s29 = ssub.s32 %s4490_s24, %s4584_s27  ;;  %p299_p0 = scmp.ne.s32.totalorder %s4486_s23, %s4482_s22 }
   0x7   : > { %p287_p1 = scmp.eq.s32.totalorder %s286_s29, 0  ;;  %p300_p2 = scmp.eq.s32.totalorder %s4580_s25, 1 }
   0x8   : > { %p305_p3 = scmp.ne.s32.totalorder %s4482_s22, %s4478_s21  ;;  %p306_p4 = scmp.eq.s32.totalorder %s3618_s26, 1 }
   0x9   : > { %s4595_s30 = scalar_select %p287_p1, %s4486_s23, %s289_s28  }
   0xa   : > { %p4597_p5 = por %p300_p2, %p299_p0  ;;  %p4601_p6 = por %p306_p4, %p305_p3 }
   0xb   : > { %5831 = sst [smem:[#allocation8_spill]] %s4595_s30  ;;  %p3621_p7 = scmp.ge.s32.totalorder %s4490_s24, 1 }
   0xc   : > { %s5833_s14 = scalar_select %p4601_p6, 1, 0 }
   0xd   : > { %p367_p8 = scmp.lt.s32.totalorder %s4490_s24, 3 }
   0xe   : > { %5834 = sst [smem:[#allocation9_spill]] %s5833_s14 }
   0xf   : > { %p368_p9 = pnand %p3621_p7, %p367_p8 }
  0x11   : > { %371 = sbr.rel (%p368_p9) target bundleno = 1067 (0x42b), region = 68 }
  0x16   : > { %v4286_v0 = vld [vmem:[%s5795_s1 + $0x78] sm:$0xff]   ;;  %s3622_s17 = sshll.u32 %s4580_s25, 2  ;;  %v4288_v2 = vld [vmem:[%s5795_s1 + $0x70] sm:$0xff]   ;;  %v4290_v4 = vld [vmem:[%s5795_s1 + $0x68] sm:$0xff]   ;;  %vm450_vm0 = vsmask.f32 3328 }
  0x17   : > { %v4287_v1 = vld [vmem:[%s5795_s1 + $0x38] sm:$0xff]   ;;  %p410_p10 = scmp.lt.s32.totalorder %s3622_s17, 7  ;;  %3987 = vmatprep.subr.bf16.mxu0 %v4286_v0  ;;  %v4289_v3 = vld [vmem:[%s5795_s1 + $0x30] sm:$0xff]   ;;  %v4291_v5 = vld [vmem:[%s5795_s1 + $0x28] sm:$0xff]   ;;  %vm451_vm1 = vsmask.f32 7440 }
  0x18   : > { %3988 = vmatpush3.bf16.msra.mxu0 %v4287_v1  ;;  %v4292_v6 = vld [vmem:[%s5795_s1 + $0x60] sm:$0xff]   ;;  %v4294_v8 = vld [vmem:[%s5795_s1 + $0x58] sm:$0xff]   ;;  %v4296_v10 = vld [vmem:[%s5795_s1 + $0x50] sm:$0xff]   ;;  %vm1317_vm3 = vcmask 1043456   ;;  %vm1318_vm4 = vsmask.f32 7938 }
  0x19   : > { %3989 = vmatprep.subr.bf16.mxu0 %v4288_v2  ;;  %s5883_s17 = smov (!%p410_p10, %s3622_s17), 7  ;;  %v4293_v7 = vld [vmem:[%s5795_s1 + $0x20] sm:$0xff]   ;;  %v4295_v9 = vld [vmem:[%s5795_s1 + $0x18] sm:$0xff]   ;;  %v4297_v18 = vld [vmem:[%s5795_s1 + $0x10] sm:$0xff]   ;;  %vm1323_vm5 = vcmask 1040384   ;;  %vm1595_vm9 = vcmask 1042432  }
  0x1a   : > { %s4245_s26 = smul.u32 144, %s5883_s17  ;;  %v4298_v22 = vld [vmem:[%s5795_s1 + $0x48] sm:$0xff]   ;;  %vm4688_vm2 = vmor %vm450_vm0, %vm451_vm1  ;;  %v4300_v50 = vld [vmem:[%s5795_s1 + $0x40] sm:$0xff]   ;;  %vm1324_vm6 = vsmask.f32 256  ;;  %vm1596_vm10 = vcmask 1046532  }
  0x1b   : > { %v4299_v43 = vld [vmem:[%s5795_s1 + $0x8] sm:$0xff]   ;;  %v4301_v0 = vld [vmem:[%s5795_s1] sm:$0xff]   ;;  %vm5035_vm7 = vmand %vm1317_vm3, %vm1318_vm4  ;;  %s407_s19 = sand.u32 1, %s4482_s22   ;;  %s4493_s28 = smov [#allocation3]  }
  0x1c   : > { %3990 = vmatpush3.bf16.msra.mxu0 %v4289_v3  ;;  %s4638_s18 = scalar_lea.vmem %s5794_s0, %s4245_s26  ;;  %vm5039_vm8 = vmand %vm1323_vm5, %vm1324_vm6  ;;  %s408_s30 = scalar_lea.vmem [#allocation3], %s407_s19 }
  0x1d   : > { %3991 = vmatprep.subr.bf16.mxu0 %v4290_v4  ;;  %v4647_v11 = vld [vmem:[%s4638_s18] sm:$0xff]  ;;  %v4650_v12 = vld [vmem:[%s4638_s18 + $0x10] sm:$0xff]  ;;  %v442_v15 = vld [vmem:[%s4638_s18 + $0x8] sm:$0x11]  ;;  %s3563_s17 = sshll.u32 %s408_s30, 4  ;;  %s3551_s20 = scalar_lea.sflag [#allocation4], %s407_s19  ;;  %s3564_s17 = int_to_ptr.vmem [resolvable:$true] %s3563_s17 }
  0x1e   : > { %v3624_v13 = vld [vmem:[%s4638_s18 + $0x90] sm:$0xff]  ;;  %v4654_v14 = vld [vmem:[%s4638_s18 + $0xa0] sm:$0xff]  ;;  %v443_v16 = vld [vmem:[%s4638_s18 + $0x18] sm:$0x11]  ;;  %v454_v17 = vshrl.u32 %v4647_v11, 16  ;;  %v457_v19 = vshll.u32 %v4647_v11, 16 }
  0x1f   : > { %v463_v20 = vshll.u32 %v442_v15, 16  ;;  %v4664_v21 = vld [vmem:[%s4638_s18 + $0x120] sm:$0xff]  ;;  %v468_v24 = vshrl.u32 %v4650_v12, 16  ;;  %v471_v25 = vshll.u32 %v4650_v12, 16  ;;  %v477_v26 = vshll.u32 %v443_v16, 16  ;;  %v4672_v27 = vld [vmem:[%s4638_s18 + $0x130] sm:$0xff]  ;;  %vm5055_vm11 = vmor %vm1595_vm9, %vm1596_vm10 }
  0x20   : > { %3992 = vmatpush3.bf16.msra.mxu0 %v4291_v5  ;;  %v456_v23 = vrot.slane %v454_v17, 4  ;;  %v434_v28 = vmax.bf16 %v3624_v13, %v4647_v11  ;;  %v435_v29 = vmax.bf16 %v4654_v14, %v4650_v12  ;;  %v459_v30 = vrot.slane %v457_v19, 5  ;;  %v3648_v32 = vld [vmem:[%s4638_s18 + $0x128] sm:$0x11]  ;;  %v3649_v33 = vld [vmem:[%s4638_s18 + $0x138] sm:$0x11] }
  0x21   : > { %3993 = vmatprep.subr.bf16.mxu0 %v4292_v6  ;;  %v465_v31 = vrot.slane %v463_v20, 5  ;;  %v470_v34 = vrot.slane %v468_v24, 4  ;;  %v473_v35 = vrot.slane %v471_v25, 5  ;;  %v479_v36 = vrot.slane %v477_v26, 5  ;;  %v3672_v42 = vld [vmem:[%s4638_s18 + $0x18] sm:$0x11] }
  0x22   : > { %v624_v37 = vshrl.u32 %v4664_v21, 16  ;;  %v460_v38 = vor.u32 %v459_v30, %v456_v23  ;;  %v627_v39 = vshll.u32 %v4664_v21, 16  ;;  %v633_v40 = vshll.u32 %v3648_v32, 16  ;;  %v4694_v49 = vld [vmem:[%s4638_s18 + $0x20] sm:$0xff]  ;;  %v3673_v61 = vld [vmem:[%s4638_s18 + $0x28] sm:$0x11] }
  0x23   : > { %v638_v41 = vshrl.u32 %v4672_v27, 16  ;;  %v474_v45 = vor.u32 %v473_v35, %v470_v34  ;;  %v641_v47 = vshll.u32 %v4672_v27, 16  ;;  %v647_v48 = vshll.u32 %v3649_v33, 16  ;;  %v3665_v4 = vld [vmem:[%s4638_s18 + $0xb0] sm:$0xff]  ;;  %v4715_v11 = vld [vmem:[%s4638_s18 + $0xc0] sm:$0xff]  ;;  %s4430_s26 = scalar_lea.vmem %s3564_s17, 16 }
  0x24   : > { %3994 = vmatpush3.bf16.msra.mxu0 %v4293_v7  ;;  %v626_v46 = vrot.slane %v624_v37, 4  ;;  %v461_v51 = vrot.slane %v460_v38, 4  ;;  %v629_v52 = vrot.slane %v627_v39, 5  ;;  %v635_v53 = vrot.slane %v633_v40, 5  ;;  %v3640_v7 = vld [vmem:[%s4638_s18 + $0x1b0] sm:$0xff]  ;;  %v3641_v15 = vld [vmem:[%s4638_s18 + $0x1c0] sm:$0xff]  ;;  %p4431_p11 = scmp.ne.s32.totalorder %s3564_s17, %s4430_s26 }
  0x25   : > { %3995 = vmatprep.subr.bf16.mxu0 %v4294_v8  ;;  %v640_v54 = vrot.slane %v638_v41, 4  ;;  %v4699_v55 = vrot.slane %v474_v45, 4  ;;  %v643_v56 = vrot.slane %v641_v47, 5  ;;  %v649_v57 = vrot.slane %v647_v48, 5  ;;  %v4723_v19 = vld [vmem:[%s4638_s18 + $0x30] sm:$0xff]  ;;  %v3634_v26 = vld [vmem:[%s4638_s18 + $0x140] sm:$0xff] }
  0x26   : > { %v803_v58 = vshll.u32 %v3672_v42, 16  ;;  %v466_v59 = vsel %vm4688_vm2, %v461_v51, %v465_v31  ;;  %v630_v60 = vor.u32 %v629_v52, %v626_v46  ;;  %v808_v62 = vshrl.u32 %v4694_v49, 16  ;;  %v444_v20 = vld [vmem:[%s4638_s18 + $0x28] sm:$0x11]  ;;  %v3635_v45 = vld [vmem:[%s4638_s18 + $0x150] sm:$0xff]  ;;  %p4432_p12 = pnand %p4431_p11, %p4597_p5  ;;  %s4434_s29 = sshll.u32 %s4493_s28, 4  ;;  %s4435_s29 = int_to_ptr.vmem [resolvable:$false] %s4434_s29 }
  0x27   : > { %v811_v63 = vshll.u32 %v4694_v49, 16  ;;  %v480_v1 = vsel %vm4688_vm2, %v4699_v55, %v479_v36  ;;  %v573_v2 = vmax.bf16 %v466_v59, %v434_v28  ;;  %v644_v3 = vor.u32 %v643_v56, %v640_v54  ;;  %v3650_v38 = vld [vmem:[%s4638_s18 + $0x148] sm:$0x11]  ;;  %v3651_v59 = vld [vmem:[%s4638_s18 + $0x158] sm:$0x11]  ;;  %p4437_p0 = scmp.lt.s32.totalorder %s3564_s17, %s4435_s29 }
  0x28   : > { %3996 = vmatpush3.bf16.msra.mxu0 %v4295_v9  ;;  %v805_v5 = vrot.slane %v803_v58, 5  ;;  %v574_v6 = vmax.bf16 %v480_v1, %v435_v29  ;;  %v631_v8 = vrot.slane %v630_v60, 4  ;;  %v810_v9 = vrot.slane %v808_v62, 4  ;;  %v3642_v58 = vld [vmem:[%s4638_s18 + $0x1d0] sm:$0xff]  ;;  %p4433_p13 = pneg %p4432_p12 }
  0x29   : > { %3997 = vmatprep.subr.bf16.mxu0 %v4296_v10  ;;  %v813_v10 = vrot.slane %v811_v63, 5  ;;  %v590_v13 = vmax.bf16 %v4664_v21, %v573_v2  ;;  %v645_v16 = vrot.slane %v644_v3, 4  ;;  %v436_v25 = vmax.bf16 %v3665_v4, %v4694_v49  ;;  %v445_v21 = vld [vmem:[%s4638_s18 + $0x38] sm:$0x11] }
  0x2a   : > { %v806_v17 = vsel %vm4688_vm2, %v4699_v55, %v805_v5  ;;  %v636_v23 = vsel %vm4688_vm2, %v631_v8, %v635_v53  ;;  %v437_v31 = vmax.bf16 %v4715_v11, %v4723_v19  ;;  %v491_v33 = vshll.u32 %v444_v20, 16  ;;  %v4758_v8 = vld [vmem:[%s4638_s18 + $0xd0] sm:$0xff] }
  0x2b   : > { %v814_v24 = vor.u32 %v813_v10, %v810_v9  ;;  %v607_v28 = vmax.bf16 %v3640_v7, %v590_v13  ;;  %v650_v29 = vsel %vm4688_vm2, %v645_v16, %v649_v57  ;;  %v496_v34 = vshrl.u32 %v4723_v19, 16  ;;  %v3675_v9 = vld [vmem:[%s4638_s18 + $0x48] sm:$0x11]  ;;  %v3643_v13 = vld [vmem:[%s4638_s18 + $0x1e0] sm:$0xff] }
  0x2c   : > { %3998 = vmatpush3.bf16.msra.mxu0 %v4297_v18  ;;  %v817_v18 = vshll.u32 %v3673_v61, 16  ;;  %v499_v36 = vshll.u32 %v4723_v19, 16  ;;  %v505_v37 = vshll.u32 %v445_v21, 16  ;;  %v652_v39 = vshrl.u32 %v3634_v26, 16  ;;  %v446_v21 = vld [vmem:[%s4638_s18 + $0x48] sm:$0x11] }
  0x2d   : > { %3999 = vmatprep.subr.bf16.mxu0 %v4298_v22  ;;  %v591_v22 = vmax.bf16 %v4672_v27, %v574_v6  ;;  %v815_v32 = vrot.slane %v814_v24, 4  ;;  %v743_v35 = vmax.bf16 %v636_v23, %v607_v28  ;;  %v493_v42 = vrot.slane %v491_v33, 5 }
  0x2e   : > { %v819_v30 = vrot.slane %v817_v18, 5  ;;  %v501_v47 = vrot.slane %v499_v36, 5  ;;  %v507_v48 = vrot.slane %v505_v37, 5  ;;  %v655_v53 = vshll.u32 %v3634_v26, 16  ;;  %v4766_v18 = vld [vmem:[%s4638_s18 + $0xe0] sm:$0xff] }
  0x2f   : > { %v608_v27 = vmax.bf16 %v3641_v15, %v591_v22  ;;  %v760_v46 = vmax.bf16 %v743_v35, %v4650_v12  ;;  %v494_v52 = vsel %vm4688_vm2, %v815_v32, %v493_v42  ;;  %v661_v54 = vshll.u32 %v3650_v38, 16  ;;  %v3636_v36 = vld [vmem:[%s4638_s18 + $0x160] sm:$0xff] }
  0x30   : > { %4000 = vmatpush3.bf16.msra.mxu0 %v4299_v43  ;;  %v820_v41 = vsel %vm4688_vm2, %v815_v32, %v819_v30  ;;  %v498_v43 = vrot.slane %v496_v34, 4  ;;  %v575_v57 = vmax.bf16 %v494_v52, %v436_v25  ;;  %v666_v12 = vshrl.u32 %v3635_v45, 16  ;;  %v4773_v25 = vld [vmem:[%s4638_s18 + $0x50] sm:$0xff] }
  0x31   : > { %4001 = vmatprep.subr.bf16.mxu0 %v4300_v50  ;;  %v744_v40 = vmax.bf16 %v650_v29, %v608_v27  ;;  %v654_v50 = vrot.slane %v652_v39, 4  ;;  %v777_v55 = vmax.bf16 %v4654_v14, %v760_v46  ;;  %v657_v61 = vrot.slane %v655_v53, 5  ;;  %v447_v27 = vld [vmem:[%s4638_s18 + $0x58] sm:$0x11] }
  0x32   : > { %v502_v56 = vor.u32 %v501_v47, %v498_v43  ;;  %v663_v62 = vrot.slane %v661_v54, 5  ;;  %v669_v63 = vshll.u32 %v3635_v45, 16  ;;  %v592_v14 = vmax.bf16 %v3634_v26, %v575_v57 }
  0x33   : > { %v761_v51 = vmax.bf16 %v4694_v49, %v744_v40  ;;  %v4750_v49 = vld [vmem:[%s4638_s18 + $0x40] sm:$0xff]  ;;  %v4753_v1 = vmax.bf16 %v806_v17, %v777_v55  ;;  %v668_v3 = vrot.slane %v666_v12, 4  ;;  %v658_v6 = vor.u32 %v657_v61, %v654_v50  ;;  %v4794_v55 = vld [vmem:[%s4638_s18 + $0x170] sm:$0xff] }
  0x34   : > { %4002 = vmatpush3.bf16.msra.mxu0 %v4301_v0  ;;  %v3674_v0 = vld [vmem:[%s4638_s18 + $0x38] sm:$0x11]  ;;  %v503_v2 = vrot.slane %v502_v56, 4  ;;  %v671_v7 = vrot.slane %v669_v63, 5  ;;  %v609_v15 = vmax.bf16 %v3642_v58, %v592_v14  ;;  %v836_v17 = vshrl.u32 %v4750_v49, 16 }
  0x35   : > { %v778_v60 = vmax.bf16 %v3665_v4, %v761_v51  ;;  %5837 = vst [vmem:[#allocation10_spill] sm:$0xff] %v4753_v1  ;;  %v675_v4 = vshll.u32 %v3651_v59, 16  ;;  %v831_v16 = vshll.u32 %v3674_v0, 16  ;;  %v659_v24 = vrot.slane %v658_v6, 4  ;;  %v3653_v59 = vld [vmem:[%s4638_s18 + $0x178] sm:$0x11] }
  0x36   : > { %v508_v10 = vsel %vm4688_vm2, %v503_v2, %v507_v48  ;;  %v672_v26 = vor.u32 %v671_v7, %v668_v3  ;;  %v838_v30 = vrot.slane %v836_v17, 4  ;;  %v839_v34 = vshll.u32 %v4750_v49, 16  ;;  %v3676_v63 = vld [vmem:[%s4638_s18 + $0x58] sm:$0x11] }
  0x37   : > { %v4755_v5 = vmax.bf16 %v820_v41, %v778_v60  ;;  %v576_v23 = vmax.bf16 %v508_v10, %v437_v31  ;;  %v677_v28 = vrot.slane %v675_v4, 5  ;;  %v833_v29 = vrot.slane %v831_v16, 5  ;;  %v3644_v4 = vld [vmem:[%s4638_s18 + $0x1f0] sm:$0xff]  ;;  %v4810_v16 = vld [vmem:[%s4638_s18 + $0x60] sm:$0xff] }
  0x38   : > { %v664_v33 = vsel %vm4688_vm2, %v659_v24, %v663_v62  ;;  %v845_v35 = vshll.u32 %v3675_v9, 16  ;;  %v673_v31 = vrot.slane %v672_v26, 4  ;;  %v438_v39 = vmax.bf16 %v4758_v8, %v4750_v49  ;;  %v3677_v24 = vld [vmem:[%s4638_s18 + $0x68] sm:$0x11] }
  0x39   : > { %5838 = vst [vmem:[#allocation11_spill] sm:$0xff] %v4755_v5  ;;  %v3681_v20 = vcombine.high %v4753_v1, %v4755_v5  ;;  %v3680_v22 = vcombine.low %v4753_v1, %v4755_v5  ;;  %v593_v32 = vmax.bf16 %v3635_v45, %v576_v23  ;;  %v745_v37 = vmax.bf16 %v664_v33, %v609_v15  ;;  %v3652_v45 = vld [vmem:[%s4638_s18 + $0x168] sm:$0x11]  ;;  %v4816_v23 = vld [vmem:[%s4638_s18 + $0xf0] sm:$0xff]  ;;  %v3645_v33 = vld [vmem:[%s4638_s18 + $0x200] sm:$0xff] }
  0x3a   : > { %v834_v38 = vsel %vm4688_vm2, %v503_v2, %v833_v29  ;;  %v841_v41 = vrot.slane %v839_v34, 5  ;;  %v847_v42 = vrot.slane %v845_v35, 5  ;;  %v439_v43 = vmax.bf16 %v4766_v18, %v4773_v25  ;;  %v4827_v35 = vld [vmem:[%s4638_s18 + $0x100] sm:$0xff] }
  0x3b   : > { %1121 = vmatprep.mubr.bf16.mxu0 %v3681_v20  ;;  %v610_v40 = vmax.bf16 %v3643_v13, %v593_v32  ;;  %v678_v46 = vsel %vm4688_vm2, %v673_v31, %v677_v28  ;;  %v762_v47 = vmax.bf16 %v745_v37, %v4723_v19  ;;  %v519_v48 = vshll.u32 %v446_v21, 16 }
  0x3c   : > { %1122 = vmatmul.mubr.bf16.vlgmr.msra.gmra.mxu0 %v3680_v22  ;;  %v524_v50 = vshrl.u32 %v4773_v25, 16  ;;  %v842_v52 = vor.u32 %v841_v41, %v838_v30  ;;  %v527_v53 = vshll.u32 %v4773_v25, 16  ;;  %v533_v54 = vshll.u32 %v447_v27, 16 }
  0x3d   : > { %v746_v51 = vmax.bf16 %v678_v46, %v610_v40  ;;  %v779_v56 = vmax.bf16 %v4715_v11, %v762_v47  ;;  %v521_v57 = vrot.slane %v519_v48, 5  ;;  %v680_v12 = vshrl.u32 %v3636_v36, 16  ;;  %v448_v40 = vld [vmem:[%s4638_s18 + $0x68] sm:$0x11]  ;;  %v449_v47 = vld [vmem:[%s4638_s18 + $0x78] sm:$0x11] }
  0x3e   : > { %v526_v58 = vrot.slane %v524_v50, 4  ;;  %v843_v60 = vrot.slane %v842_v52, 4  ;;  %v529_v61 = vrot.slane %v527_v53, 5  ;;  %v535_v62 = vrot.slane %v533_v54, 5  ;;  %v3638_v52 = vld [vmem:[%s4638_s18 + $0x180] sm:$0xff] }
  0x3f   : > { %v763_v19 = vmax.bf16 %v4750_v49, %v746_v51  ;;  %v4800_v0 = vmax.bf16 %v834_v38, %v779_v56  ;;  %v682_v2 = vrot.slane %v680_v12, 4  ;;  %v683_v14 = vshll.u32 %v3636_v36, 16 }
  0x40   : > { %v689_v3 = vshll.u32 %v3652_v45, 16  ;;  %v848_v6 = vsel %vm4688_vm2, %v843_v60, %v847_v42  ;;  %v522_v49 = vsel %vm4688_vm2, %v843_v60, %v521_v57  ;;  %v530_v7 = vor.u32 %v529_v61, %v526_v58 }
  0x41   : > { %5839 = vst [vmem:[#allocation12_spill] sm:$0xff] %v4800_v0  ;;  %v780_v11 = vmax.bf16 %v4758_v8, %v763_v19  ;;  %v577_v9 = vmax.bf16 %v522_v49, %v438_v39  ;;  %v685_v10 = vrot.slane %v683_v14, 5  ;;  %v694_v15 = vshrl.u32 %v4794_v55, 16  ;;  %v4830_v39 = vld [vmem:[%s4638_s18 + $0x70] sm:$0xff]  ;;  %v3654_v19 = vld [vmem:[%s4638_s18 + $0x188] sm:$0x11] }
  0x42   : > { %v691_v13 = vrot.slane %v689_v3, 5  ;;  %v531_v8 = vrot.slane %v530_v7, 4  ;;  %v697_v20 = vshll.u32 %v4794_v55, 16  ;;  %v703_v22 = vshll.u32 %v3653_v59, 16 }
  0x43   : > { %v4812_v17 = vmax.bf16 %v848_v6, %v780_v11  ;;  %v594_v21 = vmax.bf16 %v3636_v36, %v577_v9  ;;  %v686_v26 = vor.u32 %v685_v10, %v682_v2  ;;  %v696_v28 = vrot.slane %v694_v15, 4  ;;  %v3639_v6 = vld [vmem:[%s4638_s18 + $0x190] sm:$0xff]  ;;  %v3655_v9 = vld [vmem:[%s4638_s18 + $0x198] sm:$0x11] }
  0x44   : > { %v859_v29 = vshll.u32 %v3676_v63, 16  ;;  %v536_v32 = vsel %vm4688_vm2, %v531_v8, %v535_v62  ;;  %v699_v34 = vrot.slane %v697_v20, 5  ;;  %v705_v38 = vrot.slane %v703_v22, 5  ;;  %v3678_v20 = vld [vmem:[%s4638_s18 + $0x78] sm:$0x11] }
  0x45   : > { %5840 = vst [vmem:[#allocation13_spill] sm:$0xff] %v4812_v17  ;;  %v3683_v30 = vcombine.high %v4800_v0, %v4812_v17  ;;  %v3682_v27 = vcombine.low %v4800_v0, %v4812_v17  ;;  %v578_v31 = vmax.bf16 %v536_v32, %v439_v43  ;;  %v611_v37 = vmax.bf16 %v3644_v4, %v594_v21 }
  0x46   : > { %v687_v36 = vrot.slane %v686_v26, 4  ;;  %v700_v41 = vor.u32 %v699_v34, %v696_v28  ;;  %v861_v42 = vrot.slane %v859_v29, 5  ;;  %v864_v45 = vshrl.u32 %v4810_v16, 16 }
  0x47   : > { %1129 = vmatprep.mubr.bf16.mxu0 %v3683_v30  ;;  %v867_v46 = vshll.u32 %v4810_v16, 16  ;;  %v595_v48 = vmax.bf16 %v4794_v55, %v578_v31  ;;  %v873_v50 = vshll.u32 %v3677_v24, 16  ;;  %v440_v51 = vmax.bf16 %v4816_v23, %v4810_v16  ;;  %v3646_v30 = vld [vmem:[%s4638_s18 + $0x210] sm:$0xff]  ;;  %v3663_v31 = vld [vmem:[%s4638_s18 + $0x80] sm:$0xff] }
  0x48   : > { %1130 = vmatmul.mubr.bf16.gmra.mxu0 %v3682_v27  ;;  %v692_v43 = vsel %vm4688_vm2, %v687_v36, %v691_v13  ;;  %v701_v53 = vrot.slane %v700_v41, 4  ;;  %v862_v56 = vsel %vm4688_vm2, %v531_v8, %v861_v42  ;;  %v866_v57 = vrot.slane %v864_v45, 4 }
  0x49   : > { %v747_v54 = vmax.bf16 %v692_v43, %v611_v37  ;;  %v612_v58 = vmax.bf16 %v3645_v33, %v595_v48  ;;  %v869_v59 = vrot.slane %v867_v46, 5  ;;  %v875_v12 = vrot.slane %v873_v50, 5 }
  0x4a   : > { %v441_v55 = vmax.bf16 %v4827_v35, %v4830_v39  ;;  %v706_v60 = vsel %vm4688_vm2, %v701_v53, %v705_v38  ;;  %v547_v62 = vshll.u32 %v448_v40, 16  ;;  %v552_v63 = vshrl.u32 %v4830_v39, 16 }
  0x4b   : > { %v764_v61 = vmax.bf16 %v747_v54, %v4773_v25  ;;  %v748_v2 = vmax.bf16 %v706_v60, %v612_v58  ;;  %v870_v14 = vor.u32 %v869_v59, %v866_v57  ;;  %v555_v3 = vshll.u32 %v4830_v39, 16 }
  0x4c   : > { %v561_v11 = vshll.u32 %v449_v47, 16  ;;  %v549_v7 = vrot.slane %v547_v62, 5  ;;  %v554_v4 = vrot.slane %v552_v63, 4  ;;  %v708_v10 = vshrl.u32 %v3638_v52, 16 }
  0x4d   : > { %v781_v49 = vmax.bf16 %v4766_v18, %v764_v61  ;;  %v765_v13 = vmax.bf16 %v4810_v16, %v748_v2  ;;  %v871_v25 = vrot.slane %v870_v14, 4  ;;  %v557_v15 = vrot.slane %v555_v3, 5 }
  0x4e   : > { %v563_v8 = vrot.slane %v561_v11, 5  ;;  %v710_v24 = vrot.slane %v708_v10, 4  ;;  %v711_v21 = vshll.u32 %v3638_v52, 16  ;;  %v717_v26 = vshll.u32 %v3654_v19, 16 }
  0x4f   : > { %v4857_v22 = vmax.bf16 %v862_v56, %v781_v49  ;;  %v782_v18 = vmax.bf16 %v4816_v23, %v765_v13  ;;  %v876_v28 = vsel %vm4688_vm2, %v871_v25, %v875_v12  ;;  %v550_v29 = vsel %vm4688_vm2, %v871_v25, %v549_v7  ;;  %v3679_v23 = vld [vmem:[%s4638_s18 + $0x88] sm:$0x11]  ;;  %v3647_v56 = vld [vmem:[%s4638_s18 + $0x220] sm:$0xff]  ;;  %v3671_v7 = vld [vmem:[%s4638_s18 + $0x110] sm:$0xff]  ;;  %s3976_s18 = sshll.u32 %s4580_s25, 4  ;;  %s4436_s25 = scalar_lea.vmem %s4435_s29, 32 }
  0x50   : > { %v558_v16 = vor.u32 %v557_v15, %v554_v4  ;;  %v579_v27 = vmax.bf16 %v550_v29, %v440_v51  ;;  %v713_v32 = vrot.slane %v711_v21, 5  ;;  %v719_v33 = vrot.slane %v717_v26, 5  ;;  %v4302_v26 = vld [vmem:[%s5798_s4 + $0xf8] sm:$0xff]   ;;  %v4305_v29 = vld [vmem:[%s5798_s4 + $0xb0] sm:$0xff]   ;;  %s3561_s14 = scalar_lea.hbm %s5806_s12, %s3976_s18  ;;  %p4438_p1 = scmp.lt.s32.totalorder %s4436_s25, %s4430_s26 }
  0x51   : > { %5841 = vst [vmem:[#allocation14_spill] sm:$0xff] %v4857_v22  ;;  %v722_v34 = vshrl.u32 %v3639_v6, 16  ;;  %v4866_v37 = vmax.bf16 %v876_v28, %v782_v18  ;;  %v725_v38 = vshll.u32 %v3639_v6, 16  ;;  %v731_v40 = vshll.u32 %v3655_v9, 16  ;;  %v4303_v18 = vld [vmem:[%s5798_s4 + $0xb8] sm:$0xff]   ;;  %4027 = vmatprep.subr.bf16.mxu1 %v4302_v26  ;;  %v4304_v28 = vld [vmem:[%s5798_s4 + $0xf0] sm:$0xff]  }
  0x52   : > { %v559_v36 = vrot.slane %v558_v16, 4  ;;  %v596_v41 = vmax.bf16 %v3638_v52, %v579_v27  ;;  %v714_v42 = vor.u32 %v713_v32, %v710_v24  ;;  %v887_v46 = vshll.u32 %v3678_v20, 16  ;;  %4028 = vmatpush3.bf16.msra.mxu1 %v4303_v18  ;;  %v4306_v16 = vld [vmem:[%s5798_s4 + $0x78] sm:$0xff]   ;;  %v4308_v27 = vld [vmem:[%s5798_s4 + $0xe8] sm:$0xff]   ;;  %p4439_p2 = por %p4438_p1, %p4437_p0 }
  0x53   : > { %5842 = vst [vmem:[#allocation15_spill] sm:$0xff] %v4866_v37  ;;  %v724_v45 = vrot.slane %v722_v34, 4  ;;  %v3685_v47 = vcombine.high %v4857_v22, %v4866_v37  ;;  %v3684_v48 = vcombine.low %v4857_v22, %v4866_v37  ;;  %v727_v50 = vrot.slane %v725_v38, 5  ;;  %4029 = vmatprep.subr.bf16.mxu1 %v4304_v28  ;;  %4067 = vmatprep.subr.bf16.mxu0 %v4306_v16  ;;  %v4309_v32 = vld [vmem:[%s5798_s4 + $0xa8] sm:$0xff]   ;;  %v4311_v34 = vld [vmem:[%s5798_s4 + $0x30] sm:$0xff]  }
  0x54   : > { %v564_v43 = vsel %vm4688_vm2, %v559_v36, %v563_v8  ;;  %v613_v53 = vmax.bf16 %v3646_v30, %v596_v41  ;;  %v715_v54 = vrot.slane %v714_v42, 4  ;;  %v733_v52 = vrot.slane %v731_v40, 5  ;;  %v4307_v30 = vld [vmem:[%s5798_s4 + $0x38] sm:$0xff]   ;;  %v4314_v38 = vld [vmem:[%s5798_s4 + $0x68] sm:$0xff]   ;;  %v4318_v42 = vld [vmem:[%s5798_s4 + $0x60] sm:$0xff]   ;;  %p4440_p3 = pnand %p4439_p2, %p4433_p13 }
  0x55   : > { %v580_v51 = vmax.bf16 %v564_v43, %v441_v55  ;;  %1137 = vmatprep.mubr.bf16.mxu0 %v3685_v47  ;;  %v728_v57 = vor.u32 %v727_v50, %v724_v45  ;;  %v892_v58 = vshrl.u32 %v3663_v31, 16  ;;  %v895_v59 = vshll.u32 %v3663_v31, 16  ;;  %4068 = vmatpush3.bf16.msra.mxu0 %v4307_v30  ;;  %v4315_v40 = vld [vmem:[%s5798_s4 + $0x28] sm:$0xff]   ;;  %v4317_v41 = vld [vmem:[%s5798_s4 + $0x98] sm:$0xff]   ;;  %v4319_v45 = vld [vmem:[%s5798_s4 + $0x20] sm:$0xff]  }
  0x56   : > { %1138 = vmatmul.mubr.bf16.gmra.mxu0 %v3684_v48  ;;  %v720_v19 = vsel %vm4688_vm2, %v715_v54, %v719_v33  ;;  %v889_v60 = vrot.slane %v887_v46, 5  ;;  %v901_v61 = vshll.u32 %v3679_v23, 16  ;;  %4030 = vmatpush3.bf16.msra.mxu1 %v4305_v29  ;;  %v4310_v33 = vld [vmem:[%s5798_s4 + $0x70] sm:$0xff]   ;;  %v4316_v23 = vld [vmem:[%s5798_s4 + $0xd8] sm:$0xff]   ;;  %v4324_v50 = vld [vmem:[%s5798_s4 + $0xc8] sm:$0xff]  }
  0x57   : > { %v597_v12 = vmax.bf16 %v3639_v6, %v580_v51  ;;  %v729_v62 = vrot.slane %v728_v57, 4  ;;  %v749_v63 = vmax.bf16 %v720_v19, %v613_v53  ;;  %v894_v2 = vrot.slane %v892_v58, 4  ;;  %4031 = vmatprep.subr.bf16.mxu1 %v4308_v27  ;;  %4069 = vmatprep.subr.bf16.mxu0 %v4310_v33  ;;  %v4320_v46 = vld [vmem:[%s5798_s4 + $0xd0] sm:$0xff]   ;;  %v4322_v48 = vld [vmem:[%s5798_s4 + $0x58] sm:$0xff]   ;;  %v4325_v51 = vld [vmem:[%s5798_s4 + $0x88] sm:$0xff]  }
  0x58   : > { %v897_v14 = vrot.slane %v895_v59, 5  ;;  %v903_v3 = vrot.slane %v901_v61, 5  ;;  %v890_v10 = vsel %vm4688_vm2, %v559_v36, %v889_v60  ;;  %v4313_v36 = vld [vmem:[%s5798_s4 + $0xa0] sm:$0xff]   ;;  %v4321_v47 = vld [vmem:[%s5798_s4 + $0x90] sm:$0xff]   ;;  %v4323_v43 = vld [vmem:[%s5798_s4 + $0x18] sm:$0xff]  }
  0x59   : > { %v614_v55 = vmax.bf16 %v3647_v56, %v597_v12  ;;  %v734_v11 = vsel %vm4688_vm2, %v729_v62, %v733_v52  ;;  %v766_v49 = vmax.bf16 %v749_v63, %v4830_v39  ;;  %4070 = vmatpush3.bf16.msra.mxu0 %v4311_v34  ;;  %v4326_v53 = vld [vmem:[%s5798_s4 + $0x50] sm:$0xff]   ;;  %v4328_v56 = vld [vmem:[%s5798_s4 + $0xc0] sm:$0xff]   ;;  %v4330_v52 = vld [vmem:[%s5798_s4 + $0x48] sm:$0xff]  }
  0x5a   : > { %v898_v9 = vor.u32 %v897_v14, %v894_v2  ;;  %4032 = vmatpush3.bf16.msra.mxu1 %v4309_v32  ;;  %4071 = vmatprep.subr.bf16.mxu0 %v4314_v38  ;;  %v4327_v54 = vld [vmem:[%s5798_s4 + $0x10] sm:$0xff]   ;;  %v4329_v57 = vld [vmem:[%s5798_s4 + $0x80] sm:$0xff]   ;;  %v4331_v58 = vld [vmem:[%s5798_s4 + $0x8] sm:$0xff]  }
  0x5b   : > { %v750_v4 = vmax.bf16 %v734_v11, %v614_v55  ;;  %v783_v6 = vmax.bf16 %v4827_v35, %v766_v49  ;;  %v5811_v35 = vmov 0   ;;  %v4333_v59 = vld [vmem:[%s5798_s4 + $0x178] sm:$0xff]   ;;  %v4335_v12 = vld [vmem:[%s5798_s4 + $0x40] sm:$0xff]  }
  0x5c   : > { %v899_v25 = vrot.slane %v898_v9, 4  ;;  %1198 = vst [vmem:[#allocation2 + $0x8] sm:$0xf] %v5811_v35  ;;  %1199 = vst [vmem:[#allocation2 + $0xc] sm:$0x1] %v5811_v35  ;;  %v4336_v19 = vld [vmem:[%s5798_s4] sm:$0xff]  }
  0x5d   : > { %v767_v13 = vmax.bf16 %v3663_v31, %v750_v4  ;;  %v4887_v20 = vmax.bf16 %v890_v10, %v783_v6  ;;  %1196 = vst [vmem:[#allocation2] sm:$0xf] %v5811_v35  ;;  %1197 = vst [vmem:[#allocation2 + $0x4] sm:$0x1] %v5811_v35  ;;  %v4312_v31 = vld [vmem:[%s5798_s4 + $0xe0] sm:$0xff]   ;;  %4072 = vmatpush3.bf16.msra.mxu0 %v4315_v40  ;;  %v4340_v60 = vld [vmem:[%s5798_s4 + $0x1f8] sm:$0xff]  }
  0x5e   : > { %v904_v8 = vsel %vm4688_vm2, %v899_v25, %v903_v3  ;;  %1200 = vst [vmem:[#allocation2 + $0x10] sm:$0xf] %v5811_v35  ;;  %1201 = vst [vmem:[#allocation2 + $0x14] sm:$0x1] %v5811_v35  ;;  %4033 = vmatprep.subr.bf16.mxu1 %v4312_v31  ;;  %4073 = vmatprep.subr.bf16.mxu0 %v4318_v42  ;;  %v5020_v63 = vld [vmem:[%s5796_s2] ss:$0 sm:$0xff] }
  0x5f   : > { %v784_v15 = vmax.bf16 %v3671_v7, %v767_v13  ;;  %5843 = vst [vmem:[#allocation16_spill] sm:$0xff] %v4887_v20  ;;  %1202 = vst [vmem:[#allocation2 + $0x18] sm:$0xf] %v5811_v35  ;;  %4034 = vmatpush3.bf16.msra.mxu1 %v4313_v36  ;;  %v5025_v55 = vld [vmem:[%s5797_s3] ss:$0 sm:$0xff] }
  0x60   : > { %1203 = vst [vmem:[#allocation2 + $0x1c] sm:$0x1] %v5811_v35  ;;  %1204 = vst [vmem:[#allocation2 + $0x20] sm:$0xf] %v5811_v35  ;;  %4035 = vmatprep.subr.bf16.mxu1 %v4316_v23 }
  0x61   : > { %v4889_v24 = vmax.bf16 %v904_v8, %v784_v15  ;;  %1205 = vst [vmem:[#allocation2 + $0x24] sm:$0x1] %v5811_v35  ;;  %1206 = vst [vmem:[#allocation2 + $0x28] sm:$0xf] %v5811_v35  ;;  %4074 = vmatpush3.bf16.msra.mxu0 %v4319_v45 }
  0x62   : > { %1207 = vst [vmem:[#allocation2 + $0x2c] sm:$0x1] %v5811_v35  ;;  %1208 = vst [vmem:[#allocation2 + $0x30] sm:$0xf] %v5811_v35  ;;  %4075 = vmatprep.subr.bf16.mxu0 %v4322_v48 }
  0x63   : > { %5844 = vst [vmem:[#allocation17_spill] sm:$0xff] %v4889_v24  ;;  %v3687_v39 = vcombine.high %v4887_v20, %v4889_v24  ;;  %v3686_v21 = vcombine.low %v4887_v20, %v4889_v24  ;;  %1209 = vst [vmem:[#allocation2 + $0x34] sm:$0x1] %v5811_v35  ;;  %4036 = vmatpush3.bf16.msra.mxu1 %v4317_v41  ;;  %v1320_v16 = vld [vmem:[#allocation2 + $0x8] sm:$0xf] }
  0x64   : > { %1210 = vst [vmem:[#allocation2 + $0x38] sm:$0xf] %v5811_v35  ;;  %1211 = vst [vmem:[#allocation2 + $0x3c] sm:$0x1] %v5811_v35  ;;  %4037 = vmatprep.subr.bf16.mxu1 %v4320_v46  ;;  %v5031_v13 = vld [vmem:[#allocation2] sm:$0xf] }
  0x65   : > { %1145 = vmatprep.mubr.bf16.mxu0 %v3687_v39  ;;  %1212 = vst [vmem:[#allocation2 + $0x40] sm:$0xf] %v5811_v35  ;;  %1213 = vst [vmem:[#allocation2 + $0x44] sm:$0x1] %v5811_v35  ;;  %4076 = vmatpush3.bf16.msra.mxu0 %v4323_v43  ;;  %v1388_v39 = vshrl.u32 %v5031_v13, 16 }
  0x66   : > { %1146 = vmatmul.mubr.bf16.gmra.mxu0 %v3686_v21  ;;  %1214 = vst [vmem:[#allocation2 + $0x48] sm:$0xf] %v5811_v35  ;;  %1215 = vst [vmem:[#allocation2 + $0x4c] sm:$0x1] %v5811_v35  ;;  %4077 = vmatprep.subr.bf16.mxu0 %v4326_v53  ;;  %v1391_v21 = vshll.u32 %v5031_v13, 16 }
  0x67   : > { %4038 = vmatpush3.bf16.msra.mxu1 %v4321_v47  ;;  %v1326_v27 = vld [vmem:[#allocation2 + $0xc] sm:$0x1]  ;;  %v1390_v23 = vrot.slane %v1388_v39, 4  ;;  %v1329_v48 = vld [vmem:[#allocation2 + $0x10] sm:$0xf] }
  0x68   : > { %4039 = vmatprep.subr.bf16.mxu1 %v4324_v50  ;;  %v1393_v41 = vrot.slane %v1391_v21, 5  ;;  %v1332_v43 = vld [vmem:[#allocation2 + $0x14] sm:$0x1] }
  0x69   : > { %4078 = vmatpush3.bf16.msra.mxu0 %v4327_v54 }
  0x6a   : > { %4079 = vmatprep.subr.bf16.mxu0 %v4330_v52  ;;  %v1379_v52 = vld [vmem:[#allocation2 + $0x4] sm:$0x1] }
  0x6b   : > { %4040 = vmatpush3.bf16.msra.mxu1 %v4325_v51 }
  0x6c   : > { %4041 = vmatprep.subr.bf16.mxu1 %v4328_v56 }
  0x6d   : > { %4080 = vmatpush3.bf16.msra.mxu0 %v4331_v58  ;;  %v2459_v36 = vld [vmem:[#allocation2 + $0x48] sm:$0xf]  ;;  %v1571_v58 = vld [vmem:[#allocation2] sm:$0xe] }
  0x6e   : > { %4081 = vmatprep.subr.bf16.mxu0 %v4335_v12  ;;  %v2567_v53 = vshrl.u32 %v2459_v36, 16 }
  0x6f   : > { %4042 = vmatpush3.bf16.msra.mxu1 %v4329_v57 }
  0x70   : > { %4107 = vmatprep.subr.bf16.mxu1 %v4333_v59  ;;  %v2570_v59 = vshll.u32 %v2459_v36, 16 }
  0x71   : > { %4082 = vmatpush3.bf16.msra.mxu0 %v4336_v19  ;;  %v1397_v19 = vshll.u32 %v1379_v52, 16 }
  0x72   : > { %4147 = vmatprep.subr.bf16.mxu0 %v4340_v60 }
  0xfc   : > { %v4003_v61 = vpop.f32.mrf.mxu0 }
  0xfe   : > { %v4004_v62 = vpop.f32.mrf.mxu0 }
  0xff   : > { %v4005_v2 = vadd.f32 %v4004_v62, %v4003_v61 }
 0x100   : > { %v4006_v14 = vpop.f32.mrf.mxu0 }
 0x101   : > { %v1161_v3 = vmul.f32 %v4005_v2, %v5020_v63  ;;  %v1394_v2 = vor.u32 %v1393_v41, %v1390_v23 }
 0x102   : > { %v4007_v11 = vpop.f32.mrf.mxu0 }
 0x103   : > { %v1176_v49 = vadd.f32 %v5025_v55, %v1161_v3  ;;  %v4008_v7 = vadd.f32 %v4007_v11, %v4006_v14  ;;  %v3722_v3 = vrot.slane %v1571_v58, 9  ;;  %v1600_v11 = vrot.slane %v1379_v52, 5  ;;  %v4337_v58 = vld [vmem:[%s5798_s4 + $0x170] sm:$0xff]  }
 0x104   : > { %v5061_v21 = vrot.slane %v1394_v2, 4 }
 0x105   : > { %v1184_v4 = vmax.f32 %v1176_v49, 0.0  ;;  %v1162_v9 = vmul.f32 %v4008_v7, %v5020_v63  ;;  %v2467_v49 = vld [vmem:[#allocation2 + $0x4c] sm:$0x1] }
 0x107   : > { %v3979_v6 = vpack.c.bf16 %v1184_v4, %v1184_v4  ;;  %v1177_v10 = vadd.f32 %v5025_v55, %v1162_v9  ;;  %v2569_v9 = vrot.slane %v2567_v53, 4  ;;  %v4391_v4 = vld [vmem:[%s5802_s8 + $0x64] ss:$8 sps:$4 sm:$0xff]  }
 0x108   : > { %v4009_v8 = vpop.f32.mrf.mxu0 }
 0x109   : > { %v1237_v25 = vshrl.u32 %v3979_v6, 16  ;;  %v1185_v15 = vmax.f32 %v1177_v10, 0.0  ;;  %v1240_v18 = vshll.u32 %v3979_v6, 16  ;;  %v2572_v6 = vrot.slane %v2570_v59, 5 }
 0x10a   : > { %v4010_v32 = vpop.f32.mrf.mxu0  ;;  %v2576_v10 = vshll.u32 %v2467_v49, 16 }
 0x10b   : > { %v1239_v26 = vrot.slane %v1237_v25, 7  ;;  %v3980_v29 = vpack.c.bf16 %v1185_v15, %v1185_v15  ;;  %v4011_v38 = vadd.f32 %v4010_v32, %v4009_v8  ;;  %v5059_v15 = vrot.slane %v1397_v19, 5  ;;  %v1338_v32 = vld [vmem:[#allocation2 + $0x1c] sm:$0x1] }
 0x10c   : > { %v4012_v40 = vpop.f32.mrf.mxu0 }
 0x10d   : > { %v1242_v33 = vor.u32 %v1240_v18, %v1239_v26  ;;  %v1243_v34 = vrot.slane %v1239_v26, 4  ;;  %v1245_v31 = vshrl.u32 %v3980_v29, 16  ;;  %v1248_v47 = vshll.u32 %v3980_v29, 16 }
 0x10e   : > { %v1163_v50 = vmul.f32 %v4011_v38, %v5020_v63  ;;  %v4013_v51 = vpop.f32.mrf.mxu0  ;;  %v1601_v29 = vsel %vm5055_vm11, %v3722_v3, %v1600_v11  ;;  %v2573_v38 = vor.u32 %v2572_v6, %v2569_v9  ;;  %v1341_v3 = vld [vmem:[#allocation2 + $0x20] sm:$0xf]  ;;  %v1344_v11 = vld [vmem:[#allocation2 + $0x24] sm:$0x1] }
 0x10f   : > { %v1321_v42 = vsel %vm5035_vm7, %v1242_v33, %v1320_v16  ;;  %v1327_v45 = vsel %vm5039_vm8, %v1243_v34, %v1326_v27  ;;  %v1247_v46 = vrot.slane %v1245_v31, 7  ;;  %v4014_v57 = vadd.f32 %v4013_v51, %v4012_v40  ;;  %v1335_v27 = vld [vmem:[#allocation2 + $0x18] sm:$0xf] }
 0x110   : > { %1322 = vst [vmem:[#allocation2 + $0x8] sm:$0xf] %v1321_v42  ;;  %1328 = vst [vmem:[#allocation2 + $0xc] sm:$0x1] %v1327_v45  ;;  %v1178_v12 = vadd.f32 %v5025_v55, %v1163_v50  ;;  %v5067_v40 = vrot.slane %v2576_v10, 5  ;;  %v4334_v42 = vld [vmem:[%s5798_s4 + $0x138] sm:$0xff]   ;;  %v1400_v51 = vsel %vm4688_vm2, %v5061_v21, %v5059_v15 }
 0x111   : > { %v1250_v54 = vor.u32 %v1248_v47, %v1247_v46  ;;  %v1251_v56 = vrot.slane %v1247_v46, 4  ;;  %v1164_v62 = vmul.f32 %v4014_v57, %v5020_v63  ;;  %v4338_v15 = vld [vmem:[%s5798_s4 + $0x130] sm:$0xff]  }
 0x112   : > { %v1186_v14 = vmax.f32 %v1178_v12, 0.0 }
 0x113   : > { %v1330_v60 = vsel %vm5035_vm7, %v1250_v54, %v1329_v48  ;;  %v1333_v61 = vsel %vm5039_vm8, %v1251_v56, %v1332_v43  ;;  %v1179_v7 = vadd.f32 %v5025_v55, %v1164_v62 }
 0x114   : > { %1331 = vst [vmem:[#allocation2 + $0x10] sm:$0xf] %v1330_v60  ;;  %1334 = vst [vmem:[#allocation2 + $0x14] sm:$0x1] %v1333_v61  ;;  %v3981_v25 = vpack.c.bf16 %v1186_v14, %v1186_v14 }
 0x115   : > { %v1187_v8 = vmax.f32 %v1179_v7, 0.0  ;;  %v5090_v7 = vrot.slane %v2573_v38, 4 }
 0x116   : > { %v1253_v26 = vshrl.u32 %v3981_v25, 16  ;;  %v4015_v34 = vpop.f32.mrf.mxu0  ;;  %v1256_v41 = vshll.u32 %v3981_v25, 16 }
 0x117   : > { %v1380_v39 = vld [vmem:[#allocation2 + $0xc] sm:$0x1]  ;;  %v1572_v18 = vld [vmem:[#allocation2 + $0x8] sm:$0xe]  ;;  %v3982_v33 = vpack.c.bf16 %v1187_v8, %v1187_v8 }
 0x118   : > { %v1604_v16 = vrot.slane %v1380_v39, 5  ;;  %v3723_v31 = vrot.slane %v1572_v18, 9  ;;  %v5065_v36 = vld [vmem:[#allocation2 + $0x8] sm:$0xf]  ;;  %v1255_v23 = vrot.slane %v1253_v26, 7  ;;  %v4016_v48 = vpop.f32.mrf.mxu0  ;;  %v1411_v53 = vshll.u32 %v1380_v39, 16 }
 0x119   : > { %v1402_v45 = vshrl.u32 %v5065_v36, 16  ;;  %v1405_v46 = vshll.u32 %v5065_v36, 16  ;;  %v1261_v47 = vshrl.u32 %v3982_v33, 16  ;;  %v4017_v57 = vadd.f32 %v4016_v48, %v4015_v34  ;;  %v5107_v38 = vld [vmem:[#allocation2 + $0xc] sm:$0x1] }
 0x11a   : > { %v1605_v50 = vsel %vm5055_vm11, %v3723_v31, %v1604_v16  ;;  %v1258_v54 = vor.u32 %v1256_v41, %v1255_v23  ;;  %v1259_v56 = vrot.slane %v1255_v23, 4  ;;  %v1264_v12 = vshll.u32 %v3982_v33, 16  ;;  %v4018_v19 = vpop.f32.mrf.mxu0  ;;  %v5109_v23 = vld [vmem:[#allocation2 + $0x8] sm:$0xe] }
 0x11b   : > { %v4332_v43 = vld [vmem:[#allocation2 + $0x8] ss:$8 sps:$4 sm:$0xff]   ;;  %v3730_v52 = vcombine.low %v1601_v29, %v1605_v50  ;;  %v1263_v59 = vrot.slane %v1261_v47, 7  ;;  %v1404_v60 = vrot.slane %v1402_v45, 4  ;;  %v1407_v61 = vrot.slane %v1405_v46, 5 }
 0x11c   : > { %1839 = vmatprep.mubr.bf16.mxu1 %v4332_v43  ;;  %v5083_v62 = vld [vmem:[#allocation2 + $0x10] sm:$0xf]  ;;  %v1336_v2 = vsel %vm5035_vm7, %v1258_v54, %v1335_v27  ;;  %v1339_v14 = vsel %vm5039_vm8, %v1259_v56, %v1338_v32  ;;  %v1165_v49 = vmul.f32 %v4017_v57, %v5020_v63  ;;  %v4019_v10 = vpop.f32.mrf.mxu0  ;;  %v5095_v8 = vld [vmem:[#allocation2 + $0x14] sm:$0x1]  ;;  %v1413_v18 = vrot.slane %v1411_v53, 5  ;;  %v4343_v29 = vld [vmem:[%s5798_s4 + $0x168] sm:$0xff]  }
 0x11d   : > { %1840 = vmatmul.mubr.bf16.vlgmr.msra.gmra.mxu1 %v3730_v52  ;;  %1337 = vst [vmem:[#allocation2 + $0x18] sm:$0xf] %v1336_v2  ;;  %1340 = vst [vmem:[#allocation2 + $0x1c] sm:$0x1] %v1339_v14  ;;  %v1266_v9 = vor.u32 %v1264_v12, %v1263_v59  ;;  %v1267_v6 = vrot.slane %v1263_v59, 4  ;;  %v1408_v25 = vor.u32 %v1407_v61, %v1404_v60  ;;  %v1416_v39 = vshrl.u32 %v5083_v62, 16 }
 0x11e   : > { %4108 = vmatpush3.bf16.msra.mxu1 %v4334_v42  ;;  %v1180_v21 = vadd.f32 %v5025_v55, %v1165_v49  ;;  %v4020_v26 = vadd.f32 %v4019_v10, %v4018_v19  ;;  %v1573_v16 = vld [vmem:[#allocation2 + $0x10] sm:$0xe]  ;;  %v1419_v27 = vshll.u32 %v5083_v62, 16  ;;  %v1425_v46 = vshll.u32 %v5095_v8, 16  ;;  %v5113_v47 = vld [vmem:[#allocation2 + $0x14] sm:$0x1] }
 0x11f   : > { %4109 = vmatprep.subr.bf16.mxu1 %v4337_v58  ;;  %v1342_v32 = vsel %vm5035_vm7, %v1266_v9, %v1341_v3  ;;  %v1345_v33 = vsel %vm5039_vm8, %v1267_v6, %v1344_v11  ;;  %v1409_v34 = vrot.slane %v1408_v25, 4  ;;  %v1418_v31 = vrot.slane %v1416_v39, 4  ;;  %v4344_v54 = vld [vmem:[%s5798_s4 + $0x128] sm:$0xff]   ;;  %v4341_v58 = vld [vmem:[%s5798_s4 + $0x1b8] sm:$0xff]   ;;  %v4345_v59 = vld [vmem:[%s5798_s4 + $0x1f0] sm:$0xff]  }
 0x120   : > { %1343 = vst [vmem:[#allocation2 + $0x20] sm:$0xf] %v1342_v32  ;;  %1346 = vst [vmem:[#allocation2 + $0x24] sm:$0x1] %v1345_v33  ;;  %v1188_v41 = vmax.f32 %v1180_v21, 0.0  ;;  %v1166_v42 = vmul.f32 %v4020_v26, %v5020_v63  ;;  %v1421_v45 = vrot.slane %v1419_v27, 5  ;;  %v3714_v43 = vcombine.low %v5031_v13, %v5065_v36 }
 0x121   : > { %v1414_v48 = vsel %vm4688_vm2, %v1409_v34, %v1413_v18  ;;  %v3724_v50 = vrot.slane %v1573_v16, 9  ;;  %v1608_v53 = vrot.slane %v5095_v8, 5  ;;  %v4347_v13 = vld [vmem:[%s5798_s4 + $0x160] sm:$0xff]   ;;  %v5133_v12 = vrot.slane %v1425_v46, 5  ;;  %v1347_v49 = vld [vmem:[#allocation2 + $0x28] sm:$0xf] }
 0x122   : > { %4110 = vmatpush3.bf16.msra.mxu1 %v4338_v15  ;;  %v3983_v56 = vpack.c.bf16 %v1188_v41, %v1188_v41  ;;  %v1181_v57 = vadd.f32 %v5025_v55, %v1166_v42  ;;  %v3718_v52 = vcombine.low %v1400_v51, %v1414_v48  ;;  %v1422_v36 = vor.u32 %v1421_v45, %v1418_v31  ;;  %v4348_v51 = vld [vmem:[%s5798_s4 + $0x120] sm:$0xff]   ;;  %v1350_v9 = vld [vmem:[#allocation2 + $0x2c] sm:$0x1]  ;;  %v4346_v18 = vld [vmem:[%s5798_s4 + $0x1b0] sm:$0xff]  }
 0x123   : > { %4111 = vmatprep.subr.bf16.mxu1 %v4343_v29  ;;  %v2059_v19 = vshll.u32 %v5107_v38, 16  ;;  %v2073_v60 = vshll.u32 %v5113_v47, 16  ;;  %v3802_v61 = vrot.slane %v5109_v23, 9  ;;  %v4350_v29 = vld [vmem:[%s5798_s4 + $0x1e8] sm:$0xff]   ;;  %v4353_v16 = vld [vmem:[%s5798_s4 + $0x158] sm:$0xff]   ;;  %v1609_v32 = vsel %vm5055_vm11, %v3724_v50, %v1608_v53 }
 0x124   : > { %v1269_v2 = vshrl.u32 %v3983_v56, 16  ;;  %v1272_v14 = vshll.u32 %v3983_v56, 16  ;;  %v1189_v3 = vmax.f32 %v1181_v57, 0.0  ;;  %2000 = vmatprep.mubr.bf16.mxu0 %v3718_v52  ;;  %v5141_v11 = vrot.slane %v1422_v36, 4  ;;  %v1382_v6 = vld [vmem:[#allocation2 + $0x1c] sm:$0x1] }
 0x125   : > { %2001 = vmatmul.mubr.bf16.vlgmr.msra.gmra.mxu0 %v3714_v43  ;;  %v1574_v10 = vld [vmem:[#allocation2 + $0x18] sm:$0xe]  ;;  %v1612_v26 = vrot.slane %v1382_v6, 5  ;;  %v1353_v48 = vld [vmem:[#allocation2 + $0x30] sm:$0xf] }
 0x126   : > { %4112 = vmatpush3.bf16.msra.mxu1 %v4344_v54  ;;  %v5143_v25 = vld [vmem:[#allocation2 + $0x18] sm:$0xf]  ;;  %v1271_v15 = vrot.slane %v1269_v2, 7  ;;  %v3984_v8 = vpack.c.bf16 %v1189_v3, %v1189_v3  ;;  %v4021_v39 = vpop.f32.mrf.mxu0  ;;  %4148 = vmatpush3.bf16.msra.mxu0 %v4341_v58  ;;  %v3725_v21 = vrot.slane %v1574_v10, 9  ;;  %v1356_v43 = vld [vmem:[#allocation2 + $0x34] sm:$0x1] }
 0x127   : > { %4113 = vmatprep.subr.bf16.mxu1 %v4347_v13  ;;  %v4342_v27 = vld [vmem:[#allocation2 + $0x18] ss:$8 sps:$4 sm:$0xff]   ;;  %4149 = vmatprep.subr.bf16.mxu0 %v4345_v59  ;;  %v1430_v33 = vshrl.u32 %v5143_v25, 16  ;;  %v1433_v34 = vshll.u32 %v5143_v25, 16  ;;  %v4357_v3 = vld [vmem:[%s5798_s4 + $0x150] sm:$0xff]   ;;  %v1439_v10 = vshll.u32 %v1382_v6, 16 }
 0x128   : > { %v1274_v31 = vor.u32 %v1272_v14, %v1271_v15  ;;  %v1275_v41 = vrot.slane %v1271_v15, 4  ;;  %v1277_v42 = vshrl.u32 %v3984_v8, 16  ;;  %v1280_v45 = vshll.u32 %v3984_v8, 16  ;;  %v4022_v46 = vpop.f32.mrf.mxu0  ;;  %1847 = vmatprep.mubr.bf16.mxu1 %v4342_v27  ;;  %v4354_v50 = vld [vmem:[%s5798_s4 + $0x118] sm:$0xff]   ;;  %v5163_v53 = vld [vmem:[#allocation2 + $0x20] sm:$0xf] }
 0x129   : > { %v4023_v54 = vadd.f32 %v4022_v46, %v4021_v39  ;;  %v1613_v56 = vsel %vm5055_vm11, %v3725_v21, %v1612_v26  ;;  %v1432_v57 = vrot.slane %v1430_v33, 4  ;;  %v1435_v52 = vrot.slane %v1433_v34, 5  ;;  %v4355_v14 = vld [vmem:[%s5798_s4 + $0x1e0] sm:$0xff]   ;;  %v4358_v34 = vld [vmem:[%s5798_s4 + $0x110] sm:$0xff]  }
 0x12a   : > { %4114 = vmatpush3.bf16.msra.mxu1 %v4348_v51  ;;  %v1348_v58 = vsel %vm5035_vm7, %v1274_v31, %v1347_v49  ;;  %v1351_v13 = vsel %vm5039_vm8, %v1275_v41, %v1350_v9  ;;  %v1279_v36 = vrot.slane %v1277_v42, 7  ;;  %v4024_v59 = vpop.f32.mrf.mxu0  ;;  %v3731_v2 = vcombine.low %v1609_v32, %v1613_v56  ;;  %4150 = vmatpush3.bf16.msra.mxu0 %v4346_v18  ;;  %v4351_v51 = vld [vmem:[%s5798_s4 + $0x1a8] sm:$0xff]   ;;  %v5179_v15 = vld [vmem:[#allocation2 + $0x24] sm:$0x1]  ;;  %v1575_v8 = vld [vmem:[#allocation2 + $0x20] sm:$0xe] }
 0x12b   : > { %4115 = vmatprep.subr.bf16.mxu1 %v4353_v16  ;;  %1349 = vst [vmem:[#allocation2 + $0x28] sm:$0xf] %v1348_v58  ;;  %1352 = vst [vmem:[#allocation2 + $0x2c] sm:$0x1] %v1351_v13  ;;  %v1167_v49 = vmul.f32 %v4023_v54, %v5020_v63  ;;  %v1436_v9 = vor.u32 %v1435_v52, %v1432_v57  ;;  %4151 = vmatprep.subr.bf16.mxu0 %v4350_v29  ;;  %v2187_v39 = vrot.slane %v5107_v38, 5  ;;  %v4356_v42 = vld [vmem:[%s5798_s4 + $0x1a0] sm:$0xff]  }
 0x12c   : > { %v1282_v21 = vor.u32 %v1280_v45, %v1279_v36  ;;  %v1283_v26 = vrot.slane %v1279_v36, 4  ;;  %v4025_v18 = vpop.f32.mrf.mxu0  ;;  %1848 = vmatmul.mubr.bf16.gmra.mxu1 %v3731_v2  ;;  %v1428_v16 = vsel %vm4688_vm2, %v5141_v11, %v5133_v12  ;;  %v1444_v27 = vshrl.u32 %v5163_v53, 16  ;;  %v4360_v54 = vld [vmem:[%s5798_s4 + $0x1d8] sm:$0xff]   ;;  %v4365_v38 = vld [vmem:[%s5798_s4 + $0x1d0] sm:$0xff]  }
 0x12d   : > { %v1182_v32 = vadd.f32 %v5025_v55, %v1167_v49  ;;  %v4026_v6 = vadd.f32 %v4025_v18, %v4024_v59  ;;  %v1437_v29 = vrot.slane %v1436_v9, 4  ;;  %v1441_v33 = vrot.slane %v1439_v10, 5  ;;  %v4361_v52 = vld [vmem:[%s5798_s4 + $0x198] sm:$0xff]  }
 0x12e   : > { %4116 = vmatpush3.bf16.msra.mxu1 %v4354_v50  ;;  %v1354_v31 = vsel %vm5035_vm7, %v1282_v21, %v1353_v48  ;;  %v1357_v41 = vsel %vm5039_vm8, %v1283_v26, %v1356_v43  ;;  %4152 = vmatpush3.bf16.msra.mxu0 %v4351_v51  ;;  %v3726_v12 = vrot.slane %v1575_v8, 9  ;;  %v1616_v11 = vrot.slane %v5179_v15, 5  ;;  %v4364_v50 = vld [vmem:[%s5798_s4 + $0x108] sm:$0xff]   ;;  %v2162_v51 = vld [vmem:[#allocation2 + $0x10] sm:$0xe] }
 0x12f   : > { %4117 = vmatprep.subr.bf16.mxu1 %v4357_v3  ;;  %1355 = vst [vmem:[#allocation2 + $0x30] sm:$0xf] %v1354_v31  ;;  %1358 = vst [vmem:[#allocation2 + $0x34] sm:$0x1] %v1357_v41  ;;  %v1190_v45 = vmax.f32 %v1182_v32, 0.0  ;;  %v1168_v46 = vmul.f32 %v4026_v6, %v5020_v63  ;;  %v1442_v48 = vsel %vm4688_vm2, %v1437_v29, %v1441_v33  ;;  %4153 = vmatprep.subr.bf16.mxu0 %v4355_v14  ;;  %v4363_v63 = vld [vmem:[%s5798_s4 + $0x148] sm:$0xff]  }
 0x130   : > { %v1447_v43 = vshll.u32 %v5163_v53, 16  ;;  %v3719_v56 = vcombine.low %v1428_v16, %v1442_v48  ;;  %v3715_v57 = vcombine.low %v5083_v62, %v5143_v25  ;;  %v5219_v58 = vrot.slane %v2059_v19, 5  ;;  %v4367_v62 = vld [vmem:[%s5798_s4 + $0x140] sm:$0xff]   ;;  %v5236_v19 = vld [vmem:[#allocation2 + $0x10] sm:$0xf]  ;;  %v4370_v48 = vld [vmem:[%s5798_s4 + $0x1c8] sm:$0xff]  }
 0x131   : > { %v5223_v13 = vrot.slane %v2073_v60, 5  ;;  %v3985_v25 = vpack.c.bf16 %v1190_v45, %v1190_v45  ;;  %v1183_v36 = vadd.f32 %v5025_v55, %v1168_v46  ;;  %v5229_v59 = vrot.slane %v1444_v27, 4  ;;  %v1359_v26 = vld [vmem:[#allocation2 + $0x38] sm:$0xf]  ;;  %v1362_v18 = vld [vmem:[#allocation2 + $0x3c] sm:$0x1] }
 0x132   : > { %v5231_v2 = vrot.slane %v1447_v43, 5  ;;  %4118 = vmatpush3.bf16.msra.mxu1 %v4358_v34  ;;  %2008 = vmatprep.mubr.bf16.mxu0 %v3719_v56  ;;  %v5238_v60 = vld [vmem:[#allocation2 + $0x2c] sm:$0x1]  ;;  %v1576_v14 = vld [vmem:[#allocation2 + $0x28] sm:$0xe]  ;;  %v1617_v3 = vsel %vm5055_vm11, %v3726_v12, %v1616_v11  ;;  %v5246_v55 = vsel %vm5055_vm11, %v3802_v61, %v2187_v39  ;;  %v1453_v21 = vshll.u32 %v5179_v15, 16 }
 0x133   : > { %4154 = vmatpush3.bf16.msra.mxu0 %v4356_v42  ;;  %v1285_v49 = vshrl.u32 %v3985_v25, 16  ;;  %v1191_v9 = vmax.f32 %v1183_v36, 0.0  ;;  %v3727_v10 = vrot.slane %v1576_v14, 9  ;;  %v5248_v8 = vld [vmem:[#allocation2 + $0x28] sm:$0xf]  ;;  %v1620_v16 = vrot.slane %v5238_v60, 5  ;;  %4119 = vmatprep.subr.bf16.mxu1 %v4363_v63 }
 0x134   : > { %2009 = vmatmul.mubr.bf16.gmra.mxu0 %v3715_v57  ;;  %4155 = vmatprep.subr.bf16.mxu0 %v4360_v54  ;;  %v1458_v27 = vshrl.u32 %v5248_v8, 16  ;;  %v3803_v23 = vrot.slane %v2162_v51, 9  ;;  %v2191_v61 = vrot.slane %v5113_v47, 5  ;;  %v1288_v32 = vshll.u32 %v3985_v25, 16  ;;  %v4366_v15 = vld [vmem:[%s5798_s4 + $0x190] sm:$0xff]   ;;  %v4368_v33 = vld [vmem:[%s5798_s4 + $0x100] sm:$0xff]  }
 0x135   : > { %v1287_v39 = vrot.slane %v1285_v49, 7  ;;  %v3986_v6 = vpack.c.bf16 %v1191_v9, %v1191_v9  ;;  %v1461_v29 = vshll.u32 %v5248_v8, 16  ;;  %v1621_v31 = vsel %vm5055_vm11, %v3727_v10, %v1620_v16  ;;  %v5272_v43 = vld [vmem:[%s5799_s5 + $0x38] sm:$0xff]   ;;  %v4371_v9 = vld [vmem:[%s5798_s4 + $0x188] sm:$0xff]  }
 0x136   : > { %4120 = vmatpush3.bf16.msra.mxu1 %v4364_v50  ;;  %v4352_v34 = vld [vmem:[#allocation2 + $0x28] ss:$8 sps:$4 sm:$0xff]   ;;  %v1450_v47 = vor.u32 %v5231_v2, %v5229_v59  ;;  %v1460_v41 = vrot.slane %v1458_v27, 4  ;;  %v2469_v12 = vshrl.u32 %v5236_v19, 16  ;;  %v1455_v46 = vrot.slane %v1453_v21, 5 }
 0x137   : > { %4156 = vmatpush3.bf16.msra.mxu0 %v4361_v52  ;;  %4121 = vmatprep.subr.bf16.mxu1 %v4367_v62  ;;  %v1290_v11 = vor.u32 %v1288_v32, %v1287_v39  ;;  %v1291_v42 = vrot.slane %v1287_v39, 4  ;;  %v1293_v45 = vshrl.u32 %v3986_v6, 16  ;;  %v3732_v54 = vcombine.low %v1617_v3, %v1621_v31  ;;  %v1385_v52 = vld [vmem:[#allocation2 + $0x34] sm:$0x1]  ;;  %v5279_v50 = vld [vmem:[#allocation2 + $0x30] sm:$0xf] }
 0x138   : > { %4157 = vmatprep.subr.bf16.mxu0 %v4365_v38  ;;  %1855 = vmatprep.mubr.bf16.mxu1 %v4352_v34  ;;  %v1463_v56 = vrot.slane %v1461_v29, 5  ;;  %v1467_v57 = vshll.u32 %v5238_v60, 16  ;;  %v5277_v63 = vsel %vm5055_vm11, %v3803_v23, %v2191_v61  ;;  %v1296_v59 = vshll.u32 %v3986_v6, 16  ;;  %v1365_v2 = vld [vmem:[#allocation2 + $0x40] sm:$0xf] }
 0x139   : > { %v1360_v62 = vsel %vm5035_vm7, %v1290_v11, %v1359_v26  ;;  %v1363_v25 = vsel %vm5039_vm8, %v1291_v42, %v1362_v18  ;;  %v1295_v36 = vrot.slane %v1293_v45, 7  ;;  %v1577_v51 = vld [vmem:[#allocation2 + $0x30] sm:$0xe]  ;;  %v1368_v38 = vld [vmem:[#allocation2 + $0x44] sm:$0x1]  ;;  %1856 = vmatmul.mubr.bf16.gmra.mxu1 %v3732_v54  ;;  %v1451_v60 = vrot.slane %v1450_v47, 4 }
 0x13a   : > { %4122 = vmatpush3.bf16.msra.mxu1 %v4368_v33  ;;  %1361 = vst [vmem:[#allocation2 + $0x38] sm:$0xf] %v1360_v62  ;;  %1364 = vst [vmem:[#allocation2 + $0x3c] sm:$0x1] %v1363_v25  ;;  %v1464_v14 = vor.u32 %v1463_v56, %v1460_v41  ;;  %v3716_v3 = vcombine.low %v5163_v53, %v5248_v8  ;;  %v1472_v49 = vshrl.u32 %v5279_v50, 16  ;;  %v1475_v26 = vshll.u32 %v5279_v50, 16 }
 0x13b   : > { %4158 = vmatpush3.bf16.msra.mxu0 %v4366_v15  ;;  %v1298_v10 = vor.u32 %v1296_v59, %v1295_v36  ;;  %v1299_v21 = vrot.slane %v1295_v36, 4  ;;  %v1481_v18 = vshll.u32 %v1385_v52, 16  ;;  %v5292_v16 = vld [vmem:[#allocation2 + $0x18] sm:$0xf]  ;;  %4221 = vmatprep.subr.bf16.mxu1 %v5272_v43  ;;  %v4373_v53 = vld [vmem:[%s5798_s4 + $0x1c0] sm:$0xff]   ;;  %v1469_v27 = vrot.slane %v1467_v57, 5 }
 0x13c   : > { %4159 = vmatprep.subr.bf16.mxu0 %v4370_v48  ;;  %v1465_v8 = vrot.slane %v1464_v14, 4  ;;  %v3728_v23 = vrot.slane %v1577_v51, 9  ;;  %v1474_v61 = vrot.slane %v1472_v49, 4  ;;  %v1624_v6 = vrot.slane %v1385_v52, 5  ;;  %v5302_v15 = vld [vmem:[#allocation2 + $0x14] sm:$0x1] }
 0x13d   : > { %v1366_v39 = vsel %vm5035_vm7, %v1298_v10, %v1365_v2  ;;  %v1369_v32 = vsel %vm5039_vm8, %v1299_v21, %v1368_v38  ;;  %v1477_v29 = vrot.slane %v1475_v26, 5  ;;  %v1456_v33 = vsel %vm4688_vm2, %v1451_v60, %v1455_v46  ;;  %v2033_v42 = vld [vmem:[#allocation2 + $0x8] sm:$0xf]  ;;  %v4374_v45 = vld [vmem:[%s5798_s4 + $0x180] sm:$0xff]   ;;  %v5315_v46 = vld [vmem:[#allocation2 + $0x1c] sm:$0x1] }
 0x13e   : > { %1367 = vst [vmem:[#allocation2 + $0x40] sm:$0xf] %v1366_v39  ;;  %1370 = vst [vmem:[#allocation2 + $0x44] sm:$0x1] %v1369_v32  ;;  %v1470_v34 = vsel %vm4688_vm2, %v1465_v8, %v1469_v27  ;;  %v2472_v31 = vshll.u32 %v5236_v19, 16  ;;  %v2483_v28 = vshrl.u32 %v5292_v16, 16  ;;  %v3814_v25 = vcombine.low %v5246_v55, %v5277_v63 }
 0x13f   : > { %4160 = vmatpush3.bf16.msra.mxu0 %v4371_v9  ;;  %v3720_v47 = vcombine.low %v1456_v33, %v1470_v34  ;;  %v1478_v30 = vor.u32 %v1477_v29, %v1474_v61  ;;  %v5310_v41 = vrot.slane %v1481_v18, 5  ;;  %v2471_v11 = vrot.slane %v2469_v12, 4  ;;  %v2035_v18 = vld [vmem:[#allocation2 + $0x10] sm:$0xf]  ;;  %v5341_v33 = vld [vmem:[#allocation2 + $0x24] sm:$0x1] }
 0x140   : > { %4161 = vmatprep.subr.bf16.mxu0 %v4373_v53  ;;  %v2474_v48 = vrot.slane %v2472_v31, 5  ;;  %v2478_v54 = vshll.u32 %v5302_v15, 16  ;;  %v2485_v56 = vrot.slane %v2483_v28, 4  ;;  %v2486_v57 = vshll.u32 %v5292_v16, 16  ;;  %v2163_v34 = vld [vmem:[#allocation2 + $0x18] sm:$0xe] }
 0x141   : > { %2016 = vmatprep.mubr.bf16.mxu0 %v3720_v47  ;;  %v1386_v52 = vld [vmem:[#allocation2 + $0x3c] sm:$0x1]  ;;  %v1578_v62 = vld [vmem:[#allocation2 + $0x38] sm:$0xe]  ;;  %v1625_v12 = vsel %vm5055_vm11, %v3728_v23, %v1624_v6  ;;  %v3866_v36 = vcombine.low %v5236_v19, %v5292_v16  ;;  %v2579_v59 = vsel %vm4688_vm2, %v5090_v7, %v5067_v40  ;;  %v1479_v60 = vrot.slane %v1478_v30, 4 }
 0x142   : > { %2017 = vmatmul.mubr.bf16.gmra.mxu0 %v3716_v3  ;;  %v3729_v2 = vrot.slane %v1578_v62, 9  ;;  %v1628_v51 = vrot.slane %v1386_v52, 5  ;;  %v5329_v38 = vld [vmem:[#allocation2 + $0x38] sm:$0xf]  ;;  %v2050_v14 = vshrl.u32 %v2033_v42, 16  ;;  %v2475_v55 = vor.u32 %v2474_v48, %v2471_v11 }
 0x143   : > { %v1486_v49 = vshrl.u32 %v5329_v38, 16  ;;  %v1489_v9 = vshll.u32 %v5329_v38, 16  ;;  %v2492_v63 = vshll.u32 %v5315_v46, 16  ;;  %4162 = vmatpush3.bf16.msra.mxu0 %v4374_v45  ;;  %v1495_v21 = vshll.u32 %v1386_v52, 16  ;;  %v2164_v11 = vld [vmem:[#allocation2 + $0x20] sm:$0xe] }
 0x144   : > { %v1629_v10 = vsel %vm5055_vm11, %v3729_v2, %v1628_v51  ;;  %v2480_v26 = vrot.slane %v2478_v54, 5  ;;  %v2488_v3 = vrot.slane %v2486_v57, 5  ;;  %v3717_v61 = vcombine.low %v5279_v50, %v5329_v38 }
 0x145   : > { %v4362_v53 = vld [vmem:[#allocation2 + $0x38] ss:$8 sps:$4 sm:$0xff]   ;;  %v3733_v8 = vcombine.low %v1625_v12, %v1629_v10  ;;  %v1488_v27 = vrot.slane %v1486_v49, 4  ;;  %v1491_v23 = vrot.slane %v1489_v9, 5  ;;  %v1484_v39 = vsel %vm4688_vm2, %v1479_v60, %v5310_v41  ;;  %v5345_v41 = vld [vmem:[#allocation2 + $0x1c] sm:$0x1] }
 0x146   : > { %v2476_v32 = vrot.slane %v2475_v55, 4  ;;  %v2489_v6 = vor.u32 %v2488_v3, %v2485_v56  ;;  %v2052_v29 = vrot.slane %v2050_v14, 4  ;;  %1863 = vmatprep.mubr.bf16.mxu1 %v4362_v53  ;;  %v2053_v28 = vshll.u32 %v2033_v42, 16  ;;  %v5347_v12 = vld [vmem:[#allocation2 + $0x20] sm:$0xf] }
 0x147   : > { %v1492_v31 = vor.u32 %v1491_v23, %v1488_v27  ;;  %v2064_v47 = vshrl.u32 %v2035_v18, 16  ;;  %v2067_v30 = vshll.u32 %v2035_v18, 16  ;;  %1864 = vmatmul.mubr.bf16.gmra.mxu1 %v3733_v8  ;;  %v1497_v45 = vrot.slane %v1495_v21, 5  ;;  %v5352_v60 = vld [vmem:[#allocation2 + $0x24] sm:$0x1] }
 0x148   : > { %v2481_v50 = vsel %vm4688_vm2, %v2476_v32, %v2480_v26  ;;  %v2490_v48 = vrot.slane %v2489_v6, 4  ;;  %v2494_v54 = vrot.slane %v2492_v63, 5  ;;  %2410 = vmatprep.mubr.bf16.mxu1 %v3814_v25  ;;  %v2055_v57 = vrot.slane %v2053_v28, 5  ;;  %v5357_v55 = vld [vmem:[#allocation2 + $0x28] sm:$0xf] }
 0x149   : > { %v1493_v56 = vrot.slane %v1492_v31, 4  ;;  %v2066_v52 = vrot.slane %v2064_v47, 4  ;;  %v2069_v62 = vrot.slane %v2067_v30, 5  ;;  %v3804_v2 = vrot.slane %v2163_v34, 9  ;;  %v5359_v21 = vld [vmem:[#allocation2 + $0x2c] sm:$0x1] }
 0x14a   : > { %v2495_v42 = vsel %vm4688_vm2, %v2490_v48, %v2494_v54  ;;  %v3805_v51 = vrot.slane %v2164_v11, 9  ;;  %v2199_v38 = vrot.slane %v5341_v33, 5  ;;  %v2056_v49 = vor.u32 %v2055_v57, %v2052_v29  ;;  %v2037_v23 = vld [vmem:[#allocation2 + $0x18] sm:$0xf]  ;;  %v4375_v30 = vld [vmem:[%s5799_s5 + $0x30] sm:$0xff]  }
 0x14b   : > { %v1498_v14 = vsel %vm4688_vm2, %v1493_v56, %v1497_v45  ;;  %v2070_v25 = vor.u32 %v2069_v62, %v2066_v52  ;;  %v2195_v9 = vrot.slane %v5345_v41, 5  ;;  %v3870_v10 = vcombine.low %v2481_v50, %v2495_v42  ;;  %v5368_v34 = vld [vmem:[#allocation2 + $0x38] sm:$0xf]  ;;  %v2039_v54 = vld [vmem:[#allocation2 + $0x20] sm:$0xf] }
 0x14c   : > { %v3721_v63 = vcombine.low %v1484_v39, %v1498_v14  ;;  %v2497_v26 = vshrl.u32 %v5347_v12, 16  ;;  %v2500_v3 = vshll.u32 %v5347_v12, 16  ;;  %v2057_v18 = vrot.slane %v2056_v49, 4  ;;  %v2165_v49 = vld [vmem:[#allocation2 + $0x28] sm:$0xe] }
 0x14d   : > { %v2071_v53 = vrot.slane %v2070_v25, 4  ;;  %v2200_v8 = vsel %vm5055_vm11, %v3805_v51, %v2199_v38  ;;  %v2506_v27 = vshll.u32 %v5352_v60, 16  ;;  %v2511_v39 = vshrl.u32 %v5357_v55, 16  ;;  %v4377_v38 = vld [vmem:[%s5799_s5 + $0x28] sm:$0xff]  }
 0x14e   : > { %2024 = vmatprep.mubr.bf16.mxu0 %v3721_v63  ;;  %v2499_v32 = vrot.slane %v2497_v26, 4  ;;  %v2502_v6 = vrot.slane %v2500_v3, 5  ;;  %v2514_v29 = vshll.u32 %v5357_v55, 16  ;;  %v2062_v31 = vsel %vm4688_vm2, %v2057_v18, %v5219_v58  ;;  %v5382_v58 = vld [vmem:[#allocation2 + $0x30] sm:$0xf] }
 0x14f   : > { %2025 = vmatmul.mubr.bf16.gmra.mxu0 %v3717_v61  ;;  %v2076_v28 = vsel %vm4688_vm2, %v2071_v53, %v5223_v13  ;;  %v2196_v47 = vsel %vm5055_vm11, %v3804_v2, %v2195_v9  ;;  %v2520_v11 = vshll.u32 %v5359_v21, 16  ;;  %v2513_v50 = vrot.slane %v2511_v39, 4  ;;  %v5384_v13 = vld [vmem:[#allocation2 + $0x2c] sm:$0x1]  ;;  %v2166_v26 = vld [vmem:[#allocation2 + $0x30] sm:$0xe] }
 0x150   : > { %2781 = vmatprep.mubr.bf16.mxu0 %v3870_v10  ;;  %v3810_v45 = vcombine.low %v2062_v31, %v2076_v28  ;;  %v2503_v61 = vor.u32 %v2502_v6, %v2499_v32  ;;  %v2516_v48 = vrot.slane %v2514_v29, 5  ;;  %v3815_v56 = vcombine.low %v2196_v47, %v2200_v8 }
 0x151   : > { %v2078_v57 = vshrl.u32 %v2037_v23, 16  ;;  %v3867_v52 = vcombine.low %v5347_v12, %v5357_v55  ;;  %v3868_v62 = vcombine.low %v5382_v58, %v5368_v34  ;;  %v2508_v2 = vrot.slane %v2506_v27, 5  ;;  %v5396_v27 = vld [vmem:[#allocation2 + $0x34] sm:$0x1] }
 0x152   : > { %2411 = vmatmul.mubr.bf16.vlgmr.msra.gmra.mxu1 %v3810_v45  ;;  %v2504_v42 = vrot.slane %v2503_v61, 4  ;;  %v2517_v51 = vor.u32 %v2516_v48, %v2513_v50  ;;  %v2081_v14 = vshll.u32 %v2037_v23, 16  ;;  %v2522_v25 = vrot.slane %v2520_v11, 5  ;;  %v4378_v11 = vld [vmem:[%s5799_s5 + $0x20] sm:$0xff]   ;;  %v5410_v45 = vld [vmem:[#allocation2 + $0x34] sm:$0x1] }
 0x153   : > { %4222 = vmatpush3.bf16.msra.mxu1 %v5272_v43  ;;  %2418 = vmatprep.mubr.bf16.mxu1 %v3815_v56  ;;  %v2080_v9 = vrot.slane %v2078_v57, 4  ;;  %v2092_v63 = vshrl.u32 %v2039_v54, 16  ;;  %v2095_v10 = vshll.u32 %v2039_v54, 16  ;;  %v2087_v53 = vshll.u32 %v5345_v41, 16  ;;  %v5413_v54 = vld [vmem:[#allocation2 + $0x3c] sm:$0x1] }
 0x154   : > { %4223 = vmatprep.subr.bf16.mxu1 %v4375_v30  ;;  %v2518_v3 = vrot.slane %v2517_v51, 4  ;;  %v2083_v18 = vrot.slane %v2081_v14, 5  ;;  %v2101_v8 = vshll.u32 %v5341_v33, 16  ;;  %v2509_v23 = vsel %vm4688_vm2, %v2504_v42, %v2508_v2  ;;  %v2041_v42 = vld [vmem:[#allocation2 + $0x28] sm:$0xf] }
 0x155   : > { %v2094_v32 = vrot.slane %v2092_v63, 4  ;;  %v2097_v43 = vrot.slane %v2095_v10, 5  ;;  %v3806_v6 = vrot.slane %v2165_v49, 9  ;;  %v2203_v31 = vrot.slane %v5384_v13, 5 }
 0x156   : > { %v2523_v39 = vsel %vm4688_vm2, %v2518_v3, %v2522_v25  ;;  %v2084_v29 = vor.u32 %v2083_v18, %v2080_v9  ;;  %v3807_v28 = vrot.slane %v2166_v26, 9  ;;  %v2207_v47 = vrot.slane %v5396_v27, 5  ;;  %v2043_v25 = vld [vmem:[#allocation2 + $0x30] sm:$0xf]  ;;  %v4380_v3 = vld [vmem:[%s5799_s5 + $0x18] sm:$0xff]  }
 0x157   : > { %4224 = vmatpush3.bf16.msra.mxu1 %v4375_v30  ;;  %2782 = vmatmul.mubr.bf16.vlgmr.msra.gmra.mxu0 %v3866_v36  ;;  %v3871_v33 = vcombine.low %v2509_v23, %v2523_v39  ;;  %v2098_v41 = vor.u32 %v2097_v43, %v2094_v32  ;;  %v2525_v61 = vshrl.u32 %v5382_v58, 16  ;;  %v2089_v48 = vrot.slane %v2087_v53, 5  ;;  %v5431_v32 = vld [vmem:[#allocation2 + $0x3c] sm:$0x1]  ;;  %v2167_v43 = vld [vmem:[#allocation2 + $0x38] sm:$0xe] }
 0x158   : > { %4225 = vmatprep.subr.bf16.mxu1 %v4377_v38  ;;  %v2085_v50 = vrot.slane %v2084_v29, 4  ;;  %v2103_v30 = vrot.slane %v2101_v8, 5  ;;  %v2528_v19 = vshll.u32 %v5382_v58, 16  ;;  %v2204_v36 = vsel %vm5055_vm11, %v3806_v6, %v2203_v31  ;;  %v5434_v31 = vld [vmem:[#allocation2 + $0x44] sm:$0x1] }
 0x159   : > { %2789 = vmatprep.mubr.bf16.mxu0 %v3871_v33  ;;  %v2099_v16 = vrot.slane %v2098_v41, 4  ;;  %v2527_v56 = vrot.slane %v2525_v61, 4  ;;  %v2539_v57 = vshrl.u32 %v5368_v34, 16  ;;  %v2208_v51 = vsel %vm5055_vm11, %v3807_v28, %v2207_v47  ;;  %v2168_v61 = vld [vmem:[#allocation2 + $0x40] sm:$0xe] }
 0x15a   : > { %v2090_v2 = vsel %vm4688_vm2, %v2085_v50, %v2089_v48  ;;  %v2530_v14 = vrot.slane %v2528_v19, 5  ;;  %v2534_v49 = vshll.u32 %v5410_v45, 16  ;;  %v2542_v10 = vshll.u32 %v5368_v34, 16 }
 0x15b   : > { %v2104_v9 = vsel %vm4688_vm2, %v2099_v16, %v2103_v30  ;;  %4226 = vmatpush3.bf16.msra.mxu1 %v4377_v38  ;;  %v2541_v63 = vrot.slane %v2539_v57, 4  ;;  %v2548_v26 = vshll.u32 %v5413_v54, 16  ;;  %v2106_v8 = vshrl.u32 %v2041_v42, 16  ;;  %v5437_v16 = vld [vmem:[#allocation2 + $0x40] sm:$0xf] }
 0x15c   : > { %v3811_v18 = vcombine.low %v2090_v2, %v2104_v9  ;;  %4227 = vmatprep.subr.bf16.mxu1 %v4378_v11  ;;  %v2531_v53 = vor.u32 %v2530_v14, %v2527_v56  ;;  %v2109_v23 = vshll.u32 %v2041_v42, 16  ;;  %v3816_v6 = vcombine.low %v2204_v36, %v2208_v51  ;;  %v5446_v14 = vld [vmem:[#allocation2 + $0x44] sm:$0x1] }
 0x15d   : > { %v2544_v39 = vrot.slane %v2542_v10, 5  ;;  %v2115_v38 = vshll.u32 %v5384_v13, 16  ;;  %v2120_v29 = vshrl.u32 %v2043_v25, 16  ;;  %v2536_v28 = vrot.slane %v2534_v49, 5 }
 0x15e   : > { %2419 = vmatmul.mubr.bf16.gmra.mxu1 %v3811_v18  ;;  %v2108_v33 = vrot.slane %v2106_v8, 4  ;;  %v2111_v41 = vrot.slane %v2109_v23, 5  ;;  %v2123_v47 = vshll.u32 %v2043_v25, 16  ;;  %v2532_v50 = vrot.slane %v2531_v53, 4 }
 0x15f   : > { %2426 = vmatprep.mubr.bf16.mxu1 %v3816_v6  ;;  %4228 = vmatpush3.bf16.msra.mxu1 %v4378_v11  ;;  %v2545_v48 = vor.u32 %v2544_v39, %v2541_v63  ;;  %v2122_v30 = vrot.slane %v2120_v29, 4  ;;  %v2129_v19 = vshll.u32 %v5396_v27, 16  ;;  %v2550_v13 = vrot.slane %v2548_v26, 5  ;;  %v4381_v11 = vld [vmem:[%s5799_s5 + $0x10] sm:$0xff]   ;;  %v2045_v26 = vld [vmem:[#allocation2 + $0x38] sm:$0xf] }
 0x160   : > { %2790 = vmatmul.mubr.bf16.gmra.mxu0 %v3867_v52  ;;  %4229 = vmatprep.subr.bf16.mxu1 %v4380_v3  ;;  %v2112_v36 = vor.u32 %v2111_v41, %v2108_v33  ;;  %v2117_v56 = vrot.slane %v2115_v38, 5  ;;  %v2125_v57 = vrot.slane %v2123_v47, 5  ;;  %v3808_v2 = vrot.slane %v2167_v43, 9  ;;  %v4383_v43 = vld [vmem:[%s5799_s5 + $0x8] sm:$0xff]   ;;  %v2047_v6 = vld [vmem:[#allocation2 + $0x40] sm:$0xf] }
 0x161   : > { %v2546_v42 = vrot.slane %v2545_v48, 4  ;;  %v2211_v51 = vrot.slane %v5431_v32, 5  ;;  %v3809_v27 = vrot.slane %v2168_v61, 9  ;;  %v2215_v12 = vrot.slane %v5434_v31, 5 }
 0x162   : > { %v2113_v49 = vrot.slane %v2112_v36, 4  ;;  %v2126_v25 = vor.u32 %v2125_v57, %v2122_v30  ;;  %v2553_v55 = vshrl.u32 %v5437_v16, 16  ;;  %v2537_v52 = vsel %vm4688_vm2, %v2532_v50, %v2536_v28 }
 0x163   : > { %v2551_v9 = vsel %vm4688_vm2, %v2546_v42, %v2550_v13  ;;  %v2131_v63 = vrot.slane %v2129_v19, 5  ;;  %4230 = vmatpush3.bf16.msra.mxu1 %v4380_v3  ;;  %v2556_v10 = vshll.u32 %v5437_v16, 16  ;;  %v2216_v8 = vsel %vm5055_vm11, %v3809_v27, %v2215_v12  ;;  %v2823_v19 = vld [vmem:[#allocation2 + $0x18] sm:$0xe]  ;;  %v4384_v42 = vld [vmem:[%s5799_s5] sm:$0xff]  }
 0x164   : > { %v3872_v18 = vcombine.low %v2537_v52, %v2551_v9  ;;  %v2127_v53 = vrot.slane %v2126_v25, 4  ;;  %4231 = vmatprep.subr.bf16.mxu1 %v4381_v11  ;;  %v2562_v23 = vshll.u32 %v5446_v14, 16  ;;  %v2118_v39 = vsel %vm4688_vm2, %v2113_v49, %v2117_v56  ;;  %v2822_v49 = vld [vmem:[#allocation2 + $0x10] sm:$0xe] }
 0x165   : > { %v2212_v3 = vsel %vm5055_vm11, %v3808_v2, %v2211_v51  ;;  %v2555_v38 = vrot.slane %v2553_v55, 4  ;;  %v2558_v29 = vrot.slane %v2556_v10, 5  ;;  %v2134_v41 = vshrl.u32 %v2045_v26, 16 }
 0x166   : > { %2797 = vmatprep.mubr.bf16.mxu0 %v3872_v18  ;;  %v2132_v28 = vsel %vm4688_vm2, %v2127_v53, %v2131_v63  ;;  %v3817_v33 = vcombine.low %v2212_v3, %v2216_v8  ;;  %v2137_v47 = vshll.u32 %v2045_v26, 16  ;;  %v2148_v48 = vshrl.u32 %v2047_v6, 16  ;;  %v4428_v18 = vld [vmem:[#allocation2 + $0x48] sm:$0xf] }
 0x167   : > { %v3812_v61 = vcombine.low %v2118_v39, %v2132_v28  ;;  %4232 = vmatpush3.bf16.msra.mxu1 %v4381_v11  ;;  %v2559_v50 = vor.u32 %v2558_v29, %v2555_v38  ;;  %v2151_v30 = vshll.u32 %v2047_v6, 16  ;;  %v2564_v13 = vrot.slane %v2562_v23, 5  ;;  %v2825_v53 = vld [vmem:[#allocation2 + $0x28] sm:$0xe]  ;;  %v2824_v23 = vld [vmem:[#allocation2 + $0x20] sm:$0xe] }
 0x168   : > { %2798 = vmatmul.mubr.bf16.gmra.mxu0 %v3868_v62  ;;  %4233 = vmatprep.subr.bf16.mxu1 %v4383_v43  ;;  %v2136_v36 = vrot.slane %v2134_v41, 4  ;;  %v2139_v56 = vrot.slane %v2137_v47, 5  ;;  %v2143_v57 = vshll.u32 %v5431_v32, 16  ;;  %v2150_v2 = vrot.slane %v2148_v48, 4  ;;  %v2828_v47 = vld [vmem:[#allocation2 + $0x40] sm:$0xe] }
 0x169   : > { %2427 = vmatmul.mubr.bf16.gmra.mxu1 %v3812_v61  ;;  %v2560_v11 = vrot.slane %v2559_v50, 4  ;;  %v2153_v51 = vrot.slane %v2151_v30, 5  ;;  %v2157_v27 = vshll.u32 %v5434_v31, 16  ;;  %v3923_v58 = vrot.slane %v2823_v19, 9  ;;  %v2829_v61 = vld [vmem:[#allocation2 + $0x48] sm:$0xe] }
 0x16a   : > { %2434 = vmatprep.mubr.bf16.mxu1 %v3817_v33  ;;  %v2140_v34 = vor.u32 %v2139_v56, %v2136_v36  ;;  %v2852_v32 = vrot.slane %v5315_v46, 5  ;;  %v3922_v52 = vrot.slane %v2822_v49, 9  ;;  %v2848_v31 = vrot.slane %v5302_v15, 5  ;;  %v2827_v15 = vld [vmem:[#allocation2 + $0x38] sm:$0xe] }
 0x16b   : > { %v2565_v62 = vsel %vm4688_vm2, %v2560_v11, %v2564_v13  ;;  %v2154_v25 = vor.u32 %v2153_v51, %v2150_v2  ;;  %4234 = vmatpush3.bf16.msra.mxu1 %v4383_v43  ;;  %v2145_v9 = vrot.slane %v2143_v57, 5  ;;  %v2159_v10 = vrot.slane %v2157_v27, 5  ;;  %v4386_v11 = vld [vmem:[%s5802_s8 + $0x70] ss:$8 sps:$4 sm:$0xff]   ;;  %v4388_v2 = vld [vmem:[%s5802_s8 + $0x74] ss:$8 sps:$4 sm:$0xff]  }
 0x16c   : > { %v3873_v12 = vcombine.low %v2565_v62, %v2579_v59  ;;  %v2141_v55 = vrot.slane %v2140_v34, 4  ;;  %4235 = vmatprep.subr.bf16.mxu1 %v4384_v42  ;;  %v2853_v26 = vsel %vm5055_vm11, %v3923_v58, %v2852_v32  ;;  %v3869_v46 = vcombine.low %v5437_v16, %v4428_v18  ;;  %v2826_v16 = vld [vmem:[#allocation2 + $0x30] sm:$0xe]  ;;  %3169 = vmatprep.subr.bf16.mxu0 %v4388_v2  ;;  %v4394_v27 = vld [vmem:[%s5802_s8 + $0x54] ss:$8 sps:$4 sm:$0xff]  }
 0x16d   : > { %v2155_v63 = vrot.slane %v2154_v25, 4  ;;  %v2849_v8 = vsel %vm5055_vm11, %v3922_v52, %v2848_v31  ;;  %v2860_v43 = vrot.slane %v5359_v21, 5  ;;  %v3925_v39 = vrot.slane %v2825_v53, 9  ;;  %3170 = vmatpush1.bf16.msra.mxu0 %v4386_v11  ;;  %v4392_v51 = vld [vmem:[%s5802_s8 + $0x50] ss:$8 sps:$4 sm:$0xff]  }
 0x16e   : > { %2805 = vmatprep.mubr.bf16.mxu0 %v3873_v12  ;;  %v2146_v40 = vsel %vm4688_vm2, %v2141_v55, %v2145_v9  ;;  %v3930_v6 = vcombine.low %v2849_v8, %v2853_v26  ;;  %v3927_v3 = vrot.slane %v2827_v15, 9  ;;  %v2868_v44 = vrot.slane %v5413_v54, 5  ;;  %v4429_v54 = vld [vmem:[#allocation2 + $0x4c] sm:$0x1]  ;;  %3171 = vmatprep.subr.bf16.mxu0 %v4391_v4  ;;  %v4395_v49 = vld [vmem:[%s5802_s8 + $0x40] ss:$8 sps:$4 sm:$0xff]  }
 0x16f   : > { %v2160_v7 = vsel %vm4688_vm2, %v2155_v63, %v2159_v10  ;;  %4236 = vmatpush3.bf16.msra.mxu1 %v4384_v42  ;;  %v2856_v38 = vrot.slane %v5352_v60, 5  ;;  %v3924_v29 = vrot.slane %v2824_v23, 9  ;;  %v3926_v28 = vrot.slane %v2826_v16, 9  ;;  %v4397_v34 = vld [vmem:[%s5802_s8 + $0x44] ss:$8 sps:$4 sm:$0xff]  }
 0x170   : > { %v3813_v59 = vcombine.low %v2146_v40, %v2160_v7  ;;  %2806 = vmatmul.mubr.bf16.gmra.mxu0 %v3869_v46  ;;  %v2864_v33 = vrot.slane %v5410_v45, 5  ;;  %v2861_v41 = vsel %vm5055_vm11, %v3925_v39, %v2860_v43  ;;  %v2869_v21 = vsel %vm5055_vm11, %v3927_v3, %v2868_v44  ;;  %v4398_v58 = vld [vmem:[%s5802_s8 + $0x30] ss:$8 sps:$4 sm:$0xff]   ;;  %v4400_v62 = vld [vmem:[%s5802_s8 + $0x34] ss:$8 sps:$4 sm:$0xff]  }
 0x171   : > { %3201 = vmatprep.mubr.bf16.mxu0 %v5811_v35  ;;  %v2857_v50 = vsel %vm5055_vm11, %v3924_v29, %v2856_v38  ;;  %v2876_v30 = vrot.slane %v4429_v54, 5  ;;  %v3928_v13 = vrot.slane %v2828_v47, 9  ;;  %v2872_v45 = vrot.slane %v5446_v14, 5  ;;  %v4389_v14 = vld [vmem:[%s5802_s8 + $0x60] ss:$8 sps:$4 sm:$0xff]  }
 0x172   : > { %2435 = vmatmul.mubr.bf16.gmra.mxu1 %v3813_v59  ;;  %v3931_v48 = vcombine.low %v2857_v50, %v2861_v41  ;;  %v2865_v60 = vsel %vm5055_vm11, %v3926_v28, %v2864_v33  ;;  %v3929_v36 = vrot.slane %v2829_v61, 9  ;;  %3172 = vmatpush1.bf16.msra.mxu0 %v4389_v14  ;;  %v4401_v25 = vld [vmem:[%s5802_s8 + $0x20] ss:$8 sps:$4 sm:$0xff]   ;;  %v4403_v32 = vld [vmem:[%s5802_s8 + $0x24] ss:$8 sps:$4 sm:$0xff]  }
 0x173   : > { %4237 = vmatprep.mubr.bf16.mxu1 %v3930_v6  ;;  %v3932_v19 = vcombine.low %v2865_v60, %v2869_v21  ;;  %v2873_v56 = vsel %vm5055_vm11, %v3928_v13, %v2872_v45  ;;  %3173 = vmatprep.subr.bf16.mxu0 %v4394_v27  ;;  %v4404_v12 = vld [vmem:[%s5802_s8 + $0x10] ss:$8 sps:$4 sm:$0xff]   ;;  %v4406_v55 = vld [vmem:[%s5802_s8 + $0x14] ss:$8 sps:$4 sm:$0xff]   ;;  %v4407_v52 = vld [vmem:[%s5802_s8] ss:$8 sps:$4 sm:$0xff]  }
 0x174   : > { %v2877_v57 = vsel %vm5055_vm11, %v3929_v36, %v2876_v30  ;;  %v4409_v31 = vld [vmem:[%s5802_s8 + $0x4] ss:$8 sps:$4 sm:$0xff]  }
 0x175   : > { %v3933_v42 = vcombine.low %v2873_v56, %v2877_v57 }
 0x176   : > { %3174 = vmatpush1.bf16.msra.mxu0 %v4392_v51 }
 0x177   : > { %3175 = vmatprep.subr.bf16.mxu0 %v4397_v34 }
 0x17a   : > { %4238 = vmatmul.mubr.bf16.vlgmr.msra.gmra.mxu1 %v3931_v48  ;;  %3176 = vmatpush1.bf16.msra.mxu0 %v4395_v49 }
 0x17b   : > { %4241 = vmatprep.mubr.bf16.mxu1 %v3932_v19  ;;  %3177 = vmatprep.subr.bf16.mxu0 %v4400_v62 }
 0x17e   : > { %3178 = vmatpush1.bf16.msra.mxu0 %v4398_v58 }
 0x17f   : > { %3179 = vmatprep.subr.bf16.mxu0 %v4403_v32 }
 0x182   : > { %4242 = vmatmul.mubr.bf16.gmra.mxu1 %v3933_v42  ;;  %3180 = vmatpush1.bf16.msra.mxu0 %v4401_v25 }
 0x183   : > { %3181 = vmatprep.subr.bf16.mxu0 %v4406_v55 }
 0x186   : > { %3182 = vmatpush1.bf16.msra.mxu0 %v4404_v12 }
 0x187   : > { %3183 = vmatprep.subr.bf16.mxu0 %v4409_v31 }
 0x18a   : > { %3184 = vmatpush1.bf16.msra.mxu0 %v4407_v52 }
 0x1dd   : > { %v4043_v9 = vpop.f32.mrf.mxu1 }
 0x1df   : > { %v4044_v63 = vpop.f32.mrf.mxu1 }
 0x1e0   : > { %v4045_v37 = vadd.f32 %v4044_v63, %v4043_v9 }
 0x1e1   : > { %v5559_v10 = vpop.f32.mrf.mxu1 }
 0x1e3   : > { %v4047_v46 = vpop.f32.mrf.mxu1 }
 0x1e5   : > { %v4083_v26 = vpop.f32.mrf.mxu0 }
 0x1e7   : > { %v4084_v18 = vpop.f32.mrf.mxu0 }
 0x1e8   : > { %v4085_v35 = vadd.f32 %v4084_v18, %v4083_v26 }
 0x1e9   : > { %v4086_v53 = vpop.f32.mrf.mxu0 }
 0x1ea   : > { %v2003_v5 = vadd.f32 %v4085_v35, %v4045_v37 }
 0x1eb   : > { %v4087_v15 = vpop.f32.mrf.mxu0 }
 0x1ec   : > { %v5561_v40 = vpop.f32.mrf.mxu1  ;;  %v4088_v17 = vadd.f32 %v4087_v15, %v4086_v53 }
 0x1ee   : > { %v5563_v7 = vpop.f32.mrf.mxu1 }
 0x1ef   : > { %v4051_v18 = vadd.f32 %v5563_v7, %v5561_v40 }
 0x1f0   : > { %v4052_v59 = vpop.f32.mrf.mxu1 }
 0x1f2   : > { %v4053_v23 = vpop.f32.mrf.mxu1 }
 0x1f4   : > { %v4089_v8 = vpop.f32.mrf.mxu0 }
 0x1f6   : > { %v4090_v43 = vpop.f32.mrf.mxu0 }
 0x1f8   : > { %v4092_v39 = vpop.f32.mrf.mxu0 }
 0x1f9   : > { %v5565_v6 = vpop.f32.mrf.mxu1 }
 0x1fa   : > { %v4093_v3 = vpop.f32.mrf.mxu0 }
 0x1fb   : > { %v5567_v16 = vpop.f32.mrf.mxu1  ;;  %v4094_v0 = vadd.f32 %v4093_v3, %v4092_v39 }
 0x1fd   : > { %v5569_v44 = vpop.f32.mrf.mxu1 }
 0x1ff   : > { %v5573_v29 = vpop.f32.mrf.mxu1 }
 0x202   : > { %v5571_v38 = vpop.f32.mrf.mxu0 }
 0x204   : > { %v5575_v28 = vpop.f32.mrf.mxu0 }
 0x206   : > { %v5577_v33 = vpop.f32.mrf.mxu0 }
 0x207   : > { %v5579_v41 = vpop.f32.mrf.mxu1 }
 0x208   : > { %5851 = vst [vmem:[#allocation18_spill] sm:$0xff] %v5579_v41  ;;  %v5583_v47 = vpop.f32.mrf.mxu0  ;;  %v4048_v41 = vadd.f32 %v4047_v46, %v5559_v10 }
 0x209   : > { %v5581_v21 = vpop.f32.mrf.mxu1 }
 0x20a   : > { %5852 = vst [vmem:[#allocation19_spill] sm:$0xff] %v5581_v21  ;;  %v2006_v9 = vadd.f32 %v4088_v17, %v4048_v41 }
 0x20b   : > { %v5585_v61 = vpop.f32.mrf.mxu1 }
 0x20c   : > { %5853 = vst [vmem:[#allocation20_spill] sm:$0xff] %v5585_v61 }
 0x20d   : > { %v5587_v50 = vpop.f32.mrf.mxu1 }
 0x20e   : > { %5854 = vst [vmem:[#allocation21_spill] sm:$0xff] %v5587_v50 }
 0x20f   : > { %v5589_v48 = vpop.f32.mrf.mxu0 }
 0x210   : > { %5855 = vst [vmem:[#allocation22_spill] sm:$0xff] %v5589_v48  ;;  %v4091_v48 = vadd.f32 %v4090_v43, %v4089_v8  ;;  %v4100_v43 = vadd.f32 %v5583_v47, %v5577_v33 }
 0x211   : > { %v5591_v60 = vpop.f32.mrf.mxu0 }
 0x212   : > { %5856 = vst [vmem:[#allocation23_spill] sm:$0xff] %v5591_v60  ;;  %v4123_v54 = vpop.f32.mrf.mxu1  ;;  %v4054_v60 = vadd.f32 %v4053_v23, %v4052_v59  ;;  %v2011_v35 = vadd.f32 %v4091_v48, %v4051_v18  ;;  %v4097_v48 = vadd.f32 %v5575_v28, %v5571_v38 }
 0x213   : > { %v5593_v30 = vpop.f32.mrf.mxu0 }
 0x214   : > { %v4124_v19 = vpop.f32.mrf.mxu1  ;;  %v2014_v63 = vadd.f32 %v4094_v0, %v4054_v60 }
 0x215   : > { %v5595_v13 = vpop.f32.mrf.mxu0  ;;  %v4125_v22 = vadd.f32 %v4124_v19, %v4123_v54 }
 0x216   : > { %5857 = vst [vmem:[#allocation24_spill] sm:$0xff] %v5595_v13  ;;  %v4126_v45 = vpop.f32.mrf.mxu1 }
 0x217   : > { %v4163_v36 = vpop.f32.mrf.mxu0  ;;  %v2443_v13 = vadd.f32 %v4125_v22, %v2003_v5  ;;  %v5613_v22 = vld [vmem:[%s5800_s6] ss:$0 sm:$0xff] }
 0x218   : > { %v4127_v57 = vpop.f32.mrf.mxu1 }
 0x219   : > { %v4164_v56 = vpop.f32.mrf.mxu0 }
 0x21a   : > { %v4165_v21 = vadd.f32 %v4164_v56, %v4163_v36  ;;  %v4060_v36 = vadd.f32 %v5573_v29, %v5569_v44 }
 0x21b   : > { %v4166_v42 = vpop.f32.mrf.mxu0 }
 0x21c   : > { %v2814_v37 = vadd.f32 %v4165_v21, %v2443_v13  ;;  %v2022_v28 = vadd.f32 %v4100_v43, %v4060_v36 }
 0x21d   : > { %v4167_v11 = vpop.f32.mrf.mxu0  ;;  %v5859_v29 = vld [vmem:[#allocation24_spill] sm:$0xff] }
 0x21e   : > { %v4129_v2 = vpop.f32.mrf.mxu1  ;;  %v4168_v39 = vadd.f32 %v4167_v11, %v4166_v42 }
 0x220   : > { %v4130_v14 = vpop.f32.mrf.mxu1  ;;  %v4169_v4 = vpop.f32.mrf.mxu0 }
 0x221   : > { %v4131_v15 = vadd.f32 %v4130_v14, %v4129_v2 }
 0x222   : > { %v4132_v51 = vpop.f32.mrf.mxu1  ;;  %v4170_v27 = vpop.f32.mrf.mxu0 }
 0x223   : > { %v4171_v8 = vadd.f32 %v4170_v27, %v4169_v4  ;;  %v2445_v0 = vadd.f32 %v4131_v15, %v2011_v35  ;;  %v4106_v27 = vadd.f32 %v5859_v29, %v5593_v30  ;;  %v4417_v29 = vld [vmem:[%s5805_s11 + $0x20] sm:$0xff]  }
 0x224   : > { %v4172_v49 = vpop.f32.mrf.mxu0  ;;  %v4133_v34 = vpop.f32.mrf.mxu1 }
 0x225   : > { %v4134_v26 = vadd.f32 %v4133_v34, %v4132_v51  ;;  %v2816_v60 = vadd.f32 %v4171_v8, %v2445_v0 }
 0x226   : > { %v4173_v58 = vpop.f32.mrf.mxu0 }
 0x227   : > { %v4174_v3 = vadd.f32 %v4173_v58, %v4172_v49  ;;  %v2446_v59 = vadd.f32 %v4134_v26, %v2014_v63  ;;  %v5863_v26 = vld [vmem:[#allocation23_spill] sm:$0xff] }
 0x228   : > { %v5597_v32 = vpop.f32.mrf.mxu0 }
 0x229   : > { %v4135_v62 = vpop.f32.mrf.mxu1  ;;  %v2817_v7 = vadd.f32 %v4174_v3, %v2446_v59  ;;  %v5865_v3 = vld [vmem:[#allocation19_spill] sm:$0xff] }
 0x22a   : > { %v4176_v52 = vpop.f32.mrf.mxu0 }
 0x22b   : > { %v4136_v25 = vpop.f32.mrf.mxu1 }
 0x22c   : > { %v4178_v24 = vpop.f32.mrf.mxu0  ;;  %v4137_v47 = vadd.f32 %v4136_v25, %v4135_v62 }
 0x22d   : > { %v4138_v12 = vpop.f32.mrf.mxu1 }
 0x22e   : > { %v4179_v50 = vpop.f32.mrf.mxu0 }
 0x22f   : > { %v4139_v55 = vpop.f32.mrf.mxu1  ;;  %v4180_v2 = vadd.f32 %v4179_v50, %v4178_v24  ;;  %v5861_v24 = vld [vmem:[#allocation21_spill] sm:$0xff] }
 0x230   : > { %v5608_v54 = vpop.f32.mrf.mxu0  ;;  %v4140_v56 = vadd.f32 %v4139_v55, %v4138_v12  ;;  %v5860_v55 = vld [vmem:[#allocation20_spill] sm:$0xff] }
 0x231   : > { %v4066_v50 = vadd.f32 %v5861_v24, %v5860_v55  ;;  %v4425_v55 = vld [vmem:[%s5805_s11] sm:$0xff]   ;;  %v3244_v24 = vlaneseq }
 0x232   : > { %v5599_v31 = vpop.f32.mrf.mxu1  ;;  %v4182_v41 = vpop.f32.mrf.mxu0  ;;  %v2448_v49 = vadd.f32 %v4140_v56, %v2022_v28 }
 0x233   : > { %5858 = vst [vmem:[#allocation25_spill] sm:$0xff] %v5599_v31  ;;  %v4128_v31 = vadd.f32 %v4127_v57, %v4126_v45  ;;  %v4057_v45 = vadd.f32 %v5567_v16, %v5565_v6  ;;  %v3943_v57 = vld [vmem:[%s5801_s7] ss:$0 sm:$0xff]  ;;  %v4177_v6 = vadd.f32 %v4176_v52, %v5597_v32  ;;  %v2030_v35 = vadd.f32 %v4106_v27, %v4066_v50  ;;  %v4418_v27 = vld [vmem:[%s5805_s11 + $0x58] sm:$0xff]  }
 0x234   : > { %v5601_v20 = vpop.f32.mrf.mxu1  ;;  %v4184_v14 = vpop.f32.mrf.mxu0  ;;  %v2819_v52 = vadd.f32 %v4180_v2, %v2448_v49  ;;  %v4419_v49 = vld [vmem:[%s5805_s11 + $0x18] sm:$0xff]   ;;  %v3245_v50 = vshrl.u32 %v3244_v24, 7 }
 0x235   : > { %v2444_v46 = vadd.f32 %v4128_v31, %v2006_v9  ;;  %v2019_v51 = vadd.f32 %v4097_v48, %v4057_v45  ;;  %v5862_v31 = vld [vmem:[#allocation22_spill] sm:$0xff] }
 0x236   : > { %v5603_v1 = vpop.f32.mrf.mxu1  ;;  %v4103_v18 = vadd.f32 %v5863_v26, %v5862_v31  ;;  %v4185_v32 = vpop.f32.mrf.mxu0  ;;  %v3246_v26 = vsub.s32 0, %v3245_v50 }
 0x237   : > { %v2815_v23 = vadd.f32 %v4168_v39, %v2444_v46  ;;  %v2447_v58 = vadd.f32 %v4137_v47, %v2019_v51  ;;  %v5864_v39 = vld [vmem:[#allocation18_spill] sm:$0xff] }
 0x238   : > { %v4145_v61 = vpop.f32.mrf.mxu1  ;;  %v4411_v51 = vld [vmem:[%s5805_s11 + $0x38] sm:$0xff]  }
 0x239   : > { %v4146_v63 = vadd.f32 %v4145_v61, %v5603_v1  ;;  %v2818_v15 = vadd.f32 %v4177_v6, %v2447_v58  ;;  %v4183_v1 = vadd.f32 %v4182_v41, %v5608_v54  ;;  %v4414_v6 = vld [vmem:[%s5805_s11 + $0x68] sm:$0xff]   ;;  %v4421_v58 = vld [vmem:[%s5805_s11 + $0x10] sm:$0xff]  }
 0x23a   : > { %v4239_v53 = vpop.f32.mrf.mxu1  ;;  %v5866_v46 = vld [vmem:[#allocation25_spill] sm:$0xff] }
 0x23b   : > { %v3025_v42 = vadd.f32 %v4239_v53, %v2816_v60  ;;  %v4143_v59 = vadd.f32 %v5601_v20, %v5866_v46 }
 0x23c   : > { %v2992_v10 = vpop.f32.mrf.mxu1 }
 0x23d   : > { %v3023_v5 = vadd.f32 %v2992_v10, %v2814_v37  ;;  %v3040_v62 = vmul.f32 %v5613_v22, %v3025_v42  ;;  %v4063_v37 = vadd.f32 %v5865_v3, %v5864_v39 }
 0x23e   : > { %v4240_v17 = vpop.f32.mrf.mxu1 }
 0x23f   : > { %v3038_v40 = vmul.f32 %v5613_v22, %v3023_v5  ;;  %v3026_v19 = vadd.f32 %v4240_v17, %v2817_v7  ;;  %v3055_v8 = vadd.f32 %v3943_v57, %v3040_v62  ;;  %v4186_v5 = vadd.f32 %v4185_v32, %v4184_v14  ;;  %v4422_v62 = vld [vmem:[%s5805_s11 + $0x48] sm:$0xff]  }
 0x240   : > { %v2995_v21 = vpop.f32.mrf.mxu1  ;;  %v2027_v0 = vadd.f32 %v4103_v18, %v4063_v37  ;;  %v2450_v7 = vadd.f32 %v4146_v63, %v2030_v35  ;;  %v3242_v18 = vld [vmem:[%s5803_s9] sm:$0x3] }
 0x241   : > { %v3024_v13 = vadd.f32 %v2995_v21, %v2815_v23  ;;  %v3053_v11 = vadd.f32 %v3943_v57, %v3038_v40  ;;  %v3041_v16 = vmul.f32 %v5613_v22, %v3026_v19  ;;  %v5867_v40 = vmov 0  }
 0x242   : > { %v4243_v33 = vpop.f32.mrf.mxu1  ;;  %v2449_v43 = vadd.f32 %v4143_v59, %v2027_v0  ;;  %v3063_v21 = vmax.f32 %v3055_v8, 0.0  ;;  %v2821_v60 = vadd.f32 %v4186_v5, %v2450_v7  ;;  %v5701_v63 = vrot.slane %v3242_v18, %v3246_v26  ;;  %v5868_v0 = vld [vmem:[#allocation11_spill] sm:$0xff] }
 0x243   : > { %v3039_v38 = vmul.f32 %v5613_v22, %v3024_v13  ;;  %v3061_v25 = vmax.f32 %v3053_v11, 0.0  ;;  %v3056_v53 = vadd.f32 %v3943_v57, %v3041_v16  ;;  %v4415_v16 = vld [vmem:[%s5805_s11 + $0x28] sm:$0xff]  }
 0x244   : > { %v3008_v4 = vpop.f32.mrf.mxu1  ;;  %v2820_v19 = vadd.f32 %v4183_v1, %v2449_v43 }
 0x245   : > { %v3054_v44 = vadd.f32 %v3943_v57, %v3039_v38  ;;  %v3027_v17 = vadd.f32 %v3008_v4, %v2818_v15  ;;  %v3064_v61 = vmax.f32 %v3056_v53, 0.0  ;;  %v3270_v53 = vld [vmem:[%s5804_s10] sm:$0x3] }
 0x246   : > { %v4244_v34 = vpop.f32.mrf.mxu1  ;;  %v3029_v36 = vadd.f32 %v4243_v33, %v2820_v19  ;;  %v4410_v33 = vld [vmem:[%s5805_s11 + $0x78] sm:$0xff]   ;;  %v5710_v35 = vrot.slane %v3270_v53, %v3246_v26  ;;  %v5870_v19 = vld [vmem:[#allocation12_spill] sm:$0xff] }
 0x247   : > { %v3062_v12 = vmax.f32 %v3054_v44, 0.0  ;;  %v3042_v48 = vmul.f32 %v5613_v22, %v3027_v17  ;;  %v3030_v20 = vadd.f32 %v4244_v34, %v2821_v60  ;;  %v3070_v45 = vpack.c.bf16 %v3064_v61, %v3063_v21  ;;  %4199 = vmatprep.subr.bf16.mxu1 %v4410_v33  ;;  %v4416_v44 = vld [vmem:[%s5805_s11 + $0x60] sm:$0xff]   ;;  %v4420_v34 = vld [vmem:[%s5805_s11 + $0x50] sm:$0xff]  }
 0x248   : > { %v3011_v9 = vpop.f32.mrf.mxu1  ;;  %v3044_v41 = vmul.f32 %v5613_v22, %v3029_v36  ;;  %4200 = vmatpush3.bf16.msra.mxu1 %v4411_v51 }
 0x249   : > { %v3069_v30 = vpack.c.bf16 %v3062_v12, %v3061_v25  ;;  %v3028_v10 = vadd.f32 %v3011_v9, %v2819_v52  ;;  %v3057_v56 = vadd.f32 %v3943_v57, %v3042_v48  ;;  %v3045_v47 = vmul.f32 %v5613_v22, %v3030_v20  ;;  %v4423_v25 = vld [vmem:[%s5805_s11 + $0x8] sm:$0xff]   ;;  %v4424_v12 = vld [vmem:[%s5805_s11 + $0x40] sm:$0xff]  }
 0x24a   : > { %v3059_v28 = vadd.f32 %v3943_v57, %v3044_v41  ;;  %v3250_v52 = vsub.s32 1, %v3245_v50  ;;  %v3301_v48 = vunpack.c.h.bf16 %v5868_v0  ;;  %v3302_v20 = vunpack.c.l.bf16 %v5870_v19 }
 0x24b   : > { %3202 = vmatmul.mubr.bf16.vlgmr.msra.gmra.mxu0 %v3069_v30  ;;  %v3043_v23 = vmul.f32 %v5613_v22, %v3028_v10  ;;  %v3065_v42 = vmax.f32 %v3057_v56, 0.0  ;;  %v3060_v11 = vadd.f32 %v3943_v57, %v3045_v47  ;;  %v4412_v22 = vld [vmem:[%s5805_s11 + $0x70] sm:$0xff]  }
 0x24c   : > { %3211 = vmatprep.mubr.bf16.mxu0 %v5867_v40  ;;  %v3067_v14 = vmax.f32 %v3059_v28, 0.0  ;;  %4201 = vmatprep.subr.bf16.mxu1 %v4412_v22  ;;  %v5706_v15 = vrot.slane %v3242_v18, %v3250_v52  ;;  %v5715_v5 = vrot.slane %v3270_v53, %v3250_v52 }
 0x24d   : > { %v3058_v13 = vadd.f32 %v3943_v57, %v3043_v23  ;;  %v3068_v2 = vmax.f32 %v3060_v11, 0.0  ;;  %v4413_v57 = vld [vmem:[%s5805_s11 + $0x30] sm:$0xff]  }
 0x24e   : > { %4202 = vmatpush3.bf16.msra.mxu1 %v4413_v57  ;;  %v5869_v23 = vld [vmem:[#allocation10_spill] sm:$0xff] }
 0x24f   : > { %v3066_v54 = vmax.f32 %v3058_v13, 0.0  ;;  %v3072_v4 = vpack.c.bf16 %v3068_v2, %v3067_v14  ;;  %4203 = vmatprep.subr.bf16.mxu1 %v4414_v6  ;;  %v3298_v43 = vunpack.c.l.bf16 %v5869_v23  ;;  %v3299_v56 = vunpack.c.h.bf16 %v5869_v23  ;;  %v5872_v6 = vld [vmem:[#allocation14_spill] sm:$0xff] }
 0x251   : > { %v3071_v38 = vpack.c.bf16 %v3066_v54, %v3065_v42  ;;  %v3303_v42 = vunpack.c.h.bf16 %v5870_v19 }
 0x252   : > { %4204 = vmatpush3.bf16.msra.mxu1 %v4415_v16  ;;  %v3306_v16 = vunpack.c.l.bf16 %v5872_v6 }
 0x253   : > { %3212 = vmatmul.mubr.bf16.gmra.mxu0 %v3070_v45  ;;  %4205 = vmatprep.subr.bf16.mxu1 %v4416_v44 }
 0x254   : > { %3221 = vmatprep.mubr.bf16.mxu0 %v5867_v40 }
 0x256   : > { %4206 = vmatpush3.bf16.msra.mxu1 %v4417_v29 }
 0x257   : > { %4207 = vmatprep.subr.bf16.mxu1 %v4418_v27 }
 0x25a   : > { %4208 = vmatpush3.bf16.msra.mxu1 %v4419_v49 }
 0x25b   : > { %3222 = vmatmul.mubr.bf16.gmra.mxu0 %v3071_v38  ;;  %4209 = vmatprep.subr.bf16.mxu1 %v4420_v34  ;;  %v5871_v38 = vld [vmem:[#allocation13_spill] sm:$0xff] }
 0x25c   : > { %3231 = vmatprep.mubr.bf16.mxu0 %v5867_v40  ;;  %v3300_v40 = vunpack.c.l.bf16 %v5868_v0  ;;  %v3304_v28 = vunpack.c.l.bf16 %v5871_v38  ;;  %v3305_v57 = vunpack.c.h.bf16 %v5871_v38 }
 0x25e   : > { %4210 = vmatpush3.bf16.msra.mxu1 %v4421_v58 }
 0x25f   : > { %4211 = vmatprep.subr.bf16.mxu1 %v4422_v62 }
 0x262   : > { %4212 = vmatpush3.bf16.msra.mxu1 %v4423_v25  ;;  %v3307_v25 = vunpack.c.h.bf16 %v5872_v6 }
 0x263   : > { %3232 = vmatmul.mubr.bf16.gmra.mxu0 %v3072_v4  ;;  %4213 = vmatprep.subr.bf16.mxu1 %v4424_v12 }
 0x266   : > { %4214 = vmatpush3.bf16.msra.mxu1 %v4425_v55  ;;  %v5873_v55 = vld [vmem:[#allocation15_spill] sm:$0xff] }
 0x267   : > { %v3308_v24 = vunpack.c.l.bf16 %v5873_v55 }
 0x30b   : > { %v3203_v31 = vpop.f32.mrf.mxu0 }
 0x30c   : > { %v3254_v37 = vmul.f32 %v5701_v63, %v3203_v31 }
 0x30d   : > { %v3205_v32 = vpop.f32.mrf.mxu0 }
 0x30e   : > { %v3255_v8 = vmul.f32 %v5706_v15, %v3205_v32  ;;  %v3282_v61 = vadd.f32 %v5710_v35, %v3254_v37  ;;  %v3309_v37 = vunpack.c.h.bf16 %v5873_v55 }
 0x30f   : > { %v3207_v9 = vpop.f32.mrf.mxu0 }
 0x310   : > { %v3256_v39 = vmul.f32 %v5701_v63, %v3207_v9  ;;  %v3283_v36 = vadd.f32 %v5715_v5, %v3255_v8  ;;  %v3314_v14 = vadd.f32 %v3298_v43, %v3282_v61 }
 0x311   : > { %v3209_v30 = vpop.f32.mrf.mxu0 }
 0x312   : > { %v3257_v10 = vmul.f32 %v5706_v15, %v3209_v30  ;;  %v3284_v17 = vadd.f32 %v5710_v35, %v3256_v39  ;;  %v3315_v29 = vadd.f32 %v3299_v56, %v3283_v36  ;;  %v3330_v50 = vmax.f32 %v3314_v14, 0.0 }
 0x313   : > { %v3213_v3 = vpop.f32.mrf.mxu0 }
 0x314   : > { %v3258_v46 = vmul.f32 %v5701_v63, %v3213_v3  ;;  %v3285_v21 = vadd.f32 %v5715_v5, %v3257_v10  ;;  %v3316_v47 = vadd.f32 %v3300_v40, %v3284_v17  ;;  %v3331_v30 = vmax.f32 %v3315_v29, 0.0 }
 0x315   : > { %v3215_v59 = vpop.f32.mrf.mxu0 }
 0x316   : > { %v3259_v7 = vmul.f32 %v5706_v15, %v3215_v59  ;;  %v3286_v60 = vadd.f32 %v5710_v35, %v3258_v46  ;;  %v3317_v4 = vadd.f32 %v3301_v48, %v3285_v21  ;;  %v3332_v27 = vmax.f32 %v3316_v47, 0.0 }
 0x317   : > { %v3217_v1 = vpop.f32.mrf.mxu0 }
 0x318   : > { %v3260_v13 = vmul.f32 %v5701_v63, %v3217_v1  ;;  %v3287_v41 = vadd.f32 %v5715_v5, %v3259_v7  ;;  %v3318_v51 = vadd.f32 %v3302_v20, %v3286_v60  ;;  %v3333_v31 = vmax.f32 %v3317_v4, 0.0  ;;  %v5874_v1 = vld [vmem:[#allocation16_spill] sm:$0xff] }
 0x319   : > { %v3219_v45 = vpop.f32.mrf.mxu0  ;;  %v3346_v39 = vadd.f32 %v3332_v27, %v3330_v50  ;;  %v3310_v61 = vunpack.c.l.bf16 %v5874_v1 }
 0x31a   : > { %v3261_v54 = vmul.f32 %v5706_v15, %v3219_v45  ;;  %v3288_v11 = vadd.f32 %v5710_v35, %v3260_v13  ;;  %v3319_v58 = vadd.f32 %v3303_v42, %v3287_v41  ;;  %v3334_v32 = vmax.f32 %v3318_v51, 0.0  ;;  %v5875_v45 = vld [vmem:[#allocation17_spill] sm:$0xff] }
 0x31b   : > { %v3223_v2 = vpop.f32.mrf.mxu0  ;;  %v3359_v0 = vadd.f32 %v3333_v31, %v3331_v30  ;;  %v3311_v13 = vunpack.c.h.bf16 %v5874_v1  ;;  %v3312_v36 = vunpack.c.l.bf16 %v5875_v45 }
 0x31c   : > { %v3262_v33 = vmul.f32 %v5701_v63, %v3223_v2  ;;  %v3289_v22 = vadd.f32 %v5715_v5, %v3261_v54  ;;  %v3320_v62 = vadd.f32 %v3304_v28, %v3288_v11  ;;  %v3335_v10 = vmax.f32 %v3319_v58, 0.0 }
 0x31d   : > { %v3225_v44 = vpop.f32.mrf.mxu0  ;;  %v3347_v23 = vadd.f32 %v3346_v39, %v3334_v32 }
 0x31e   : > { %v3290_v49 = vadd.f32 %v5710_v35, %v3262_v33  ;;  %v3263_v34 = vmul.f32 %v5706_v15, %v3225_v44  ;;  %v3321_v52 = vadd.f32 %v3305_v57, %v3289_v22  ;;  %v3336_v46 = vmax.f32 %v3320_v62, 0.0 }
 0x31f   : > { %v3227_v12 = vpop.f32.mrf.mxu0  ;;  %v3360_v56 = vadd.f32 %v3359_v0, %v3335_v10  ;;  %v3313_v22 = vunpack.c.h.bf16 %v5875_v45 }
 0x320   : > { %v3291_v26 = vadd.f32 %v5715_v5, %v3263_v34  ;;  %v3264_v18 = vmul.f32 %v5701_v63, %v3227_v12  ;;  %v3322_v9 = vadd.f32 %v3306_v16, %v3290_v49  ;;  %v3337_v43 = vmax.f32 %v3321_v52, 0.0 }
 0x321   : > { %v3229_v53 = vpop.f32.mrf.mxu0  ;;  %v3348_v47 = vadd.f32 %v3347_v23, %v3336_v46 }
 0x322   : > { %v3292_v3 = vadd.f32 %v5710_v35, %v3264_v18  ;;  %v3323_v59 = vadd.f32 %v3307_v25, %v3291_v26  ;;  %v3265_v8 = vmul.f32 %v5706_v15, %v3229_v53  ;;  %v3338_v21 = vmax.f32 %v3322_v9, 0.0 }
 0x323   : > { %v3233_v17 = vpop.f32.mrf.mxu0  ;;  %v3361_v14 = vadd.f32 %v3360_v56, %v3337_v43 }
 0x324   : > { %v3324_v40 = vadd.f32 %v3308_v24, %v3292_v3  ;;  %v3266_v7 = vmul.f32 %v5701_v63, %v3233_v17  ;;  %v3293_v48 = vadd.f32 %v5715_v5, %v3265_v8  ;;  %v3339_v54 = vmax.f32 %v3323_v59, 0.0 }
 0x325   : > { %v3235_v60 = vpop.f32.mrf.mxu0  ;;  %v3349_v4 = vadd.f32 %v3348_v47, %v3338_v21 }
 0x326   : > { %v3294_v19 = vadd.f32 %v5710_v35, %v3266_v7  ;;  %v3267_v20 = vmul.f32 %v5706_v15, %v3235_v60  ;;  %v3325_v41 = vadd.f32 %v3309_v37, %v3293_v48  ;;  %v3340_v11 = vmax.f32 %v3324_v40, 0.0 }
 0x327   : > { %v3237_v42 = vpop.f32.mrf.mxu0  ;;  %v3362_v29 = vadd.f32 %v3361_v14, %v3339_v54 }
 0x328   : > { %v3326_v38 = vadd.f32 %v3310_v61, %v3294_v19  ;;  %v3295_v28 = vadd.f32 %v5715_v5, %v3267_v20  ;;  %v3268_v2 = vmul.f32 %v5701_v63, %v3237_v42  ;;  %v3341_v33 = vmax.f32 %v3325_v41, 0.0 }
 0x329   : > { %v3239_v51 = vpop.f32.mrf.mxu0  ;;  %v3350_v27 = vadd.f32 %v3349_v4, %v3340_v11 }
 0x32a   : > { %v3342_v57 = vmax.f32 %v3326_v38, 0.0  ;;  %v3327_v6 = vadd.f32 %v3311_v13, %v3295_v28  ;;  %v3296_v16 = vadd.f32 %v5710_v35, %v3268_v2  ;;  %v3269_v44 = vmul.f32 %v5706_v15, %v3239_v51 }
 0x32b   : > { %v3363_v62 = vadd.f32 %v3362_v29, %v3341_v33 }
 0x32c   : > { %v3343_v49 = vmax.f32 %v3327_v6, 0.0  ;;  %v3328_v34 = vadd.f32 %v3312_v36, %v3296_v16  ;;  %v3297_v58 = vadd.f32 %v5715_v5, %v3269_v44  ;;  %v3351_v63 = vadd.f32 %v3350_v27, %v3342_v57 }
 0x32e   : > { %v3344_v25 = vmax.f32 %v3328_v34, 0.0  ;;  %v3329_v12 = vadd.f32 %v3313_v22, %v3297_v58  ;;  %v3364_v55 = vadd.f32 %v3363_v62, %v3343_v49 }
 0x330   : > { %v3352_v24 = vadd.f32 %v3351_v63, %v3344_v25  ;;  %v3345_v50 = vmax.f32 %v3329_v12, 0.0 }
 0x332   : > { %v3353_v31 = vrot.slane %v3352_v24, 4  ;;  %v3365_v26 = vadd.f32 %v3364_v55, %v3345_v50 }
 0x334   : > { %v3354_v18 = vadd.f32 %v3353_v31, %v3352_v24  ;;  %v3366_v32 = vrot.slane %v3365_v26, 4 }
 0x336   : > { %v3355_v35 = vrot.slane %v3354_v18, 2  ;;  %v3367_v52 = vadd.f32 %v3366_v32, %v3365_v26 }
 0x338   : > { %v3356_v15 = vadd.f32 %v3355_v35, %v3354_v18  ;;  %v3368_v9 = vrot.slane %v3367_v52, 2 }
 0x33a   : > { %v3357_v53 = vrot.slane %v3356_v15, 1  ;;  %v3369_v30 = vadd.f32 %v3368_v9, %v3367_v52 }
 0x33c   : > { %v3370_v39 = vrot.slane %v3369_v30, 1  ;;  %v3358_v5 = vadd.f32 %v3357_v53, %v3356_v15 }
 0x33e   : > { %v3371_v3 = vadd.f32 %v3370_v39, %v3369_v30  ;;  %v3373_v37 = vmul.f32 0.015625, %v3358_v5 }
 0x340   : > { %v3374_v10 = vmul.f32 0.015625, %v3371_v3  ;;  %v3375_v59 = vpack.c.bf16 %v3373_v37, %v3373_v37 }
 0x342   : > { %v3376_v46 = vpack.c.bf16 %v3374_v10, %v3374_v10 }
 0x344   : > { %3537 = vmatprep.mubr.bf16.mxu1 %v3376_v46 }
 0x345   : > { %3538 = vmatmul.mubr.bf16.vlgmr.msra.gmra.mxu1 %v3375_v59 }
 0x405   : > { %v4215_v8 = vpop.f32.mrf.mxu1 }
 0x407   : > { %v4216_v17 = vpop.f32.mrf.mxu1 }
 0x408   : > { %v4217_v0 = vadd.f32 %v4216_v17, %v4215_v8 }
 0x409   : > { %v4218_v40 = vpop.f32.mrf.mxu1 }
 0x40a   : > { %v3545_v7 = vmul.f32 0.5, %v4217_v0 }
 0x40b   : > { %v4219_v1 = vpop.f32.mrf.mxu1 }
 0x40c   : > { %4426 = vtanh.f32 %v3545_v7 }
 0x419   : > { %v4427_v61 = vpop.eup %4426 }
 0x41a   : > { %v3547_v23 = vadd.f32 1.0, %v4427_v61 }
 0x41c   : > { %v3548_v43 = vmul.f32 0.5, %v3547_v23 }
 0x41e   : > { %3549 = vst [vmem:[%s408_s30] sm:$0x1] %v3548_v43 }
 0x41f   : > { %4443 = shalt.err (!%p4440_p3)
}
 0x420   : > { %s4444_s15 = scalar_lea.hbm %s3561_s14, 16  ;;  %s4448_s18 = scalar_lea.hbm %s5806_s12, 32 }
 0x421   : > { %p4445_p4 = scmp.ne.s32.totalorder %s3561_s14, %s4444_s15  ;;  %p4449_p9 = scmp.lt.s32.totalorder %s3561_s14, %s5806_s12 }
 0x422   : > { %p4450_p10 = scmp.lt.s32.totalorder %s4448_s18, %s4444_s15 }
 0x423   : > { %p4446_p7 = pnand %p4445_p4, %p4597_p5 }
 0x424   : > { %p4451_p11 = por %p4450_p10, %p4449_p9 }
 0x425   : > { %p4447_p8 = pneg %p4446_p7 }
 0x427   : > { %p4452_p12 = pnand %p4451_p11, %p4447_p8 }
 0x429   : > { %4455 = shalt.err (!%p4452_p12)
}
 0x42a   : > { %4246 = dma.vmem_to_hbm [thread:$0]  (%p4597_p5), %s3564_s17, 16, %s3561_s14, %s3551_s20  }
 0x42b PF: > { %p4252_p13 = scmp.ge.s32.totalorder %s4490_s24, 2  ;;  %s3575_s26 = sand.u32 1, %s4478_s21  }
 0x42c   : > { %s3576_s28 = scalar_lea.sflag [#allocation4], %s3575_s26 }
 0x42d   : > { %p4249_p0 = pnand %p4252_p13, %p4601_p6 }
 0x42f   : > { %p4250_p1 = pneg %p4249_p0 }
 0x431   : > { %4473 = dma.done.wait (%p4250_p1), %s3576_s28, 16  }
 0x432   : > { %4475 = vsyncadd (%p4250_p1), %s3576_s28, 4294967280  ;;  %s5877_s24 = sld [smem:[#allocation7_spill]]  ;;  %s5880_s21 = smov %s4482_s22 }
 0x433   : > { %s5878_s29 = sld [smem:[#allocation6_spill]] }
 0x434   : > { %s5879_s23 = sld [smem:[#allocation8_spill]] }
 0x438   : > { %p22_p2 = scmp.ge.s32.totalorder %s5877_s24, 4  }
 0x439   : > { %s5881_s22 = smov %s5878_s29 }
 0x43a   :  { %24 = sbr.rel (!%p22_p2) target bundleno = 3 (0x3), region = 113 }
 0x43f   :  { %3580 = vsyncpa [#allocation4], 1 }
 0x440   :  { %3582 = vsyncpa [#allocation4 + $0x1], 1 }

</bundles_post_ra>
